<compile_context>
chip_gen: v6e
topology: v6e:2x2x1
jax: 0.10.0
libtpu: 0.0.40
codegen_flags: <defaults>
</compile_context>

<pallas_src>
import functools

import jax
import jax.numpy as jnp
from jax.experimental import pallas as pl
from jax.experimental.pallas import tpu as pltpu

_VMEM_LIMIT = 32 * 1024 * 1024


def _round_up(x, m):
    return (x + m - 1) // m * m


# ----------------------------------------------------------------------------
# Kernel 1: batched 3x3 conv (stride-1 on the padded grid) + bias (+ LeakyReLU)
# as ONE tap-stacked matmul.
#   x_ref : (Cin, L)        bf16  zero-padded frame(s), flat (y*Wp + x) + guard
#   w_ref : (Cout, 9*Cin)   bf16  columns ordered (tap j = dy*3+dx, cin)
#   b_ref : (Cout, 1)       f32
#   o_ref : (Cout, Lc)      bf16/f32  conv value at every padded-grid start
# ----------------------------------------------------------------------------
def _conv3x3_kernel(x_ref, w_ref, b_ref, o_ref, *, wp, lc, leaky):
    # Upcast once; build the stacked operand with 8-row-aligned f32 sublane
    # concatenation (robust lowering), downcast once for the MXU.
    x = x_ref[...].astype(jnp.float32)
    xs = jnp.concatenate(
        [x[:, (j // 3) * wp + (j % 3):(j // 3) * wp + (j % 3) + lc]
         for j in range(9)],
        axis=0).astype(jnp.bfloat16)                     # (9*Cin, Lc)
    acc = jnp.dot(w_ref[...], xs, preferred_element_type=jnp.float32)
    acc = acc + b_ref[...]
    if leaky:
        acc = jnp.where(acc > 0, acc, 0.2 * acc)         # LeakyReLU(0.2)
    o_ref[...] = acc.astype(o_ref.dtype)


def _conv3x3(x, w_mat, b2, *, wp, lc, leaky, out_dtype):
    """x: (F, Cin, L) bf16 -> (F, Cout, Lc); grid over F ("parallel")."""
    f, cin, l = x.shape
    cout = w_mat.shape[0]
    return pl.pallas_call(
        functools.partial(_conv3x3_kernel, wp=wp, lc=lc, leaky=leaky),
        out_shape=jax.ShapeDtypeStruct((f, cout, lc), out_dtype),
        grid=(f,),
        in_specs=[
            pl.BlockSpec((None, cin, l), lambda i: (i, 0, 0)),
            pl.BlockSpec((cout, 9 * cin), lambda i: (0, 0)),
            pl.BlockSpec((cout, 1), lambda i: (0, 0)),
        ],
        out_specs=pl.BlockSpec((None, cout, lc), lambda i: (i, 0, 0)),
        compiler_params=pltpu.CompilerParams(
            dimension_semantics=("parallel",),
            vmem_limit_bytes=_VMEM_LIMIT),
    )(x, w_mat, b2)


def conv_stage(frames, w, b, stride):
    """3x3 conv (pad=1) + LeakyReLU(0.2) per frame.

    frames: (F, Cin, H, W) -> (F, Cout, Hout, Wout) bf16
    """
    f, cin, hh, ww = frames.shape
    cout = w.shape[0]
    assert w.shape == (cout, cin, 3, 3)
    cin_p = _round_up(cin, 8)                 # 8-row-aligned concat pieces
    if cin_p != cin:
        frames = jnp.pad(frames, ((0, 0), (0, cin_p - cin), (0, 0), (0, 0)))
        w = jnp.pad(w, ((0, 0), (0, cin_p - cin), (0, 0), (0, 0)))
    hp, wp = hh + 2, ww + 2
    mpf = hp * wp
    lcf = _round_up(mpf, 128)                 # lane-dense compute width
    lf = _round_up(lcf + 2 * wp + 2, 128)     # + zero guard for shifted reads

    xp = jnp.pad(frames, ((0, 0), (0, 0), (1, 1), (1, 1))).reshape(f, cin_p, mpf)
    xp = jnp.pad(xp, ((0, 0), (0, 0), (0, lf - mpf))).astype(jnp.bfloat16)
    w_mat = w.transpose(0, 2, 3, 1).reshape(cout, 9 * cin_p).astype(jnp.bfloat16)
    b2 = b.reshape(cout, 1).astype(jnp.float32)

    y = _conv3x3(xp, w_mat, b2, wp=wp, lc=lcf, leaky=True,
                 out_dtype=jnp.bfloat16)                  # (F, Cout, Lc)
    hout = (hh + 2 - 3) // stride + 1
    wout = (ww + 2 - 3) // stride + 1
    yg = y[:, :, :mpf].reshape(f, cout, hp, wp)
    # stride-s output(yo,xo) == stride-1 padded-grid value at (s*yo, s*xo)
    return yg[:, :, 0:stride * hout:stride, 0:stride * wout:stride]


# ----------------------------------------------------------------------------
# Kernel 2: ConvLSTM recurrence.  Only the Wh*h gate conv runs inside the
# sequential loop (tap-stacked, K = 9*hidden); the Wx*x_t + b pre-gates arrive
# precomputed per timestep.  h lives in bf16 VMEM scratch in padded-flat layout
# (stored index = conv-grid index q + d, d = Wp+1); c in f32 conv-grid layout.
# ----------------------------------------------------------------------------
def _convlstm_kernel(pg_ref, wh_ref, m_ref, o_ref, h_ref, c_ref,
                     *, hidden, wp, lc):
    t = pl.program_id(0)

    @pl.when(t == 0)
    def _init():
        h_ref[...] = jnp.zeros_like(h_ref)
        c_ref[...] = jnp.zeros_like(c_ref)

    hf = h_ref[...].astype(jnp.float32)               # one upcast per step
    hs = jnp.concatenate(
        [hf[:, (j // 3) * wp + (j % 3):(j // 3) * wp + (j % 3) + lc]
         for j in range(9)],
        axis=0).astype(jnp.bfloat16)                  # (9*hidden, Lc)
    gates = pg_ref[...] + jnp.dot(wh_ref[...], hs,
                                  preferred_element_type=jnp.float32)

    i_g = jax.nn.sigmoid(gates[0 * hidden:1 * hidden, :])
    f_g = jax.nn.sigmoid(gates[1 * hidden:2 * hidden, :])
    g_g = jnp.tanh(gates[2 * hidden:3 * hidden, :])
    o_g = jax.nn.sigmoid(gates[3 * hidden:4 * hidden, :])

    mask = m_ref[...]                                 # 1 inside image, else 0
    c_new = (f_g * c_ref[...] + i_g * g_g) * mask
    h_new = (o_g * jnp.tanh(c_new)) * mask
    c_ref[...] = c_new
    d = wp + 1                                        # conv-grid q -> stored q+d
    h_ref[:, d:d + lc] = h_new.astype(jnp.bfloat16)
    o_ref[...] = h_new.astype(o_ref.dtype)


def convlstm_stage(y5, w, b, hidden):
    """ConvLSTM(k=3, pad=1) over a sequence.

    y5: (S, B, Cin, H, W) -> (S, B, hidden, H, W) bf16
    """
    s, bsz, cin, hh, ww = y5.shape
    g = 4 * hidden
    assert w.shape == (g, cin + hidden, 3, 3)
    assert cin % 8 == 0 and hidden % 8 == 0
    hp, wp = hh + 2, ww + 2
    mp = bsz * hp * wp
    lc = _round_up(mp, 128)
    l = _round_up(lc + 2 * wp + 2, 128)

    # x_t in padded-flat, channel-sublane layout: flat = b*Hp*Wp + y*Wp + x.
    xp = jnp.pad(y5, ((0, 0), (0, 0), (0, 0), (1, 1), (1, 1)))
    x_seq = jnp.transpose(xp, (0, 2, 1, 3, 4)).reshape(s, cin, mp)
    x_seq = jnp.pad(x_seq, ((0, 0), (0, 0), (0, l - mp))).astype(jnp.bfloat16)

    # Hoisted weight reorg (once per stage).
    wx_mat = w[:, :cin].transpose(0, 2, 3, 1).reshape(g, 9 * cin).astype(jnp.bfloat16)
    wh_mat = w[:, cin:].transpose(0, 2, 3, 1).reshape(g, 9 * hidden).astype(jnp.bfloat16)
    b2 = b.reshape(g, 1).astype(jnp.float32)

    # Pre-gates Wx*x_t + b for every timestep: one parallel, pipelined GEMM call.
    pregate = _conv3x3(x_seq, wx_mat, b2, wp=wp, lc=lc, leaky=False,
                       out_dtype=jnp.float32)             # (S, G, Lc) f32

    # Validity mask over the conv grid (keeps the h zero-padding ring intact).
    q = jnp.arange(lc)
    rem = q % (hp * wp)
    mask = ((q < mp) & (rem // wp < hh) & (rem % wp < ww))
    mask = mask.astype(jnp.float32).reshape(1, lc)

    out = pl.pallas_call(
        functools.partial(_convlstm_kernel, hidden=hidden, wp=wp, lc=lc),
        out_shape=jax.ShapeDtypeStruct((s, hidden, lc), jnp.bfloat16),
        grid=(s,),
        in_specs=[
            pl.BlockSpec((None, g, lc), lambda t: (t, 0, 0)),     # pre-gate_t
            pl.BlockSpec((g, 9 * hidden), lambda t: (0, 0)),      # Wh
            pl.BlockSpec((1, lc), lambda t: (0, 0)),              # mask
        ],
        out_specs=pl.BlockSpec((None, hidden, lc), lambda t: (t, 0, 0)),
        scratch_shapes=[
            pltpu.VMEM((hidden, l), jnp.bfloat16),   # h (padded-flat + guard)
            pltpu.VMEM((hidden, lc), jnp.float32),   # c (conv-grid layout)
        ],
        compiler_params=pltpu.CompilerParams(
            dimension_semantics=("arbitrary",),
            vmem_limit_bytes=_VMEM_LIMIT),
    )(pregate, wh_mat, mask)

    h_seq = out[:, :, :mp].reshape(s, hidden, bsz, hp, wp)[:, :, :, :hh, :ww]
    return jnp.transpose(h_seq, (0, 2, 1, 3, 4))          # (S, B, hidden, H, W)


# ----------------------------------------------------------------------------
# Encoder forward (matches the PyTorch module's stage loop).
# ----------------------------------------------------------------------------
def encoder_forward(x, stages):
    """x: (B, S, C, H, W) -> output of the last rnn stage, (S, B, C', H', W')."""
    seq = jnp.transpose(x, (1, 0, 2, 3, 4))               # inputs.transpose(0, 1)
    for st in stages:
        assert st["padding"] == 1 and st["conv_w"].shape[2:] == (3, 3)
        s, b, c, hh, ww = seq.shape
        frames = seq.reshape(s * b, c, hh, ww)
        y = conv_stage(frames, st["conv_w"], st["conv_b"], st["stride"])
        _, cout, ho, wo = y.shape
        y5 = y.reshape(s, b, cout, ho, wo)
        seq = convlstm_stage(y5, st["rnn_w"], st["rnn_b"], st["hidden"])
    return seq.astype(jnp.float32)


# ----------------------------------------------------------------------------
# Deterministic parameter construction + demo
# ----------------------------------------------------------------------------
def make_params():
    key = jax.random.PRNGKey(0)
    ks = jax.random.split(key, 8)

    def w(k, shape, scale=0.1):
        return (scale * jax.random.normal(k, shape)).astype(jnp.float32)

    # Stage 1: conv1_leaky_1 [4, 8, 3, 1, 1]  + ConvLSTM(input=8,  hidden=8,  k=3)
    # Stage 2: conv2_leaky_1 [8, 16, 3, 2, 1] + ConvLSTM(input=16, hidden=16, k=3)
    stage1 = dict(
        conv_w=w(ks[0], (8, 4, 3, 3)), conv_b=w(ks[1], (8,)),
        stride=1, padding=1, hidden=8,
        rnn_w=w(ks[2], (4 * 8, 8 + 8, 3, 3)), rnn_b=w(ks[3], (4 * 8,)),
    )
    stage2 = dict(
        conv_w=w(ks[4], (16, 8, 3, 3)), conv_b=w(ks[5], (16,)),
        stride=2, padding=1, hidden=16,
        rnn_w=w(ks[6], (4 * 16, 16 + 16, 3, 3)), rnn_b=w(ks[7], (4 * 16,)),
    )
    return [stage1, stage2]


if __name__ == "__main__":
    B, S, C, H, W = 2, 4, 4, 16, 16
    x = jax.random.normal(jax.random.PRNGKey(0), (B, S, C, H, W), dtype=jnp.float32)
    stages = make_params()
    fwd = jax.jit(lambda inp: encoder_forward(inp, stages))
    out = jax.block_until_ready(fwd(x))
    assert out.shape == (S, B, 16, 8, 8), out.shape
    assert bool(jnp.all(jnp.isfinite(out)))
    print("KERNEL_OK")
</pallas_src>

<mosaic_0001>
module attributes {stable_mosaic.version = 11 : i64} {
  func.func @_conv3x3_kernel(%arg0: i32, %arg1: memref<1x8x512xbf16, #tpu.memory_space<vmem>>, %arg2: memref<8x72xbf16, #tpu.memory_space<vmem>>, %arg3: memref<8x1xf32, #tpu.memory_space<vmem>>, %arg4: memref<1x8x384xbf16, #tpu.memory_space<vmem>>) attributes {dimension_semantics = [#tpu.dimension_semantics<parallel>], iteration_bounds = array<i64: 8>, scalar_prefetch = 0 : i64, scratch_operands = 0 : i64, tpu.core_type = #tpu.core_type<tc>, window_params = [{transform_indices = @transform_0, window_bounds = array<i64: 1, 8, 512>}, {pipeline_mode = #tpu.pipeline_mode<synchronous>, transform_indices = @transform_1, window_bounds = array<i64: 8, 72>}, {pipeline_mode = #tpu.pipeline_mode<synchronous>, transform_indices = @transform_2, window_bounds = array<i64: 8, 1>}, {transform_indices = @transform_3, window_bounds = array<i64: 1, 8, 384>}]} {
    %c0 = arith.constant 0 : index
    %c0_0 = arith.constant 0 : index
    %c0_1 = arith.constant 0 : index
    %0 = vector.load %arg1[%c0, %c0_0, %c0_1] : memref<1x8x512xbf16, #tpu.memory_space<vmem>>, vector<1x8x512xbf16>
    %1 = vector.shape_cast %0 : vector<1x8x512xbf16> to vector<8x512xbf16>
    %2 = arith.extf %1 : vector<8x512xbf16> to vector<8x512xf32>
    %3 = vector.extract_strided_slice %2 {offsets = [0, 0], sizes = [8, 384], strides = [1, 1]} : vector<8x512xf32> to vector<8x384xf32>
    %4 = vector.extract_strided_slice %2 {offsets = [0, 1], sizes = [8, 384], strides = [1, 1]} : vector<8x512xf32> to vector<8x384xf32>
    %5 = vector.extract_strided_slice %2 {offsets = [0, 2], sizes = [8, 384], strides = [1, 1]} : vector<8x512xf32> to vector<8x384xf32>
    %6 = vector.extract_strided_slice %2 {offsets = [0, 18], sizes = [8, 384], strides = [1, 1]} : vector<8x512xf32> to vector<8x384xf32>
    %7 = vector.extract_strided_slice %2 {offsets = [0, 19], sizes = [8, 384], strides = [1, 1]} : vector<8x512xf32> to vector<8x384xf32>
    %8 = vector.extract_strided_slice %2 {offsets = [0, 20], sizes = [8, 384], strides = [1, 1]} : vector<8x512xf32> to vector<8x384xf32>
    %9 = vector.extract_strided_slice %2 {offsets = [0, 36], sizes = [8, 384], strides = [1, 1]} : vector<8x512xf32> to vector<8x384xf32>
    %10 = vector.extract_strided_slice %2 {offsets = [0, 37], sizes = [8, 384], strides = [1, 1]} : vector<8x512xf32> to vector<8x384xf32>
    %11 = vector.extract_strided_slice %2 {offsets = [0, 38], sizes = [8, 384], strides = [1, 1]} : vector<8x512xf32> to vector<8x384xf32>
    %12 = tpu.concatenate %3, %4, %5, %6, %7, %8, %9, %10, %11 in 0 : vector<8x384xf32>, vector<8x384xf32>, vector<8x384xf32>, vector<8x384xf32>, vector<8x384xf32>, vector<8x384xf32>, vector<8x384xf32>, vector<8x384xf32>, vector<8x384xf32> -> vector<72x384xf32>
    %13 = arith.truncf %12 : vector<72x384xf32> to vector<72x384xbf16>
    %c0_2 = arith.constant 0 : index
    %c0_3 = arith.constant 0 : index
    %14 = vector.load %arg2[%c0_2, %c0_3] : memref<8x72xbf16, #tpu.memory_space<vmem>>, vector<8x72xbf16>
    %cst = arith.constant dense<0.000000e+00> : vector<8x384xf32>
    %15 = tpu.matmul %14, %13, %cst {dimension_numbers = #tpu.dot_dimension_numbers<[1], [0], [0], [1], [0, 0, 1, 1], [], []>} : vector<8x72xbf16>, vector<72x384xbf16>, vector<8x384xf32> -> vector<8x384xf32>
    %c0_4 = arith.constant 0 : index
    %c0_5 = arith.constant 0 : index
    %16 = vector.load %arg3[%c0_4, %c0_5] : memref<8x1xf32, #tpu.memory_space<vmem>>, vector<8x1xf32>
    %17 = vector.broadcast %16 : vector<8x1xf32> to vector<8x384xf32>
    %18 = arith.addf %15, %17 : vector<8x384xf32>
    %cst_6 = arith.constant 0.000000e+00 : f32
    %19 = vector.broadcast %cst_6 : f32 to vector<8x384xf32>
    %20 = arith.cmpf ogt, %18, %19 : vector<8x384xf32>
    %cst_7 = arith.constant 2.000000e-01 : f32
    %21 = vector.broadcast %cst_7 : f32 to vector<8x384xf32>
    %22 = arith.mulf %21, %18 : vector<8x384xf32>
    %23 = arith.select %20, %18, %22 : vector<8x384xi1>, vector<8x384xf32>
    %24 = arith.truncf %23 : vector<8x384xf32> to vector<8x384xbf16>
    %c0_8 = arith.constant 0 : index
    %c0_9 = arith.constant 0 : index
    %c0_10 = arith.constant 0 : index
    %25 = vector.load %arg4[%c0_8, %c0_9, %c0_10] : memref<1x8x384xbf16, #tpu.memory_space<vmem>>, vector<1x8x384xbf16>
    %26 = vector.shape_cast %25 : vector<1x8x384xbf16> to vector<8x384xbf16>
    %27 = vector.shape_cast %24 : vector<8x384xbf16> to vector<1x8x384xbf16>
    tpu.vector_store %arg4[%c0_8, %c0_9, %c0_10], %27 {strides = array<i32>} : memref<1x8x384xbf16, #tpu.memory_space<vmem>>, vector<1x8x384xbf16>,
    return
  }
  func.func @transform_0(%arg0: i32) -> (i32, i32, i32) {
    %c0_i32 = arith.constant 0 : i32
    %c0_i32_0 = arith.constant 0 : i32
    %c0_i32_1 = arith.constant 0 : i32
    return %arg0, %c0_i32, %c0_i32_0 : i32, i32, i32
  }
  func.func @transform_1(%arg0: i32) -> (i32, i32) {
    %c0_i32 = arith.constant 0 : i32
    %c0_i32_0 = arith.constant 0 : i32
    %c0_i32_1 = arith.constant 0 : i32
    return %c0_i32, %c0_i32_0 : i32, i32
  }
  func.func @transform_2(%arg0: i32) -> (i32, i32) {
    %c0_i32 = arith.constant 0 : i32
    %c0_i32_0 = arith.constant 0 : i32
    %c0_i32_1 = arith.constant 0 : i32
    return %c0_i32, %c0_i32_0 : i32, i32
  }
  func.func @transform_3(%arg0: i32) -> (i32, i32, i32) {
    %c0_i32 = arith.constant 0 : i32
    %c0_i32_0 = arith.constant 0 : i32
    %c0_i32_1 = arith.constant 0 : i32
    return %arg0, %c0_i32, %c0_i32_0 : i32, i32, i32
  }
}

module attributes {stable_mosaic.version = 11 : i64} {
  func.func @_conv3x3_kernel(%arg0: i32, %arg1: memref<1x8x896xbf16, #tpu.memory_space<vmem>>, %arg2: memref<32x72xbf16, #tpu.memory_space<vmem>>, %arg3: memref<32x1xf32, #tpu.memory_space<vmem>>, %arg4: memref<1x32x768xf32, #tpu.memory_space<vmem>>) attributes {dimension_semantics = [#tpu.dimension_semantics<parallel>], iteration_bounds = array<i64: 4>, scalar_prefetch = 0 : i64, scratch_operands = 0 : i64, tpu.core_type = #tpu.core_type<tc>, window_params = [{transform_indices = @transform_0, window_bounds = array<i64: 1, 8, 896>}, {pipeline_mode = #tpu.pipeline_mode<synchronous>, transform_indices = @transform_1, window_bounds = array<i64: 32, 72>}, {pipeline_mode = #tpu.pipeline_mode<synchronous>, transform_indices = @transform_2, window_bounds = array<i64: 32, 1>}, {transform_indices = @transform_3, window_bounds = array<i64: 1, 32, 768>}]} {
    %c0 = arith.constant 0 : index
    %c0_0 = arith.constant 0 : index
    %c0_1 = arith.constant 0 : index
    %0 = vector.load %arg1[%c0, %c0_0, %c0_1] : memref<1x8x896xbf16, #tpu.memory_space<vmem>>, vector<1x8x896xbf16>
    %1 = vector.shape_cast %0 : vector<1x8x896xbf16> to vector<8x896xbf16>
    %2 = arith.extf %1 : vector<8x896xbf16> to vector<8x896xf32>
    %3 = vector.extract_strided_slice %2 {offsets = [0, 0], sizes = [8, 768], strides = [1, 1]} : vector<8x896xf32> to vector<8x768xf32>
    %4 = vector.extract_strided_slice %2 {offsets = [0, 1], sizes = [8, 768], strides = [1, 1]} : vector<8x896xf32> to vector<8x768xf32>
    %5 = vector.extract_strided_slice %2 {offsets = [0, 2], sizes = [8, 768], strides = [1, 1]} : vector<8x896xf32> to vector<8x768xf32>
    %6 = vector.extract_strided_slice %2 {offsets = [0, 18], sizes = [8, 768], strides = [1, 1]} : vector<8x896xf32> to vector<8x768xf32>
    %7 = vector.extract_strided_slice %2 {offsets = [0, 19], sizes = [8, 768], strides = [1, 1]} : vector<8x896xf32> to vector<8x768xf32>
    %8 = vector.extract_strided_slice %2 {offsets = [0, 20], sizes = [8, 768], strides = [1, 1]} : vector<8x896xf32> to vector<8x768xf32>
    %9 = vector.extract_strided_slice %2 {offsets = [0, 36], sizes = [8, 768], strides = [1, 1]} : vector<8x896xf32> to vector<8x768xf32>
    %10 = vector.extract_strided_slice %2 {offsets = [0, 37], sizes = [8, 768], strides = [1, 1]} : vector<8x896xf32> to vector<8x768xf32>
    %11 = vector.extract_strided_slice %2 {offsets = [0, 38], sizes = [8, 768], strides = [1, 1]} : vector<8x896xf32> to vector<8x768xf32>
    %12 = tpu.concatenate %3, %4, %5, %6, %7, %8, %9, %10, %11 in 0 : vector<8x768xf32>, vector<8x768xf32>, vector<8x768xf32>, vector<8x768xf32>, vector<8x768xf32>, vector<8x768xf32>, vector<8x768xf32>, vector<8x768xf32>, vector<8x768xf32> -> vector<72x768xf32>
    %13 = arith.truncf %12 : vector<72x768xf32> to vector<72x768xbf16>
    %c0_2 = arith.constant 0 : index
    %c0_3 = arith.constant 0 : index
    %14 = vector.load %arg2[%c0_2, %c0_3] : memref<32x72xbf16, #tpu.memory_space<vmem>>, vector<32x72xbf16>
    %cst = arith.constant dense<0.000000e+00> : vector<32x768xf32>
    %15 = tpu.matmul %14, %13, %cst {dimension_numbers = #tpu.dot_dimension_numbers<[1], [0], [0], [1], [0, 0, 1, 1], [], []>} : vector<32x72xbf16>, vector<72x768xbf16>, vector<32x768xf32> -> vector<32x768xf32>
    %c0_4 = arith.constant 0 : index
    %c0_5 = arith.constant 0 : index
    %16 = vector.load %arg3[%c0_4, %c0_5] : memref<32x1xf32, #tpu.memory_space<vmem>>, vector<32x1xf32>
    %17 = vector.broadcast %16 : vector<32x1xf32> to vector<32x768xf32>
    %18 = arith.addf %15, %17 : vector<32x768xf32>
    %c0_6 = arith.constant 0 : index
    %c0_7 = arith.constant 0 : index
    %c0_8 = arith.constant 0 : index
    %19 = vector.load %arg4[%c0_6, %c0_7, %c0_8] : memref<1x32x768xf32, #tpu.memory_space<vmem>>, vector<1x32x768xf32>
    %20 = vector.shape_cast %19 : vector<1x32x768xf32> to vector<32x768xf32>
    %21 = vector.shape_cast %18 : vector<32x768xf32> to vector<1x32x768xf32>
    tpu.vector_store %arg4[%c0_6, %c0_7, %c0_8], %21 {strides = array<i32>} : memref<1x32x768xf32, #tpu.memory_space<vmem>>, vector<1x32x768xf32>,
    return
  }
  func.func @transform_0(%arg0: i32) -> (i32, i32, i32) {
    %c0_i32 = arith.constant 0 : i32
    %c0_i32_0 = arith.constant 0 : i32
    %c0_i32_1 = arith.constant 0 : i32
    return %arg0, %c0_i32, %c0_i32_0 : i32, i32, i32
  }
  func.func @transform_1(%arg0: i32) -> (i32, i32) {
    %c0_i32 = arith.constant 0 : i32
    %c0_i32_0 = arith.constant 0 : i32
    %c0_i32_1 = arith.constant 0 : i32
    return %c0_i32, %c0_i32_0 : i32, i32
  }
  func.func @transform_2(%arg0: i32) -> (i32, i32) {
    %c0_i32 = arith.constant 0 : i32
    %c0_i32_0 = arith.constant 0 : i32
    %c0_i32_1 = arith.constant 0 : i32
    return %c0_i32, %c0_i32_0 : i32, i32
  }
  func.func @transform_3(%arg0: i32) -> (i32, i32, i32) {
    %c0_i32 = arith.constant 0 : i32
    %c0_i32_0 = arith.constant 0 : i32
    %c0_i32_1 = arith.constant 0 : i32
    return %arg0, %c0_i32, %c0_i32_0 : i32, i32, i32
  }
}

module attributes {stable_mosaic.version = 11 : i64} {
  func.func @_convlstm_kernel(%arg0: i32, %arg1: memref<1x32x768xf32, #tpu.memory_space<vmem>>, %arg2: memref<32x72xbf16, #tpu.memory_space<vmem>>, %arg3: memref<1x768xf32, #tpu.memory_space<vmem>>, %arg4: memref<1x8x768xbf16, #tpu.memory_space<vmem>>, %arg5: memref<8x896xbf16, #tpu.memory_space<vmem>>, %arg6: memref<8x768xf32, #tpu.memory_space<vmem>>) attributes {dimension_semantics = [#tpu.dimension_semantics<arbitrary>], iteration_bounds = array<i64: 4>, scalar_prefetch = 0 : i64, scratch_operands = 2 : i64, tpu.core_type = #tpu.core_type<tc>, window_params = [{transform_indices = @transform_0, window_bounds = array<i64: 1, 32, 768>}, {pipeline_mode = #tpu.pipeline_mode<synchronous>, transform_indices = @transform_1, window_bounds = array<i64: 32, 72>}, {pipeline_mode = #tpu.pipeline_mode<synchronous>, transform_indices = @transform_2, window_bounds = array<i64: 1, 768>}, {transform_indices = @transform_3, window_bounds = array<i64: 1, 8, 768>}]} {
    %c0_i32 = arith.constant 0 : i32
    %0 = arith.cmpi eq, %arg0, %c0_i32 : i32
    %1 = arith.extui %0 : i1 to i32
    %c0_i32_0 = arith.constant 0 : i32
    %2 = arith.cmpi ne, %1, %c0_i32_0 : i32
    scf.if %2 {
      %cst_20 = arith.constant 0.000000e+00 : bf16
      %59 = vector.broadcast %cst_20 : bf16 to vector<8x896xbf16>
      %c0_21 = arith.constant 0 : index
      %c0_22 = arith.constant 0 : index
      %60 = vector.load %arg5[%c0_21, %c0_22] : memref<8x896xbf16, #tpu.memory_space<vmem>>, vector<8x896xbf16>
      tpu.vector_store %arg5[%c0_21, %c0_22], %59 {strides = array<i32>} : memref<8x896xbf16, #tpu.memory_space<vmem>>, vector<8x896xbf16>,
      %cst_23 = arith.constant 0.000000e+00 : f32
      %61 = vector.broadcast %cst_23 : f32 to vector<8x768xf32>
      %c0_24 = arith.constant 0 : index
      %c0_25 = arith.constant 0 : index
      %62 = vector.load %arg6[%c0_24, %c0_25] : memref<8x768xf32, #tpu.memory_space<vmem>>, vector<8x768xf32>
      tpu.vector_store %arg6[%c0_24, %c0_25], %61 {strides = array<i32>} : memref<8x768xf32, #tpu.memory_space<vmem>>, vector<8x768xf32>,
    } else {
    }
    %c0 = arith.constant 0 : index
    %c0_1 = arith.constant 0 : index
    %3 = vector.load %arg5[%c0, %c0_1] : memref<8x896xbf16, #tpu.memory_space<vmem>>, vector<8x896xbf16>
    %4 = arith.extf %3 : vector<8x896xbf16> to vector<8x896xf32>
    %5 = vector.extract_strided_slice %4 {offsets = [0, 0], sizes = [8, 768], strides = [1, 1]} : vector<8x896xf32> to vector<8x768xf32>
    %6 = vector.extract_strided_slice %4 {offsets = [0, 1], sizes = [8, 768], strides = [1, 1]} : vector<8x896xf32> to vector<8x768xf32>
    %7 = vector.extract_strided_slice %4 {offsets = [0, 2], sizes = [8, 768], strides = [1, 1]} : vector<8x896xf32> to vector<8x768xf32>
    %8 = vector.extract_strided_slice %4 {offsets = [0, 18], sizes = [8, 768], strides = [1, 1]} : vector<8x896xf32> to vector<8x768xf32>
    %9 = vector.extract_strided_slice %4 {offsets = [0, 19], sizes = [8, 768], strides = [1, 1]} : vector<8x896xf32> to vector<8x768xf32>
    %10 = vector.extract_strided_slice %4 {offsets = [0, 20], sizes = [8, 768], strides = [1, 1]} : vector<8x896xf32> to vector<8x768xf32>
    %11 = vector.extract_strided_slice %4 {offsets = [0, 36], sizes = [8, 768], strides = [1, 1]} : vector<8x896xf32> to vector<8x768xf32>
    %12 = vector.extract_strided_slice %4 {offsets = [0, 37], sizes = [8, 768], strides = [1, 1]} : vector<8x896xf32> to vector<8x768xf32>
    %13 = vector.extract_strided_slice %4 {offsets = [0, 38], sizes = [8, 768], strides = [1, 1]} : vector<8x896xf32> to vector<8x768xf32>
    %14 = tpu.concatenate %5, %6, %7, %8, %9, %10, %11, %12, %13 in 0 : vector<8x768xf32>, vector<8x768xf32>, vector<8x768xf32>, vector<8x768xf32>, vector<8x768xf32>, vector<8x768xf32>, vector<8x768xf32>, vector<8x768xf32>, vector<8x768xf32> -> vector<72x768xf32>
    %15 = arith.truncf %14 : vector<72x768xf32> to vector<72x768xbf16>
    %c0_2 = arith.constant 0 : index
    %c0_3 = arith.constant 0 : index
    %c0_4 = arith.constant 0 : index
    %16 = vector.load %arg1[%c0_2, %c0_3, %c0_4] : memref<1x32x768xf32, #tpu.memory_space<vmem>>, vector<1x32x768xf32>
    %17 = vector.shape_cast %16 : vector<1x32x768xf32> to vector<32x768xf32>
    %c0_5 = arith.constant 0 : index
    %c0_6 = arith.constant 0 : index
    %18 = vector.load %arg2[%c0_5, %c0_6] : memref<32x72xbf16, #tpu.memory_space<vmem>>, vector<32x72xbf16>
    %cst = arith.constant dense<0.000000e+00> : vector<32x768xf32>
    %19 = tpu.matmul %18, %15, %cst {dimension_numbers = #tpu.dot_dimension_numbers<[1], [0], [0], [1], [0, 0, 1, 1], [], []>} : vector<32x72xbf16>, vector<72x768xbf16>, vector<32x768xf32> -> vector<32x768xf32>
    %20 = arith.addf %17, %19 : vector<32x768xf32>
    %21 = vector.extract_strided_slice %20 {offsets = [0, 0], sizes = [8, 768], strides = [1, 1]} : vector<32x768xf32> to vector<8x768xf32>
    %22 = arith.negf %21 : vector<8x768xf32>
    %23 = math.exp %22 : vector<8x768xf32>
    %cst_7 = arith.constant 1.000000e+00 : f32
    %24 = vector.broadcast %cst_7 : f32 to vector<8x768xf32>
    %25 = arith.addf %24, %23 : vector<8x768xf32>
    %26 = arith.divf %24, %25 : vector<8x768xf32>
    %27 = vector.extract_strided_slice %20 {offsets = [8, 0], sizes = [8, 768], strides = [1, 1]} : vector<32x768xf32> to vector<8x768xf32>
    %28 = arith.negf %27 : vector<8x768xf32>
    %29 = math.exp %28 : vector<8x768xf32>
    %cst_8 = arith.constant 1.000000e+00 : f32
    %30 = vector.broadcast %cst_8 : f32 to vector<8x768xf32>
    %31 = arith.addf %30, %29 : vector<8x768xf32>
    %32 = arith.divf %30, %31 : vector<8x768xf32>
    %33 = vector.extract_strided_slice %20 {offsets = [16, 0], sizes = [8, 768], strides = [1, 1]} : vector<32x768xf32> to vector<8x768xf32>
    %34 = math.tanh %33 : vector<8x768xf32>
    %35 = vector.extract_strided_slice %20 {offsets = [24, 0], sizes = [8, 768], strides = [1, 1]} : vector<32x768xf32> to vector<8x768xf32>
    %36 = arith.negf %35 : vector<8x768xf32>
    %37 = math.exp %36 : vector<8x768xf32>
    %cst_9 = arith.constant 1.000000e+00 : f32
    %38 = vector.broadcast %cst_9 : f32 to vector<8x768xf32>
    %39 = arith.addf %38, %37 : vector<8x768xf32>
    %40 = arith.divf %38, %39 : vector<8x768xf32>
    %c0_10 = arith.constant 0 : index
    %c0_11 = arith.constant 0 : index
    %41 = vector.load %arg3[%c0_10, %c0_11] : memref<1x768xf32, #tpu.memory_space<vmem>>, vector<1x768xf32>
    %c0_12 = arith.constant 0 : index
    %c0_13 = arith.constant 0 : index
    %42 = vector.load %arg6[%c0_12, %c0_13] : memref<8x768xf32, #tpu.memory_space<vmem>>, vector<8x768xf32>
    %43 = arith.mulf %32, %42 : vector<8x768xf32>
    %44 = arith.mulf %26, %34 : vector<8x768xf32>
    %45 = arith.addf %43, %44 : vector<8x768xf32>
    %46 = vector.broadcast %41 : vector<1x768xf32> to vector<8x768xf32>
    %47 = arith.mulf %45, %46 : vector<8x768xf32>
    %48 = math.tanh %47 : vector<8x768xf32>
    %49 = arith.mulf %40, %48 : vector<8x768xf32>
    %50 = vector.broadcast %41 : vector<1x768xf32> to vector<8x768xf32>
    %51 = arith.mulf %49, %50 : vector<8x768xf32>
    %c0_14 = arith.constant 0 : index
    %c0_15 = arith.constant 0 : index
    %52 = vector.load %arg6[%c0_14, %c0_15] : memref<8x768xf32, #tpu.memory_space<vmem>>, vector<8x768xf32>
    tpu.vector_store %arg6[%c0_14, %c0_15], %47 {strides = array<i32>} : memref<8x768xf32, #tpu.memory_space<vmem>>, vector<8x768xf32>,
    %53 = arith.truncf %51 : vector<8x768xf32> to vector<8x768xbf16>
    %c0_16 = arith.constant 0 : index
    %c19 = arith.constant 19 : index
    %54 = vector.load %arg5[%c0_16, %c19] : memref<8x896xbf16, #tpu.memory_space<vmem>>, vector<8x768xbf16>
    tpu.vector_store %arg5[%c0_16, %c19], %53 {strides = array<i32>} : memref<8x896xbf16, #tpu.memory_space<vmem>>, vector<8x768xbf16>,
    %55 = arith.truncf %51 : vector<8x768xf32> to vector<8x768xbf16>
    %c0_17 = arith.constant 0 : index
    %c0_18 = arith.constant 0 : index
    %c0_19 = arith.constant 0 : index
    %56 = vector.load %arg4[%c0_17, %c0_18, %c0_19] : memref<1x8x768xbf16, #tpu.memory_space<vmem>>, vector<1x8x768xbf16>
    %57 = vector.shape_cast %56 : vector<1x8x768xbf16> to vector<8x768xbf16>
    %58 = vector.shape_cast %55 : vector<8x768xbf16> to vector<1x8x768xbf16>
    tpu.vector_store %arg4[%c0_17, %c0_18, %c0_19], %58 {strides = array<i32>} : memref<1x8x768xbf16, #tpu.memory_space<vmem>>, vector<1x8x768xbf16>,
    return
  }
  func.func @transform_0(%arg0: i32) -> (i32, i32, i32) {
    %c0_i32 = arith.constant 0 : i32
    %c0_i32_0 = arith.constant 0 : i32
    %c0_i32_1 = arith.constant 0 : i32
    return %arg0, %c0_i32, %c0_i32_0 : i32, i32, i32
  }
  func.func @transform_1(%arg0: i32) -> (i32, i32) {
    %c0_i32 = arith.constant 0 : i32
    %c0_i32_0 = arith.constant 0 : i32
    %c0_i32_1 = arith.constant 0 : i32
    return %c0_i32, %c0_i32_0 : i32, i32
  }
  func.func @transform_2(%arg0: i32) -> (i32, i32) {
    %c0_i32 = arith.constant 0 : i32
    %c0_i32_0 = arith.constant 0 : i32
    %c0_i32_1 = arith.constant 0 : i32
    return %c0_i32, %c0_i32_0 : i32, i32
  }
  func.func @transform_3(%arg0: i32) -> (i32, i32, i32) {
    %c0_i32 = arith.constant 0 : i32
    %c0_i32_0 = arith.constant 0 : i32
    %c0_i32_1 = arith.constant 0 : i32
    return %arg0, %c0_i32, %c0_i32_0 : i32, i32, i32
  }
}

module attributes {stable_mosaic.version = 11 : i64} {
  func.func @_conv3x3_kernel(%arg0: i32, %arg1: memref<1x8x512xbf16, #tpu.memory_space<vmem>>, %arg2: memref<16x72xbf16, #tpu.memory_space<vmem>>, %arg3: memref<16x1xf32, #tpu.memory_space<vmem>>, %arg4: memref<1x16x384xbf16, #tpu.memory_space<vmem>>) attributes {dimension_semantics = [#tpu.dimension_semantics<parallel>], iteration_bounds = array<i64: 8>, scalar_prefetch = 0 : i64, scratch_operands = 0 : i64, tpu.core_type = #tpu.core_type<tc>, window_params = [{transform_indices = @transform_0, window_bounds = array<i64: 1, 8, 512>}, {pipeline_mode = #tpu.pipeline_mode<synchronous>, transform_indices = @transform_1, window_bounds = array<i64: 16, 72>}, {pipeline_mode = #tpu.pipeline_mode<synchronous>, transform_indices = @transform_2, window_bounds = array<i64: 16, 1>}, {transform_indices = @transform_3, window_bounds = array<i64: 1, 16, 384>}]} {
    %c0 = arith.constant 0 : index
    %c0_0 = arith.constant 0 : index
    %c0_1 = arith.constant 0 : index
    %0 = vector.load %arg1[%c0, %c0_0, %c0_1] : memref<1x8x512xbf16, #tpu.memory_space<vmem>>, vector<1x8x512xbf16>
    %1 = vector.shape_cast %0 : vector<1x8x512xbf16> to vector<8x512xbf16>
    %2 = arith.extf %1 : vector<8x512xbf16> to vector<8x512xf32>
    %3 = vector.extract_strided_slice %2 {offsets = [0, 0], sizes = [8, 384], strides = [1, 1]} : vector<8x512xf32> to vector<8x384xf32>
    %4 = vector.extract_strided_slice %2 {offsets = [0, 1], sizes = [8, 384], strides = [1, 1]} : vector<8x512xf32> to vector<8x384xf32>
    %5 = vector.extract_strided_slice %2 {offsets = [0, 2], sizes = [8, 384], strides = [1, 1]} : vector<8x512xf32> to vector<8x384xf32>
    %6 = vector.extract_strided_slice %2 {offsets = [0, 18], sizes = [8, 384], strides = [1, 1]} : vector<8x512xf32> to vector<8x384xf32>
    %7 = vector.extract_strided_slice %2 {offsets = [0, 19], sizes = [8, 384], strides = [1, 1]} : vector<8x512xf32> to vector<8x384xf32>
    %8 = vector.extract_strided_slice %2 {offsets = [0, 20], sizes = [8, 384], strides = [1, 1]} : vector<8x512xf32> to vector<8x384xf32>
    %9 = vector.extract_strided_slice %2 {offsets = [0, 36], sizes = [8, 384], strides = [1, 1]} : vector<8x512xf32> to vector<8x384xf32>
    %10 = vector.extract_strided_slice %2 {offsets = [0, 37], sizes = [8, 384], strides = [1, 1]} : vector<8x512xf32> to vector<8x384xf32>
    %11 = vector.extract_strided_slice %2 {offsets = [0, 38], sizes = [8, 384], strides = [1, 1]} : vector<8x512xf32> to vector<8x384xf32>
    %12 = tpu.concatenate %3, %4, %5, %6, %7, %8, %9, %10, %11 in 0 : vector<8x384xf32>, vector<8x384xf32>, vector<8x384xf32>, vector<8x384xf32>, vector<8x384xf32>, vector<8x384xf32>, vector<8x384xf32>, vector<8x384xf32>, vector<8x384xf32> -> vector<72x384xf32>
    %13 = arith.truncf %12 : vector<72x384xf32> to vector<72x384xbf16>
    %c0_2 = arith.constant 0 : index
    %c0_3 = arith.constant 0 : index
    %14 = vector.load %arg2[%c0_2, %c0_3] : memref<16x72xbf16, #tpu.memory_space<vmem>>, vector<16x72xbf16>
    %cst = arith.constant dense<0.000000e+00> : vector<16x384xf32>
    %15 = tpu.matmul %14, %13, %cst {dimension_numbers = #tpu.dot_dimension_numbers<[1], [0], [0], [1], [0, 0, 1, 1], [], []>} : vector<16x72xbf16>, vector<72x384xbf16>, vector<16x384xf32> -> vector<16x384xf32>
    %c0_4 = arith.constant 0 : index
    %c0_5 = arith.constant 0 : index
    %16 = vector.load %arg3[%c0_4, %c0_5] : memref<16x1xf32, #tpu.memory_space<vmem>>, vector<16x1xf32>
    %17 = vector.broadcast %16 : vector<16x1xf32> to vector<16x384xf32>
    %18 = arith.addf %15, %17 : vector<16x384xf32>
    %cst_6 = arith.constant 0.000000e+00 : f32
    %19 = vector.broadcast %cst_6 : f32 to vector<16x384xf32>
    %20 = arith.cmpf ogt, %18, %19 : vector<16x384xf32>
    %cst_7 = arith.constant 2.000000e-01 : f32
    %21 = vector.broadcast %cst_7 : f32 to vector<16x384xf32>
    %22 = arith.mulf %21, %18 : vector<16x384xf32>
    %23 = arith.select %20, %18, %22 : vector<16x384xi1>, vector<16x384xf32>
    %24 = arith.truncf %23 : vector<16x384xf32> to vector<16x384xbf16>
    %c0_8 = arith.constant 0 : index
    %c0_9 = arith.constant 0 : index
    %c0_10 = arith.constant 0 : index
    %25 = vector.load %arg4[%c0_8, %c0_9, %c0_10] : memref<1x16x384xbf16, #tpu.memory_space<vmem>>, vector<1x16x384xbf16>
    %26 = vector.shape_cast %25 : vector<1x16x384xbf16> to vector<16x384xbf16>
    %27 = vector.shape_cast %24 : vector<16x384xbf16> to vector<1x16x384xbf16>
    tpu.vector_store %arg4[%c0_8, %c0_9, %c0_10], %27 {strides = array<i32>} : memref<1x16x384xbf16, #tpu.memory_space<vmem>>, vector<1x16x384xbf16>,
    return
  }
  func.func @transform_0(%arg0: i32) -> (i32, i32, i32) {
    %c0_i32 = arith.constant 0 : i32
    %c0_i32_0 = arith.constant 0 : i32
    %c0_i32_1 = arith.constant 0 : i32
    return %arg0, %c0_i32, %c0_i32_0 : i32, i32, i32
  }
  func.func @transform_1(%arg0: i32) -> (i32, i32) {
    %c0_i32 = arith.constant 0 : i32
    %c0_i32_0 = arith.constant 0 : i32
    %c0_i32_1 = arith.constant 0 : i32
    return %c0_i32, %c0_i32_0 : i32, i32
  }
  func.func @transform_2(%arg0: i32) -> (i32, i32) {
    %c0_i32 = arith.constant 0 : i32
    %c0_i32_0 = arith.constant 0 : i32
    %c0_i32_1 = arith.constant 0 : i32
    return %c0_i32, %c0_i32_0 : i32, i32
  }
  func.func @transform_3(%arg0: i32) -> (i32, i32, i32) {
    %c0_i32 = arith.constant 0 : i32
    %c0_i32_0 = arith.constant 0 : i32
    %c0_i32_1 = arith.constant 0 : i32
    return %arg0, %c0_i32, %c0_i32_0 : i32, i32, i32
  }
}

module attributes {stable_mosaic.version = 11 : i64} {
  func.func @_conv3x3_kernel(%arg0: i32, %arg1: memref<1x16x384xbf16, #tpu.memory_space<vmem>>, %arg2: memref<64x144xbf16, #tpu.memory_space<vmem>>, %arg3: memref<64x1xf32, #tpu.memory_space<vmem>>, %arg4: memref<1x64x256xf32, #tpu.memory_space<vmem>>) attributes {dimension_semantics = [#tpu.dimension_semantics<parallel>], iteration_bounds = array<i64: 4>, scalar_prefetch = 0 : i64, scratch_operands = 0 : i64, tpu.core_type = #tpu.core_type<tc>, window_params = [{transform_indices = @transform_0, window_bounds = array<i64: 1, 16, 384>}, {pipeline_mode = #tpu.pipeline_mode<synchronous>, transform_indices = @transform_1, window_bounds = array<i64: 64, 144>}, {pipeline_mode = #tpu.pipeline_mode<synchronous>, transform_indices = @transform_2, window_bounds = array<i64: 64, 1>}, {transform_indices = @transform_3, window_bounds = array<i64: 1, 64, 256>}]} {
    %c0 = arith.constant 0 : index
    %c0_0 = arith.constant 0 : index
    %c0_1 = arith.constant 0 : index
    %0 = vector.load %arg1[%c0, %c0_0, %c0_1] : memref<1x16x384xbf16, #tpu.memory_space<vmem>>, vector<1x16x384xbf16>
    %1 = vector.shape_cast %0 : vector<1x16x384xbf16> to vector<16x384xbf16>
    %2 = arith.extf %1 : vector<16x384xbf16> to vector<16x384xf32>
    %3 = vector.extract_strided_slice %2 {offsets = [0, 0], sizes = [16, 256], strides = [1, 1]} : vector<16x384xf32> to vector<16x256xf32>
    %4 = vector.extract_strided_slice %2 {offsets = [0, 1], sizes = [16, 256], strides = [1, 1]} : vector<16x384xf32> to vector<16x256xf32>
    %5 = vector.extract_strided_slice %2 {offsets = [0, 2], sizes = [16, 256], strides = [1, 1]} : vector<16x384xf32> to vector<16x256xf32>
    %6 = vector.extract_strided_slice %2 {offsets = [0, 10], sizes = [16, 256], strides = [1, 1]} : vector<16x384xf32> to vector<16x256xf32>
    %7 = vector.extract_strided_slice %2 {offsets = [0, 11], sizes = [16, 256], strides = [1, 1]} : vector<16x384xf32> to vector<16x256xf32>
    %8 = vector.extract_strided_slice %2 {offsets = [0, 12], sizes = [16, 256], strides = [1, 1]} : vector<16x384xf32> to vector<16x256xf32>
    %9 = vector.extract_strided_slice %2 {offsets = [0, 20], sizes = [16, 256], strides = [1, 1]} : vector<16x384xf32> to vector<16x256xf32>
    %10 = vector.extract_strided_slice %2 {offsets = [0, 21], sizes = [16, 256], strides = [1, 1]} : vector<16x384xf32> to vector<16x256xf32>
    %11 = vector.extract_strided_slice %2 {offsets = [0, 22], sizes = [16, 256], strides = [1, 1]} : vector<16x384xf32> to vector<16x256xf32>
    %12 = tpu.concatenate %3, %4, %5, %6, %7, %8, %9, %10, %11 in 0 : vector<16x256xf32>, vector<16x256xf32>, vector<16x256xf32>, vector<16x256xf32>, vector<16x256xf32>, vector<16x256xf32>, vector<16x256xf32>, vector<16x256xf32>, vector<16x256xf32> -> vector<144x256xf32>
    %13 = arith.truncf %12 : vector<144x256xf32> to vector<144x256xbf16>
    %c0_2 = arith.constant 0 : index
    %c0_3 = arith.constant 0 : index
    %14 = vector.load %arg2[%c0_2, %c0_3] : memref<64x144xbf16, #tpu.memory_space<vmem>>, vector<64x144xbf16>
    %cst = arith.constant dense<0.000000e+00> : vector<64x256xf32>
    %15 = tpu.matmul %14, %13, %cst {dimension_numbers = #tpu.dot_dimension_numbers<[1], [0], [0], [1], [0, 0, 1, 1], [], []>} : vector<64x144xbf16>, vector<144x256xbf16>, vector<64x256xf32> -> vector<64x256xf32>
    %c0_4 = arith.constant 0 : index
    %c0_5 = arith.constant 0 : index
    %16 = vector.load %arg3[%c0_4, %c0_5] : memref<64x1xf32, #tpu.memory_space<vmem>>, vector<64x1xf32>
    %17 = vector.broadcast %16 : vector<64x1xf32> to vector<64x256xf32>
    %18 = arith.addf %15, %17 : vector<64x256xf32>
    %c0_6 = arith.constant 0 : index
    %c0_7 = arith.constant 0 : index
    %c0_8 = arith.constant 0 : index
    %19 = vector.load %arg4[%c0_6, %c0_7, %c0_8] : memref<1x64x256xf32, #tpu.memory_space<vmem>>, vector<1x64x256xf32>
    %20 = vector.shape_cast %19 : vector<1x64x256xf32> to vector<64x256xf32>
    %21 = vector.shape_cast %18 : vector<64x256xf32> to vector<1x64x256xf32>
    tpu.vector_store %arg4[%c0_6, %c0_7, %c0_8], %21 {strides = array<i32>} : memref<1x64x256xf32, #tpu.memory_space<vmem>>, vector<1x64x256xf32>,
    return
  }
  func.func @transform_0(%arg0: i32) -> (i32, i32, i32) {
    %c0_i32 = arith.constant 0 : i32
    %c0_i32_0 = arith.constant 0 : i32
    %c0_i32_1 = arith.constant 0 : i32
    return %arg0, %c0_i32, %c0_i32_0 : i32, i32, i32
  }
  func.func @transform_1(%arg0: i32) -> (i32, i32) {
    %c0_i32 = arith.constant 0 : i32
    %c0_i32_0 = arith.constant 0 : i32
    %c0_i32_1 = arith.constant 0 : i32
    return %c0_i32, %c0_i32_0 : i32, i32
  }
  func.func @transform_2(%arg0: i32) -> (i32, i32) {
    %c0_i32 = arith.constant 0 : i32
    %c0_i32_0 = arith.constant 0 : i32
    %c0_i32_1 = arith.constant 0 : i32
    return %c0_i32, %c0_i32_0 : i32, i32
  }
  func.func @transform_3(%arg0: i32) -> (i32, i32, i32) {
    %c0_i32 = arith.constant 0 : i32
    %c0_i32_0 = arith.constant 0 : i32
    %c0_i32_1 = arith.constant 0 : i32
    return %arg0, %c0_i32, %c0_i32_0 : i32, i32, i32
  }
}

module attributes {stable_mosaic.version = 11 : i64} {
  func.func @_convlstm_kernel(%arg0: i32, %arg1: memref<1x64x256xf32, #tpu.memory_space<vmem>>, %arg2: memref<64x144xbf16, #tpu.memory_space<vmem>>, %arg3: memref<1x256xf32, #tpu.memory_space<vmem>>, %arg4: memref<1x16x256xbf16, #tpu.memory_space<vmem>>, %arg5: memref<16x384xbf16, #tpu.memory_space<vmem>>, %arg6: memref<16x256xf32, #tpu.memory_space<vmem>>) attributes {dimension_semantics = [#tpu.dimension_semantics<arbitrary>], iteration_bounds = array<i64: 4>, scalar_prefetch = 0 : i64, scratch_operands = 2 : i64, tpu.core_type = #tpu.core_type<tc>, window_params = [{transform_indices = @transform_0, window_bounds = array<i64: 1, 64, 256>}, {pipeline_mode = #tpu.pipeline_mode<synchronous>, transform_indices = @transform_1, window_bounds = array<i64: 64, 144>}, {pipeline_mode = #tpu.pipeline_mode<synchronous>, transform_indices = @transform_2, window_bounds = array<i64: 1, 256>}, {transform_indices = @transform_3, window_bounds = array<i64: 1, 16, 256>}]} {
    %c0_i32 = arith.constant 0 : i32
    %0 = arith.cmpi eq, %arg0, %c0_i32 : i32
    %1 = arith.extui %0 : i1 to i32
    %c0_i32_0 = arith.constant 0 : i32
    %2 = arith.cmpi ne, %1, %c0_i32_0 : i32
    scf.if %2 {
      %cst_20 = arith.constant 0.000000e+00 : bf16
      %59 = vector.broadcast %cst_20 : bf16 to vector<16x384xbf16>
      %c0_21 = arith.constant 0 : index
      %c0_22 = arith.constant 0 : index
      %60 = vector.load %arg5[%c0_21, %c0_22] : memref<16x384xbf16, #tpu.memory_space<vmem>>, vector<16x384xbf16>
      tpu.vector_store %arg5[%c0_21, %c0_22], %59 {strides = array<i32>} : memref<16x384xbf16, #tpu.memory_space<vmem>>, vector<16x384xbf16>,
      %cst_23 = arith.constant 0.000000e+00 : f32
      %61 = vector.broadcast %cst_23 : f32 to vector<16x256xf32>
      %c0_24 = arith.constant 0 : index
      %c0_25 = arith.constant 0 : index
      %62 = vector.load %arg6[%c0_24, %c0_25] : memref<16x256xf32, #tpu.memory_space<vmem>>, vector<16x256xf32>
      tpu.vector_store %arg6[%c0_24, %c0_25], %61 {strides = array<i32>} : memref<16x256xf32, #tpu.memory_space<vmem>>, vector<16x256xf32>,
    } else {
    }
    %c0 = arith.constant 0 : index
    %c0_1 = arith.constant 0 : index
    %3 = vector.load %arg5[%c0, %c0_1] : memref<16x384xbf16, #tpu.memory_space<vmem>>, vector<16x384xbf16>
    %4 = arith.extf %3 : vector<16x384xbf16> to vector<16x384xf32>
    %5 = vector.extract_strided_slice %4 {offsets = [0, 0], sizes = [16, 256], strides = [1, 1]} : vector<16x384xf32> to vector<16x256xf32>
    %6 = vector.extract_strided_slice %4 {offsets = [0, 1], sizes = [16, 256], strides = [1, 1]} : vector<16x384xf32> to vector<16x256xf32>
    %7 = vector.extract_strided_slice %4 {offsets = [0, 2], sizes = [16, 256], strides = [1, 1]} : vector<16x384xf32> to vector<16x256xf32>
    %8 = vector.extract_strided_slice %4 {offsets = [0, 10], sizes = [16, 256], strides = [1, 1]} : vector<16x384xf32> to vector<16x256xf32>
    %9 = vector.extract_strided_slice %4 {offsets = [0, 11], sizes = [16, 256], strides = [1, 1]} : vector<16x384xf32> to vector<16x256xf32>
    %10 = vector.extract_strided_slice %4 {offsets = [0, 12], sizes = [16, 256], strides = [1, 1]} : vector<16x384xf32> to vector<16x256xf32>
    %11 = vector.extract_strided_slice %4 {offsets = [0, 20], sizes = [16, 256], strides = [1, 1]} : vector<16x384xf32> to vector<16x256xf32>
    %12 = vector.extract_strided_slice %4 {offsets = [0, 21], sizes = [16, 256], strides = [1, 1]} : vector<16x384xf32> to vector<16x256xf32>
    %13 = vector.extract_strided_slice %4 {offsets = [0, 22], sizes = [16, 256], strides = [1, 1]} : vector<16x384xf32> to vector<16x256xf32>
    %14 = tpu.concatenate %5, %6, %7, %8, %9, %10, %11, %12, %13 in 0 : vector<16x256xf32>, vector<16x256xf32>, vector<16x256xf32>, vector<16x256xf32>, vector<16x256xf32>, vector<16x256xf32>, vector<16x256xf32>, vector<16x256xf32>, vector<16x256xf32> -> vector<144x256xf32>
    %15 = arith.truncf %14 : vector<144x256xf32> to vector<144x256xbf16>
    %c0_2 = arith.constant 0 : index
    %c0_3 = arith.constant 0 : index
    %c0_4 = arith.constant 0 : index
    %16 = vector.load %arg1[%c0_2, %c0_3, %c0_4] : memref<1x64x256xf32, #tpu.memory_space<vmem>>, vector<1x64x256xf32>
    %17 = vector.shape_cast %16 : vector<1x64x256xf32> to vector<64x256xf32>
    %c0_5 = arith.constant 0 : index
    %c0_6 = arith.constant 0 : index
    %18 = vector.load %arg2[%c0_5, %c0_6] : memref<64x144xbf16, #tpu.memory_space<vmem>>, vector<64x144xbf16>
    %cst = arith.constant dense<0.000000e+00> : vector<64x256xf32>
    %19 = tpu.matmul %18, %15, %cst {dimension_numbers = #tpu.dot_dimension_numbers<[1], [0], [0], [1], [0, 0, 1, 1], [], []>} : vector<64x144xbf16>, vector<144x256xbf16>, vector<64x256xf32> -> vector<64x256xf32>
    %20 = arith.addf %17, %19 : vector<64x256xf32>
    %21 = vector.extract_strided_slice %20 {offsets = [0, 0], sizes = [16, 256], strides = [1, 1]} : vector<64x256xf32> to vector<16x256xf32>
    %22 = arith.negf %21 : vector<16x256xf32>
    %23 = math.exp %22 : vector<16x256xf32>
    %cst_7 = arith.constant 1.000000e+00 : f32
    %24 = vector.broadcast %cst_7 : f32 to vector<16x256xf32>
    %25 = arith.addf %24, %23 : vector<16x256xf32>
    %26 = arith.divf %24, %25 : vector<16x256xf32>
    %27 = vector.extract_strided_slice %20 {offsets = [16, 0], sizes = [16, 256], strides = [1, 1]} : vector<64x256xf32> to vector<16x256xf32>
    %28 = arith.negf %27 : vector<16x256xf32>
    %29 = math.exp %28 : vector<16x256xf32>
    %cst_8 = arith.constant 1.000000e+00 : f32
    %30 = vector.broadcast %cst_8 : f32 to vector<16x256xf32>
    %31 = arith.addf %30, %29 : vector<16x256xf32>
    %32 = arith.divf %30, %31 : vector<16x256xf32>
    %33 = vector.extract_strided_slice %20 {offsets = [32, 0], sizes = [16, 256], strides = [1, 1]} : vector<64x256xf32> to vector<16x256xf32>
    %34 = math.tanh %33 : vector<16x256xf32>
    %35 = vector.extract_strided_slice %20 {offsets = [48, 0], sizes = [16, 256], strides = [1, 1]} : vector<64x256xf32> to vector<16x256xf32>
    %36 = arith.negf %35 : vector<16x256xf32>
    %37 = math.exp %36 : vector<16x256xf32>
    %cst_9 = arith.constant 1.000000e+00 : f32
    %38 = vector.broadcast %cst_9 : f32 to vector<16x256xf32>
    %39 = arith.addf %38, %37 : vector<16x256xf32>
    %40 = arith.divf %38, %39 : vector<16x256xf32>
    %c0_10 = arith.constant 0 : index
    %c0_11 = arith.constant 0 : index
    %41 = vector.load %arg3[%c0_10, %c0_11] : memref<1x256xf32, #tpu.memory_space<vmem>>, vector<1x256xf32>
    %c0_12 = arith.constant 0 : index
    %c0_13 = arith.constant 0 : index
    %42 = vector.load %arg6[%c0_12, %c0_13] : memref<16x256xf32, #tpu.memory_space<vmem>>, vector<16x256xf32>
    %43 = arith.mulf %32, %42 : vector<16x256xf32>
    %44 = arith.mulf %26, %34 : vector<16x256xf32>
    %45 = arith.addf %43, %44 : vector<16x256xf32>
    %46 = vector.broadcast %41 : vector<1x256xf32> to vector<16x256xf32>
    %47 = arith.mulf %45, %46 : vector<16x256xf32>
    %48 = math.tanh %47 : vector<16x256xf32>
    %49 = arith.mulf %40, %48 : vector<16x256xf32>
    %50 = vector.broadcast %41 : vector<1x256xf32> to vector<16x256xf32>
    %51 = arith.mulf %49, %50 : vector<16x256xf32>
    %c0_14 = arith.constant 0 : index
    %c0_15 = arith.constant 0 : index
    %52 = vector.load %arg6[%c0_14, %c0_15] : memref<16x256xf32, #tpu.memory_space<vmem>>, vector<16x256xf32>
    tpu.vector_store %arg6[%c0_14, %c0_15], %47 {strides = array<i32>} : memref<16x256xf32, #tpu.memory_space<vmem>>, vector<16x256xf32>,
    %53 = arith.truncf %51 : vector<16x256xf32> to vector<16x256xbf16>
    %c0_16 = arith.constant 0 : index
    %c11 = arith.constant 11 : index
    %54 = vector.load %arg5[%c0_16, %c11] : memref<16x384xbf16, #tpu.memory_space<vmem>>, vector<16x256xbf16>
    tpu.vector_store %arg5[%c0_16, %c11], %53 {strides = array<i32>} : memref<16x384xbf16, #tpu.memory_space<vmem>>, vector<16x256xbf16>,
    %55 = arith.truncf %51 : vector<16x256xf32> to vector<16x256xbf16>
    %c0_17 = arith.constant 0 : index
    %c0_18 = arith.constant 0 : index
    %c0_19 = arith.constant 0 : index
    %56 = vector.load %arg4[%c0_17, %c0_18, %c0_19] : memref<1x16x256xbf16, #tpu.memory_space<vmem>>, vector<1x16x256xbf16>
    %57 = vector.shape_cast %56 : vector<1x16x256xbf16> to vector<16x256xbf16>
    %58 = vector.shape_cast %55 : vector<16x256xbf16> to vector<1x16x256xbf16>
    tpu.vector_store %arg4[%c0_17, %c0_18, %c0_19], %58 {strides = array<i32>} : memref<1x16x256xbf16, #tpu.memory_space<vmem>>, vector<1x16x256xbf16>,
    return
  }
  func.func @transform_0(%arg0: i32) -> (i32, i32, i32) {
    %c0_i32 = arith.constant 0 : i32
    %c0_i32_0 = arith.constant 0 : i32
    %c0_i32_1 = arith.constant 0 : i32
    return %arg0, %c0_i32, %c0_i32_0 : i32, i32, i32
  }
  func.func @transform_1(%arg0: i32) -> (i32, i32) {
    %c0_i32 = arith.constant 0 : i32
    %c0_i32_0 = arith.constant 0 : i32
    %c0_i32_1 = arith.constant 0 : i32
    return %c0_i32, %c0_i32_0 : i32, i32
  }
  func.func @transform_2(%arg0: i32) -> (i32, i32) {
    %c0_i32 = arith.constant 0 : i32
    %c0_i32_0 = arith.constant 0 : i32
    %c0_i32_1 = arith.constant 0 : i32
    return %c0_i32, %c0_i32_0 : i32, i32
  }
  func.func @transform_3(%arg0: i32) -> (i32, i32, i32) {
    %c0_i32 = arith.constant 0 : i32
    %c0_i32_0 = arith.constant 0 : i32
    %c0_i32_1 = arith.constant 0 : i32
    return %arg0, %c0_i32, %c0_i32_0 : i32, i32, i32
  }
}

</mosaic_0001>

<bundles_post_ra>
// kernel: _lambda_.6
= control target key start
LH: loop header
LB: loop body
LE: loop exit
PB: predicated region body
PF: predicated region fallthrough
CT: control target
= control target key end

     0   :  { %s672_s12 = smov 0   ;;  %s742_s0 = inlined_call_operand.vmem [shape: bf16[8,8,512], index: 0, kind: input, shape index: {}]   ;;  %s743_s1 = inlined_call_operand.vmem [shape: bf16[8,72], index: 1, kind: input, shape index: {}]   ;;  %s744_s2 = inlined_call_operand.vmem [shape: f32[8,1], index: 2, kind: input, shape index: {}]   ;;  %s745_s3 = inlined_call_operand.vmem [shape: bf16[8,8,384], index: 3, kind: output, shape index: {}]  }
   0x1 LB: > { %s498_s13 = sadd.s32 4294967295, %s639_s12   ;;  %p502_p0 = scmp.ge.s32.totalorder %s639_s12, 1  ;;  %s639_s12 = sphi %s672_s12, %s13_s12  }
   0x2   : > { %p137_p1 = scmp.lt.s32.totalorder %s639_s12, 9 }
   0x4   : > { %p138_p2 = pnand %p502_p0, %p137_p1 }
   0x5   : > { %p161_p3 = scmp.lt.s32.totalorder (!%p138_p2), %s498_s13, 7  ;;  %s642_s18 = smov (!%p138_p2), 92  }
   0x6   : > { %141 = sbr.rel (%p138_p2) target bundleno = 374 (0x176), region = 32  ;;  %s643_s19 = smov (!%p138_p2), 90  }
   0x7   : > { %s644_s20 = smov (!%p138_p2), 91   ;;  %s645_s21 = smov (!%p138_p2), 108  }
   0x8   : > { %s646_s22 = smov (!%p138_p2), 109   ;;  %s647_s23 = smov (!%p138_p2), 110  }
   0x9   : > { %s648_s24 = smov (!%p138_p2), 126   ;;  %s651_s25 = smov (!%p138_p2), 127  }
   0xb   : > { %s747_s13 = smov (!%p161_p3, %s498_s13), 7  ;;  %v641_v6 = vmov 0.0   ;;  %v649_v11 = vmov 0   ;;  %vm650_vm0 = vmmov 0   ;;  %v318_v12 = vld [vmem:[%s744_s2] sm:$0xff]  ;;  %vm295_vm1 = vcmask 736256  }
   0xc   : > { %s513_s14 = sshll.u32 %s747_s13, 4  ;;  %522 = vmatprep.subr.bf16.mxu1 %v641_v6  ;;  %370 = vmatprep.mubr.bf16.mxu0 %v649_v11  ;;  %vm265_vm2 = vcmask 752640   ;;  %vm280_vm3 = vcmask 744448   ;;  %vm328_vm4 = vcmask 1043456   ;;  %vm235_vm5 = vcmask 891904   ;;  %s536_s30 = smul.u32 12, %s747_s13 }
   0xd   : > { %s165_s17 = scalar_lea.vmem %s742_s0, %s513_s14  ;;  %631 = vset.pattern.permute.xlu1 %v649_v11  ;;  %532 = vmatprep.mubr.msk.bf16.mxu1 %vm650_vm0, %v641_v6  ;;  %vm250_vm6 = vcmask 883712   ;;  %vm205_vm7 = vcmask 1031168   ;;  %vm220_vm8 = vcmask 900096   ;;  %vm190_vm9 = vcmask 1039360  }
   0xe   : > { %v172_v0 = vld [vmem:[%s165_s17] sm:$0xff]  ;;  %v173_v1 = vld [vmem:[%s165_s17 + $0x8] sm:$0xff]  ;;  %632 = vset.pattern.permute.xlu0 %v649_v11  ;;  %vm324_vm10 = vcmask 588800   ;;  %s170_s6 = scalar_lea.vmem %s745_s3, %s536_s30 }
   0xf   : > { %v686_v2 = vunpack.c.h.bf16 %v172_v0  ;;  %v688_v3 = vunpack.c.l.bf16 %v173_v1  ;;  %v690_v4 = vunpack.c.l.bf16 %v172_v0  ;;  %v177_v5 = vunpack.c.h.bf16 %v173_v1 }
  0x11   : > { %v566_v7 = vpack.i.bf16 %v688_v3, %v686_v2  ;;  %v556_v8 = vpack.i.bf16 %v686_v2, %v690_v4  ;;  %v561_v9 = vpack.i.bf16 %v177_v5, %v688_v3  ;;  %v581_v10 = vpack.i.bf16 %v177_v5, %v690_v4 }
  0x13   : > { %567 = vrot.lane.b32.xlu1 %v566_v7, %s642_s18  ;;  %557 = vrot.lane.b32.xlu0 %v556_v8, %s643_s19 }
  0x17   : > { %572 = vrot.lane.b32.xlu1 %v566_v7, %s644_s20  ;;  %562 = vrot.lane.b32.xlu0 %v561_v9, %s643_s19 }
  0x1b   : > { %582 = vrot.lane.b32.xlu1 %v581_v10, %s644_s20  ;;  %577 = vrot.lane.b32.xlu0 %v581_v10, %s642_s18 }
  0x1f   : > { %592 = vrot.lane.b32.xlu1 %v566_v7, %s645_s21  ;;  %587 = vrot.lane.b32.xlu0 %v566_v7, %s646_s22 }
  0x23   : > { %602 = vrot.lane.b32.xlu1 %v581_v10, %s645_s21  ;;  %597 = vrot.lane.b32.xlu0 %v581_v10, %s646_s22 }
  0x27   : > { %612 = vrot.lane.b32.xlu1 %v566_v7, %s647_s23  ;;  %607 = vrot.lane.b32.xlu0 %v566_v7, %s648_s24 }
  0x2b   : > { %622 = vrot.lane.b32.xlu1 %v581_v10, %s647_s23  ;;  %617 = vrot.lane.b32.xlu0 %v581_v10, %s648_s24 }
  0x2f   : > { %627 = vrot.lane.b32.xlu0 %v566_v7, %s651_s25  ;;  %182 = vrot.lane.b32.xlu1 %v690_v4, %s651_s25 }
  0x33   : > { %188 = vrot.lane.b32.xlu0 %v177_v5, %s651_s25  ;;  %321 = vperm.xlu1 %631, %v318_v12  }
  0x85   : > { %v568_v13 = vpop.permute.xlu1 %567  ;;  %v558_v14 = vpop.permute.xlu0 %557 }
  0x86   : > { %v560_v15 = vunpack.i.h.bf16 %v558_v14  ;;  %v559_v16 = vunpack.i.l.bf16 %v558_v14  ;;  %v570_v18 = vunpack.i.h.bf16 %v568_v13  ;;  %v569_v19 = vunpack.i.l.bf16 %v568_v13 }
  0x88   : > { %v296_v17 = vsel %vm295_vm1, %v559_v16, %v560_v15  ;;  %v267_v34 = vsel %vm265_vm2, %v569_v19, %v570_v18 }
  0x89   : > { %v573_v20 = vpop.permute.xlu1 %572  ;;  %v563_v21 = vpop.permute.xlu0 %562  ;;  %v314_v26 = vpack.c.bf16 %v296_v17, %v296_v17 }
  0x8a   : > { %v575_v22 = vunpack.i.h.bf16 %v573_v20  ;;  %v574_v23 = vunpack.i.l.bf16 %v573_v20  ;;  %v565_v24 = vunpack.i.h.bf16 %v563_v21  ;;  %v564_v25 = vunpack.i.l.bf16 %v563_v21 }
  0x8b   : > { %v330_v39 = vsel %vm328_vm4, %v314_v26, 0 }
  0x8c   : > { %v297_v27 = vsel %vm295_vm1, %v560_v15, %v564_v25  ;;  %v298_v28 = vsel %vm295_vm1, %v564_v25, %v565_v24  ;;  %v282_v29 = vsel %vm280_vm3, %v574_v23, %v575_v22 }
  0x8d   : > { %v583_v30 = vpop.permute.xlu1 %582  ;;  %v578_v31 = vpop.permute.xlu0 %577  ;;  %v315_v32 = vpack.c.bf16 %v297_v27, %v297_v27  ;;  %v316_v33 = vpack.c.bf16 %v298_v28, %v298_v28  ;;  %v312_v41 = vpack.c.bf16 %v282_v29, %v267_v34 }
  0x8e   : > { %v585_v35 = vunpack.i.h.bf16 %v583_v30  ;;  %v584_v36 = vunpack.i.l.bf16 %v583_v30  ;;  %v580_v37 = vunpack.i.h.bf16 %v578_v31  ;;  %v579_v38 = vunpack.i.l.bf16 %v578_v31 }
  0x8f   : > { %506 = vmatprep.subr.msk.bf16.mxu0 %vm328_vm4, %v315_v32  ;;  %v336_v40 = vsel %vm328_vm4, %v316_v33, 0 }
  0x90   : > { %345 = vmatpush1.bf16.msra.mxu0 %v330_v39  ;;  %523 = vmatpush3.bf16.msra.mxu1 %v336_v40  ;;  %v266_v42 = vsel %vm265_vm2, %v579_v38, %v569_v19  ;;  %v281_v43 = vsel %vm280_vm3, %v584_v36, %v574_v23  ;;  %v268_v44 = vsel %vm265_vm2, %v570_v18, %v580_v37 }
  0x91   : > { %v593_v45 = vpop.permute.xlu1 %592  ;;  %v588_v46 = vpop.permute.xlu0 %587  ;;  %346 = vmatprep.subr.bf16.mxu0 %v312_v41  ;;  %524 = vmatprep.subr.bf16.mxu1 %v641_v6  ;;  %v311_v47 = vpack.c.bf16 %v281_v43, %v266_v42  ;;  %v283_v48 = vsel %vm280_vm3, %v575_v22, %v585_v35  ;;  %v317_v41 = vld [vmem:[%s743_s1] sm:$0xf] }
  0x92   : > { %v595_v49 = vunpack.i.h.bf16 %v593_v45  ;;  %v594_v50 = vunpack.i.l.bf16 %v593_v45  ;;  %v590_v51 = vunpack.i.h.bf16 %v588_v46  ;;  %v589_v52 = vunpack.i.l.bf16 %v588_v46 }
  0x93   : > { %v313_v53 = vpack.c.bf16 %v283_v48, %v268_v44 }
  0x94   : > { %347 = vmatpush1.bf16.msra.mxu0 %v311_v47  ;;  %v237_v54 = vsel %vm235_vm5, %v589_v52, %v590_v51  ;;  %v252_v55 = vsel %vm250_vm6, %v594_v50, %v595_v49 }
  0x95   : > { %525 = vmatpush3.bf16.msra.mxu1 %v313_v53  ;;  %v603_v56 = vpop.permute.xlu1 %602  ;;  %v598_v57 = vpop.permute.xlu0 %597  ;;  %v309_v58 = vpack.c.bf16 %v252_v55, %v237_v54 }
  0x96   : > { %v605_v59 = vunpack.i.h.bf16 %v603_v56  ;;  %v604_v60 = vunpack.i.l.bf16 %v603_v56  ;;  %v600_v61 = vunpack.i.h.bf16 %v598_v57  ;;  %v599_v62 = vunpack.i.l.bf16 %v598_v57  ;;  %526 = vmatprep.subr.bf16.mxu1 %v641_v6 }
  0x97   : > { %348 = vmatprep.subr.bf16.mxu0 %v309_v58 }
  0x98   : > { %v236_v63 = vsel %vm235_vm5, %v599_v62, %v589_v52  ;;  %v251_v0 = vsel %vm250_vm6, %v604_v60, %v594_v50  ;;  %v238_v1 = vsel %vm235_vm5, %v590_v51, %v600_v61  ;;  %v253_v5 = vsel %vm250_vm6, %v595_v49, %v605_v59 }
  0x99   : > { %v613_v7 = vpop.permute.xlu1 %612  ;;  %v608_v8 = vpop.permute.xlu0 %607  ;;  %v308_v9 = vpack.c.bf16 %v251_v0, %v236_v63  ;;  %v310_v10 = vpack.c.bf16 %v253_v5, %v238_v1 }
  0x9a   : > { %v615_v11 = vunpack.i.h.bf16 %v613_v7  ;;  %v614_v12 = vunpack.i.l.bf16 %v613_v7  ;;  %v610_v13 = vunpack.i.h.bf16 %v608_v8  ;;  %v609_v14 = vunpack.i.l.bf16 %v608_v8 }
  0x9b   : > { %349 = vmatpush1.bf16.msra.mxu0 %v308_v9  ;;  %527 = vmatpush3.bf16.msra.mxu1 %v310_v10 }
  0x9c   : > { %v207_v15 = vsel %vm205_vm7, %v609_v14, %v610_v13  ;;  %v222_v16 = vsel %vm220_vm8, %v614_v12, %v615_v11  ;;  %528 = vmatprep.subr.bf16.mxu1 %v641_v6 }
  0x9d   : > { %v623_v17 = vpop.permute.xlu1 %622  ;;  %v618_v18 = vpop.permute.xlu0 %617  ;;  %v306_v19 = vpack.c.bf16 %v222_v16, %v207_v15 }
  0x9e   : > { %v625_v20 = vunpack.i.h.bf16 %v623_v17  ;;  %v624_v21 = vunpack.i.l.bf16 %v623_v17  ;;  %v620_v22 = vunpack.i.h.bf16 %v618_v18  ;;  %v619_v23 = vunpack.i.l.bf16 %v618_v18 }
  0x9f   : > { %350 = vmatprep.subr.bf16.mxu0 %v306_v19 }
  0xa0   : > { %v206_v24 = vsel %vm205_vm7, %v619_v23, %v609_v14  ;;  %v221_v25 = vsel %vm220_vm8, %v624_v21, %v614_v12  ;;  %v208_v26 = vsel %vm205_vm7, %v610_v13, %v620_v22  ;;  %v223_v27 = vsel %vm220_vm8, %v615_v11, %v625_v20 }
  0xa1   : > { %v628_v28 = vpop.permute.xlu0 %627  ;;  %v183_v29 = vpop.permute.xlu1 %182  ;;  %v305_v30 = vpack.c.bf16 %v221_v25, %v206_v24  ;;  %v307_v31 = vpack.c.bf16 %v223_v27, %v208_v26 }
  0xa2   : > { %v630_v32 = vunpack.i.h.bf16 %v628_v28  ;;  %v629_v33 = vunpack.i.l.bf16 %v628_v28 }
  0xa3   : > { %351 = vmatpush1.bf16.msra.mxu0 %v305_v30  ;;  %529 = vmatpush3.bf16.msra.mxu1 %v307_v31 }
  0xa4   : > { %v191_v34 = vsel %vm190_vm9, %v183_v29, %v629_v33  ;;  %v192_v35 = vsel %vm190_vm9, %v629_v33, %v630_v32  ;;  %530 = vmatprep.subr.bf16.mxu1 %v641_v6 }
  0xa5   : > { %v302_v36 = vpack.c.bf16 %v191_v34, %v690_v4  ;;  %v189_v37 = vpop.permute.xlu0 %188  ;;  %v303_v38 = vpack.c.bf16 %v192_v35, %v686_v2 }
  0xa6   : > { %v193_v39 = vsel %vm190_vm9, %v630_v32, %v189_v37 }
  0xa7   : > { %v304_v40 = vpack.c.bf16 %v193_v39, %v688_v3  ;;  %352 = vmatprep.subr.bf16.mxu0 %v303_v38 }
  0xa8   : > { %353 = vmatpush1.bf16.msra.mxu0 %v302_v36 }
  0xa9   : > { %531 = vmatpush3.bf16.msra.mxu1 %v304_v40 }
  0xab   : > { %507 = vmatmul.mubr.msk.bf16.vlgmr.msra.gmra.mxu0 %vm324_vm10, %v317_v41 }
  0xac   : > { %533 = vmatmul.mubr.msk.bf16.vlgmr.msra.gmra.mxu1 %vm324_vm10, %v317_v41 }
  0xae   : > { %v322_v6 = vpop.permute.xlu1 %321 }
 0x16b   : > { %v372_v42 = vpop.f32.mrf.mxu0 }
 0x16c   : > { %v373_v4 = vadd.f32 %v372_v42, %v322_v6  ;;  %v413_v43 = vpop.f32.mrf.mxu1 }
 0x16d   : > { %v414_v44 = vadd.f32 %v413_v43, %v322_v6  ;;  %v374_v2 = vpop.f32.mrf.mxu0 }
 0x16e   : > { %v422_v45 = vmul.f32 0.2, %v373_v4  ;;  %v375_v46 = vadd.f32 %v374_v2, %v322_v6  ;;  %v534_v3 = vpop.f32.mrf.mxu1  ;;  %vm419_vm11 = vcmp.gt.f32.partialorder %v373_v4, 0.0 }
 0x16f   : > { %vm421_vm12 = vcmp.gt.f32.partialorder %v414_v44, 0.0  ;;  %v424_v47 = vmul.f32 0.2, %v414_v44  ;;  %v376_v48 = vpop.f32.mrf.mxu0 }
 0x170   : > { %vm420_vm13 = vcmp.gt.f32.partialorder %v375_v46, 0.0  ;;  %v423_v49 = vmul.f32 0.2, %v375_v46  ;;  %v416_v50 = vpop.f32.mrf.mxu1  ;;  %v425_v53 = vsel %vm419_vm11, %v373_v4, %v422_v45 }
 0x171   : > { %v427_v51 = vsel %vm421_vm12, %v414_v44, %v424_v47  ;;  %v377_v52 = vpop.f32.mrf.mxu0 }
 0x172   : > { %v515_v54 = vpack.c.bf16 %v427_v51, %v427_v51  ;;  %v426_v55 = vsel %vm420_vm13, %v375_v46, %v423_v49  ;;  %v535_v56 = vpop.f32.mrf.mxu1 }
 0x173   : > { %v514_v57 = vpack.c.bf16 %v426_v55, %v425_v53 }
 0x174   : > { %442 = vst [vmem:[%s170_s6 + $0x8] sm:$0xf] %v515_v54 }
 0x175   : > { %441 = vst [vmem:[%s170_s6] sm:$0xff] %v514_v57 }
 0x176 PF: > { %s13_s12 = sadd.s32 1, %s639_s12  }
 0x177   : > { %p10_p4 = scmp.ge.s32.totalorder %s13_s12, 10  }
 0x179   :  { %12 = sbr.rel (!%p10_p4) target bundleno = 1 (0x1), region = 62 }

// kernel: _lambda_.7
= control target key start
LH: loop header
LB: loop body
LE: loop exit
PB: predicated region body
PF: predicated region fallthrough
CT: control target
= control target key end

     0   :  { %s948_s12 = smov 0   ;;  %s1220_s0 = inlined_call_operand.vmem [shape: bf16[4,8,896], index: 0, kind: input, shape index: {}]   ;;  %s1221_s1 = inlined_call_operand.vmem [shape: bf16[32,72], index: 1, kind: input, shape index: {}]   ;;  %s1222_s2 = inlined_call_operand.vmem [shape: f32[32,1], index: 2, kind: input, shape index: {}]   ;;  %s1223_s3 = inlined_call_operand.vmem [shape: f32[4,32,768], index: 3, kind: output, shape index: {}]  }
   0x1 LB: > { %s738_s13 = sadd.s32 4294967295, %s917_s12   ;;  %p742_p0 = scmp.ge.s32.totalorder %s917_s12, 1  ;;  %s917_s12 = sphi %s948_s12, %s13_s12  }
   0x2   : > { %p137_p1 = scmp.lt.s32.totalorder %s917_s12, 5 }
   0x4   : > { %p138_p2 = pnand %p742_p0, %p137_p1 }
   0x5   : > { %p161_p3 = scmp.lt.s32.totalorder (!%p138_p2), %s738_s13, 3  ;;  %s919_s18 = smov (!%p138_p2), 90  }
   0x6   : > { %141 = sbr.rel (%p138_p2) target bundleno = 411 (0x19b), region = 32  ;;  %s920_s19 = smov (!%p138_p2), 92  }
   0x7   : > { %s921_s20 = smov (!%p138_p2), 91   ;;  %s922_s21 = smov (!%p138_p2), 109  }
   0x8   : > { %s923_s22 = smov (!%p138_p2), 108   ;;  %s924_s23 = smov (!%p138_p2), 126  }
   0x9   : > { %s925_s24 = smov (!%p138_p2), 110   ;;  %s927_s25 = smov (!%p138_p2), 127  }
   0xb   : > { %s1225_s13 = smov (!%p161_p3, %s738_s13), 3  ;;  %v926_v13 = vmov 0   ;;  %v441_v17 = vld [vmem:[%s1222_s2 + $0x8] sm:$0xff]  ;;  %v440_v18 = vld [vmem:[%s1222_s2] sm:$0xff]  ;;  %v442_v19 = vld [vmem:[%s1222_s2 + $0x10] sm:$0xff]  ;;  %vm393_vm0 = vcmask 736256  }
   0xc   : > { %s768_s14 = smul.u32 28, %s1225_s13  ;;  %532 = vmatprep.mubr.bf16.mxu0 %v926_v13  ;;  %585 = vmatprep.mubr.bf16.mxu1 %v926_v13  ;;  %v443_v20 = vld [vmem:[%s1222_s2 + $0x18] sm:$0xff]  ;;  %vm339_vm1 = vcmask 752640   ;;  %vm481_vm2 = vcmask 1043456   ;;  %vm366_vm3 = vcmask 744448   ;;  %vm285_vm4 = vcmask 891904  }
   0xd   : > { %907 = vset.pattern.permute.xlu0 %v926_v13  ;;  %908 = vset.pattern.permute.xlu1 %v926_v13  ;;  %vm312_vm5 = vcmask 883712   ;;  %vm231_vm6 = vcmask 1031168   ;;  %vm258_vm7 = vcmask 900096   ;;  %vm204_vm8 = vcmask 1039360   ;;  %s769_s11 = smul.u32 192, %s1225_s13 }
   0xe   : > { %s962_s17 = scalar_lea.vmem %s1220_s0, %s768_s14  ;;  %vm474_vm9 = vcmask 588800  }
   0xf   : > { %v965_v0 = vld [vmem:[%s962_s17 + $0x10] sm:$0xff]  ;;  %v172_v1 = vld [vmem:[%s962_s17] sm:$0xff]  ;;  %v173_v2 = vld [vmem:[%s962_s17 + $0x8] sm:$0xff]  ;;  %s1183_s16 = scalar_lea.vmem %s1223_s3, %s769_s11 }
  0x10   : > { %v970_v3 = vunpack.c.l.bf16 %v965_v0  ;;  %v972_v4 = vunpack.c.l.bf16 %v172_v1  ;;  %v974_v5 = vunpack.c.h.bf16 %v172_v1  ;;  %v976_v6 = vunpack.c.l.bf16 %v173_v2  ;;  %v175_v12 = vld [vmem:[%s962_s17 + $0x18] sm:$0xf] }
  0x11   : > { %v978_v7 = vunpack.c.h.bf16 %v173_v2  ;;  %v181_v14 = vunpack.c.h.bf16 %v965_v0  ;;  %v182_v15 = vunpack.c.l.bf16 %v175_v12 }
  0x12   : > { %387 = vrot.lane.b32.xlu1 %v970_v3, %s919_s18  ;;  %v787_v8 = vpack.i.bf16 %v974_v5, %v972_v4  ;;  %v797_v9 = vpack.i.bf16 %v976_v6, %v974_v5 }
  0x13   : > { %v792_v10 = vpack.i.bf16 %v978_v7, %v976_v6  ;;  %v802_v11 = vpack.i.bf16 %v970_v3, %v978_v7  ;;  %v872_v16 = vpack.i.bf16 %v182_v15, %v181_v14 }
  0x14   : > { %788 = vrot.lane.b32.xlu0 %v787_v8, %s919_s18 }
  0x16   : > { %798 = vrot.lane.b32.xlu1 %v797_v9, %s920_s19 }
  0x18   : > { %793 = vrot.lane.b32.xlu0 %v792_v10, %s919_s18 }
  0x1a   : > { %808 = vrot.lane.b32.xlu1 %v797_v9, %s921_s20 }
  0x1c   : > { %803 = vrot.lane.b32.xlu0 %v802_v11, %s920_s19 }
  0x1e   : > { %325 = vrot.lane.b32.xlu1 %v972_v4, %s920_s19 }
  0x20   : > { %813 = vrot.lane.b32.xlu0 %v802_v11, %s921_s20 }
  0x22   : > { %818 = vrot.lane.b32.xlu1 %v797_v9, %s922_s21 }
  0x24   : > { %352 = vrot.lane.b32.xlu0 %v972_v4, %s921_s20 }
  0x26   : > { %828 = vrot.lane.b32.xlu1 %v797_v9, %s923_s22 }
  0x28   : > { %823 = vrot.lane.b32.xlu0 %v802_v11, %s922_s21 }
  0x2a   : > { %271 = vrot.lane.b32.xlu1 %v972_v4, %s922_s21 }
  0x2c   : > { %833 = vrot.lane.b32.xlu0 %v802_v11, %s923_s22 }
  0x2e   : > { %838 = vrot.lane.b32.xlu1 %v797_v9, %s924_s23 }
  0x30   : > { %298 = vrot.lane.b32.xlu0 %v972_v4, %s923_s22 }
  0x32   : > { %848 = vrot.lane.b32.xlu1 %v797_v9, %s925_s24 }
  0x34   : > { %843 = vrot.lane.b32.xlu0 %v802_v11, %s924_s23 }
  0x36   : > { %217 = vrot.lane.b32.xlu1 %v972_v4, %s924_s23 }
  0x38   : > { %853 = vrot.lane.b32.xlu0 %v802_v11, %s925_s24 }
  0x3a   : > { %858 = vrot.lane.b32.xlu1 %v797_v9, %s927_s25 }
  0x3c   : > { %244 = vrot.lane.b32.xlu0 %v972_v4, %s925_s24 }
  0x3e   : > { %190 = vrot.lane.b32.xlu1 %v972_v4, %s927_s25 }
  0x40   : > { %863 = vrot.lane.b32.xlu0 %v802_v11, %s927_s25 }
  0x42   : > { %873 = vrot.lane.b32.xlu1 %v872_v16, %s920_s19 }
  0x44   : > { %868 = vrot.lane.b32.xlu0 %v872_v16, %s919_s18 }
  0x46   : > { %883 = vrot.lane.b32.xlu1 %v872_v16, %s922_s21 }
  0x48   : > { %878 = vrot.lane.b32.xlu0 %v872_v16, %s921_s20 }
  0x4a   : > { %893 = vrot.lane.b32.xlu1 %v872_v16, %s924_s23 }
  0x4c   : > { %888 = vrot.lane.b32.xlu0 %v872_v16, %s923_s22 }
  0x4e   : > { %903 = vrot.lane.b32.xlu1 %v872_v16, %s927_s25 }
  0x50   : > { %898 = vrot.lane.b32.xlu0 %v872_v16, %s925_s24 }
  0x52   : > { %451 = vperm.xlu1 %908, %v441_v17  }
  0x54   : > { %446 = vperm.xlu0 %907, %v440_v18  }
  0x56   : > { %456 = vperm.xlu1 %908, %v442_v19  }
  0x58   : > { %461 = vperm.xlu0 %907, %v443_v20  }
  0x84   : > { %v1036_v21 = vpop.permute.xlu1 %387 }
  0x86   : > { %v789_v22 = vpop.permute.xlu0 %788 }
  0x87   : > { %v791_v23 = vunpack.i.h.bf16 %v789_v22  ;;  %v790_v24 = vunpack.i.l.bf16 %v789_v22 }
  0x88   : > { %v799_v25 = vpop.permute.xlu1 %798 }
  0x89   : > { %v801_v26 = vunpack.i.h.bf16 %v799_v25  ;;  %v800_v27 = vunpack.i.l.bf16 %v799_v25  ;;  %v394_v28 = vsel %vm393_vm0, %v790_v24, %v791_v23 }
  0x8a   : > { %v794_v29 = vpop.permute.xlu0 %793  ;;  %v430_v33 = vpack.c.bf16 %v394_v28, %v394_v28 }
  0x8b   : > { %v796_v30 = vunpack.i.h.bf16 %v794_v29  ;;  %v795_v31 = vunpack.i.l.bf16 %v794_v29  ;;  %v341_v34 = vsel %vm339_vm1, %v800_v27, %v801_v26 }
  0x8c   : > { %v809_v32 = vpop.permute.xlu1 %808  ;;  %v483_v48 = vsel %vm481_vm2, %v430_v33, 0 }
  0x8d   : > { %v811_v35 = vunpack.i.h.bf16 %v809_v32  ;;  %v810_v36 = vunpack.i.l.bf16 %v809_v32  ;;  %v395_v37 = vsel %vm393_vm0, %v791_v23, %v795_v31  ;;  %v397_v38 = vsel %vm393_vm0, %v796_v30, %v1036_v21 }
  0x8e   : > { %v1043_v39 = vpop.permute.xlu0 %803  ;;  %v431_v40 = vpack.c.bf16 %v395_v37, %v395_v37  ;;  %v433_v41 = vpack.c.bf16 %v397_v38, %v397_v38  ;;  %v396_v42 = vsel %vm393_vm0, %v795_v31, %v796_v30 }
  0x8f   : > { %v432_v43 = vpack.c.bf16 %v396_v42, %v396_v42  ;;  %v368_v44 = vsel %vm366_vm3, %v810_v36, %v811_v35  ;;  %v806_v45 = vunpack.i.h.bf16 %v1043_v39  ;;  %v805_v46 = vunpack.i.l.bf16 %v1043_v39 }
  0x90   : > { %v326_v47 = vpop.permute.xlu1 %325  ;;  %747 = vmatprep.subr.msk.bf16.mxu0 %vm481_vm2, %v431_v40  ;;  %750 = vmatprep.subr.msk.bf16.mxu1 %vm481_vm2, %v433_v41  ;;  %v425_v49 = vpack.c.bf16 %v368_v44, %v341_v34 }
  0x91   : > { %507 = vmatpush1.bf16.msra.mxu0 %v483_v48  ;;  %v489_v50 = vsel %vm481_vm2, %v432_v43, 0  ;;  %v343_v55 = vsel %vm339_vm1, %v805_v46, %v806_v45  ;;  %v342_v56 = vsel %vm339_vm1, %v801_v26, %v805_v46  ;;  %v340_v1 = vsel %vm339_vm1, %v326_v47, %v800_v27 }
  0x92   : > { %560 = vmatpush1.bf16.msra.mxu1 %v489_v50  ;;  %v1053_v51 = vpop.permute.xlu0 %813  ;;  %508 = vmatprep.subr.bf16.mxu0 %v425_v49 }
  0x93   : > { %v816_v52 = vunpack.i.h.bf16 %v1053_v51  ;;  %v815_v53 = vunpack.i.l.bf16 %v1053_v51 }
  0x94   : > { %v819_v54 = vpop.permute.xlu1 %818 }
  0x95   : > { %v821_v57 = vunpack.i.h.bf16 %v819_v54  ;;  %v820_v58 = vunpack.i.l.bf16 %v819_v54  ;;  %v370_v59 = vsel %vm366_vm3, %v815_v53, %v816_v52  ;;  %v369_v60 = vsel %vm366_vm3, %v811_v35, %v815_v53 }
  0x96   : > { %v353_v61 = vpop.permute.xlu0 %352  ;;  %v427_v62 = vpack.c.bf16 %v370_v59, %v343_v55  ;;  %v426_v63 = vpack.c.bf16 %v369_v60, %v342_v56 }
  0x97   : > { %v367_v2 = vsel %vm366_vm3, %v353_v61, %v810_v36  ;;  %v287_v12 = vsel %vm285_vm4, %v820_v58, %v821_v57 }
  0x98   : > { %v424_v8 = vpack.c.bf16 %v367_v2, %v340_v1  ;;  %v829_v9 = vpop.permute.xlu1 %828  ;;  %561 = vmatprep.subr.bf16.mxu1 %v427_v62 }
  0x99   : > { %v831_v10 = vunpack.i.h.bf16 %v829_v9  ;;  %v830_v11 = vunpack.i.l.bf16 %v829_v9  ;;  %562 = vmatpush1.bf16.msra.mxu1 %v426_v63 }
  0x9a   : > { %v1068_v15 = vpop.permute.xlu0 %823  ;;  %509 = vmatpush1.bf16.msra.mxu0 %v424_v8 }
  0x9b   : > { %v314_v16 = vsel %vm312_vm5, %v830_v11, %v831_v10  ;;  %v826_v17 = vunpack.i.h.bf16 %v1068_v15  ;;  %v825_v18 = vunpack.i.l.bf16 %v1068_v15 }
  0x9c   : > { %v272_v19 = vpop.permute.xlu1 %271  ;;  %v419_v20 = vpack.c.bf16 %v314_v16, %v287_v12 }
  0x9d   : > { %v289_v26 = vsel %vm285_vm4, %v825_v18, %v826_v17  ;;  %v288_v27 = vsel %vm285_vm4, %v821_v57, %v825_v18  ;;  %v286_v35 = vsel %vm285_vm4, %v272_v19, %v820_v58 }
  0x9e   : > { %v1073_v22 = vpop.permute.xlu0 %833  ;;  %510 = vmatprep.subr.bf16.mxu0 %v419_v20 }
  0x9f   : > { %v836_v23 = vunpack.i.h.bf16 %v1073_v22  ;;  %v835_v24 = vunpack.i.l.bf16 %v1073_v22 }
  0xa0   : > { %v839_v25 = vpop.permute.xlu1 %838 }
  0xa1   : > { %v841_v28 = vunpack.i.h.bf16 %v839_v25  ;;  %v840_v29 = vunpack.i.l.bf16 %v839_v25  ;;  %v316_v30 = vsel %vm312_vm5, %v835_v24, %v836_v23  ;;  %v315_v31 = vsel %vm312_vm5, %v831_v10, %v835_v24 }
  0xa2   : > { %v299_v32 = vpop.permute.xlu0 %298  ;;  %v421_v33 = vpack.c.bf16 %v316_v30, %v289_v26  ;;  %v420_v34 = vpack.c.bf16 %v315_v31, %v288_v27 }
  0xa3   : > { %v313_v36 = vsel %vm312_vm5, %v299_v32, %v830_v11  ;;  %v233_v42 = vsel %vm231_vm6, %v840_v29, %v841_v28 }
  0xa4   : > { %v418_v37 = vpack.c.bf16 %v313_v36, %v286_v35  ;;  %v849_v38 = vpop.permute.xlu1 %848  ;;  %563 = vmatprep.subr.bf16.mxu1 %v421_v33 }
  0xa5   : > { %v851_v40 = vunpack.i.h.bf16 %v849_v38  ;;  %v850_v41 = vunpack.i.l.bf16 %v849_v38  ;;  %564 = vmatpush1.bf16.msra.mxu1 %v420_v34 }
  0xa6   : > { %v1088_v43 = vpop.permute.xlu0 %843  ;;  %511 = vmatpush1.bf16.msra.mxu0 %v418_v37 }
  0xa7   : > { %v260_v44 = vsel %vm258_vm7, %v850_v41, %v851_v40  ;;  %v846_v46 = vunpack.i.h.bf16 %v1088_v43  ;;  %v845_v47 = vunpack.i.l.bf16 %v1088_v43 }
  0xa8   : > { %v218_v48 = vpop.permute.xlu1 %217  ;;  %v413_v49 = vpack.c.bf16 %v260_v44, %v233_v42 }
  0xa9   : > { %v235_v56 = vsel %vm231_vm6, %v845_v47, %v846_v46  ;;  %v234_v57 = vsel %vm231_vm6, %v841_v28, %v845_v47  ;;  %v232_v2 = vsel %vm231_vm6, %v218_v48, %v840_v29 }
  0xaa   : > { %v1093_v50 = vpop.permute.xlu0 %853  ;;  %512 = vmatprep.subr.bf16.mxu0 %v413_v49 }
  0xab   : > { %v856_v53 = vunpack.i.h.bf16 %v1093_v50  ;;  %v855_v54 = vunpack.i.l.bf16 %v1093_v50 }
  0xac   : > { %v859_v55 = vpop.permute.xlu1 %858 }
  0xad   : > { %v861_v58 = vunpack.i.h.bf16 %v859_v55  ;;  %v860_v59 = vunpack.i.l.bf16 %v859_v55  ;;  %v262_v60 = vsel %vm258_vm7, %v855_v54, %v856_v53  ;;  %v261_v61 = vsel %vm258_vm7, %v851_v40, %v855_v54 }
  0xae   : > { %v245_v62 = vpop.permute.xlu0 %244  ;;  %v415_v63 = vpack.c.bf16 %v262_v60, %v235_v56  ;;  %v414_v1 = vpack.c.bf16 %v261_v61, %v234_v57 }
  0xaf   : > { %v259_v8 = vsel %vm258_vm7, %v245_v62, %v850_v41  ;;  %v206_v9 = vsel %vm204_vm8, %v860_v59, %v861_v58 }
  0xb0   : > { %v412_v10 = vpack.c.bf16 %v259_v8, %v232_v2  ;;  %v191_v11 = vpop.permute.xlu1 %190  ;;  %565 = vmatprep.subr.bf16.mxu1 %v415_v63  ;;  %v407_v12 = vpack.c.bf16 %v206_v9, %v974_v5  ;;  %v1121_v5 = vld [vmem:[%s1221_s1] sm:$0xff]  }
  0xb1   : > { %v205_v16 = vsel %vm204_vm8, %v191_v11, %v860_v59  ;;  %566 = vmatpush1.bf16.msra.mxu1 %v414_v1 }
  0xb2   : > { %v406_v18 = vpack.c.bf16 %v205_v16, %v972_v4  ;;  %v1111_v19 = vpop.permute.xlu0 %863  ;;  %513 = vmatpush1.bf16.msra.mxu0 %v412_v10 }
  0xb3   : > { %v866_v20 = vunpack.i.h.bf16 %v1111_v19  ;;  %v865_v24 = vunpack.i.l.bf16 %v1111_v19  ;;  %514 = vmatprep.subr.bf16.mxu0 %v407_v12 }
  0xb4   : > { %v874_v25 = vpop.permute.xlu1 %873 }
  0xb5   : > { %v208_v26 = vsel %vm204_vm8, %v865_v24, %v866_v20  ;;  %v207_v4 = vsel %vm204_vm8, %v861_v58, %v865_v24  ;;  %v876_v30 = vunpack.i.h.bf16 %v874_v25  ;;  %v875_v34 = vunpack.i.l.bf16 %v874_v25  ;;  %v910_v58 = vld [vmem:[%s1221_s1 + $0x8] sm:$0xff]  }
  0xb6   : > { %v869_v27 = vpop.permute.xlu0 %868  ;;  %515 = vmatpush1.bf16.msra.mxu0 %v406_v18  ;;  %v409_v28 = vpack.c.bf16 %v208_v26, %v978_v7  ;;  %v408_v29 = vpack.c.bf16 %v207_v4, %v976_v6 }
  0xb7   : > { %v871_v31 = vunpack.i.h.bf16 %v869_v27  ;;  %v870_v32 = vunpack.i.l.bf16 %v869_v27  ;;  %v345_v42 = vsel %vm339_vm1, %v875_v34, %v876_v30 }
  0xb8   : > { %v884_v33 = vpop.permute.xlu1 %883  ;;  %567 = vmatprep.subr.bf16.mxu1 %v409_v28 }
  0xb9   : > { %v399_v35 = vsel %vm393_vm0, %v870_v32, %v871_v31  ;;  %748 = vmatmul.mubr.msk.bf16.vlgmr.msra.gmra.mxu0 %vm474_vm9, %v1121_v5  ;;  %568 = vmatpush1.bf16.msra.mxu1 %v408_v29  ;;  %v398_v36 = vsel %vm393_vm0, %v1036_v21, %v870_v32  ;;  %v886_v6 = vunpack.i.h.bf16 %v884_v33  ;;  %v885_v44 = vunpack.i.l.bf16 %v884_v33 }
  0xba   : > { %v435_v37 = vpack.c.bf16 %v399_v35, %v399_v35  ;;  %v879_v7 = vpop.permute.xlu0 %878  ;;  %v434_v38 = vpack.c.bf16 %v398_v36, %v398_v36  ;;  %542 = vmatprep.mubr.bf16.mxu0 %v926_v13  ;;  %v344_v21 = vsel %vm339_vm1, %v806_v45, %v875_v34 }
  0xbb   : > { %v881_v40 = vunpack.i.h.bf16 %v879_v7  ;;  %v880_v41 = vunpack.i.l.bf16 %v879_v7  ;;  %v290_v59 = vsel %vm285_vm4, %v826_v17, %v885_v44 }
  0xbc   : > { %v894_v47 = vpop.permute.xlu1 %893  ;;  %751 = vmatmul.mubr.msk.bf16.vlgmr.msra.gmra.mxu1 %vm474_vm9, %v1121_v5  ;;  %753 = vmatprep.subr.msk.bf16.mxu0 %vm481_vm2, %v435_v37  ;;  %v495_v48 = vsel %vm481_vm2, %v434_v38, 0 }
  0xbd   : > { %v371_v49 = vsel %vm366_vm3, %v816_v52, %v880_v41  ;;  %758 = vmatprep.subr.msk.bf16.mxu1 %vm481_vm2, %v435_v37  ;;  %613 = vmatpush1.bf16.msra.mxu0 %v495_v48  ;;  %v372_v54 = vsel %vm366_vm3, %v880_v41, %v881_v40  ;;  %v896_v39 = vunpack.i.h.bf16 %v894_v47  ;;  %v291_v52 = vsel %vm285_vm4, %v885_v44, %v886_v6 }
  0xbe   : > { %v428_v55 = vpack.c.bf16 %v371_v49, %v344_v21  ;;  %763 = vmatpush1.bf16.msra.mxu1 %v495_v48  ;;  %v889_v56 = vpop.permute.xlu0 %888  ;;  %v429_v57 = vpack.c.bf16 %v372_v54, %v345_v42  ;;  %595 = vmatprep.mubr.bf16.mxu1 %v926_v13  ;;  %v895_v60 = vunpack.i.l.bf16 %v894_v47 }
  0xbf   : > { %v891_v45 = vunpack.i.h.bf16 %v889_v56  ;;  %v890_v51 = vunpack.i.l.bf16 %v889_v56 }
  0xc0   : > { %v904_v61 = vpop.permute.xlu1 %903  ;;  %614 = vmatprep.subr.bf16.mxu0 %v429_v57  ;;  %759 = vmatprep.subr.bf16.mxu1 %v429_v57  ;;  %v237_v11 = vsel %vm231_vm6, %v895_v60, %v896_v39  ;;  %v236_v22 = vsel %vm231_vm6, %v846_v46, %v895_v60 }
  0xc1   : > { %v317_v62 = vsel %vm312_vm5, %v836_v23, %v890_v51  ;;  %v906_v63 = vunpack.i.h.bf16 %v904_v61  ;;  %v905_v1 = vunpack.i.l.bf16 %v904_v61  ;;  %615 = vmatpush1.bf16.msra.mxu0 %v428_v55  ;;  %v318_v2 = vsel %vm312_vm5, %v890_v51, %v891_v45 }
  0xc2   : > { %v422_v8 = vpack.c.bf16 %v317_v62, %v290_v59  ;;  %764 = vmatpush1.bf16.msra.mxu1 %v428_v55  ;;  %v899_v9 = vpop.permute.xlu0 %898  ;;  %749 = vmatmul.mubr.msk.bf16.gmra.mxu0 %vm474_vm9, %v910_v58  ;;  %v423_v15 = vpack.c.bf16 %v318_v2, %v291_v52 }
  0xc3   : > { %v901_v17 = vunpack.i.h.bf16 %v899_v9  ;;  %v900_v10 = vunpack.i.l.bf16 %v899_v9  ;;  %v210_v12 = vsel %vm204_vm8, %v905_v1, %v906_v63  ;;  %638 = vmatprep.mubr.bf16.mxu0 %v926_v13  ;;  %v209_v43 = vsel %vm204_vm8, %v866_v20, %v905_v1 }
  0xc4   : > { %752 = vmatmul.mubr.msk.bf16.gmra.mxu1 %vm474_vm9, %v910_v58  ;;  %616 = vmatprep.subr.bf16.mxu0 %v423_v15  ;;  %v411_v25 = vpack.c.bf16 %v210_v12, %v181_v14  ;;  %v410_v46 = vpack.c.bf16 %v209_v43, %v970_v3 }
  0xc5   : > { %v263_v23 = vsel %vm258_vm7, %v856_v53, %v900_v10  ;;  %760 = vmatprep.subr.bf16.mxu1 %v423_v15  ;;  %617 = vmatpush1.bf16.msra.mxu0 %v422_v8  ;;  %v264_v16 = vsel %vm258_vm7, %v900_v10, %v901_v17 }
  0xc6   : > { %v416_v18 = vpack.c.bf16 %v263_v23, %v236_v22  ;;  %765 = vmatpush1.bf16.msra.mxu1 %v422_v8  ;;  %v417_v24 = vpack.c.bf16 %v264_v16, %v237_v11  ;;  %648 = vmatprep.mubr.bf16.mxu1 %v926_v13 }
  0xc8   : > { %618 = vmatprep.subr.bf16.mxu0 %v417_v24  ;;  %761 = vmatprep.subr.bf16.mxu1 %v417_v24 }
  0xc9   : > { %619 = vmatpush1.bf16.msra.mxu0 %v416_v18 }
  0xca   : > { %766 = vmatpush1.bf16.msra.mxu1 %v416_v18  ;;  %620 = vmatprep.subr.bf16.mxu0 %v411_v25 }
  0xcb   : > { %762 = vmatprep.subr.bf16.mxu1 %v411_v25 }
  0xcd   : > { %621 = vmatpush1.bf16.msra.mxu0 %v410_v46  ;;  %v1185_v50 = vpop.permute.xlu1 %451 }
  0xce   : > { %767 = vmatpush1.bf16.msra.mxu1 %v410_v46 }
  0xcf   : > { %v447_v0 = vpop.permute.xlu0 %446 }
  0xd0   : > { %754 = vmatmul.mubr.msk.bf16.vlgmr.msra.gmra.mxu0 %vm474_vm9, %v1121_v5 }
  0xd1   : > { %755 = vmatmul.mubr.msk.bf16.vlgmr.msra.gmra.mxu1 %vm474_vm9, %v910_v58  ;;  %v457_v31 = vpop.permute.xlu1 %456 }
  0xd3   : > { %v462_v37 = vpop.permute.xlu0 %461 }
 0x179   : > { %v534_v3 = vpop.f32.mrf.mxu0 }
 0x17a   : > { %v535_v13 = vadd.f32 %v534_v3, %v447_v0 }
 0x17b   : > { %v536_v14 = vpop.f32.mrf.mxu0 }
 0x17c   : > { %v587_v53 = vpop.f32.mrf.mxu1  ;;  %v537_v19 = vadd.f32 %v536_v14, %v447_v0  ;;  %659 = vst [vmem:[%s1183_s16] sm:$0xff] %v535_v13 }
 0x17d   : > { %v588_v20 = vadd.f32 %v587_v53, %v447_v0  ;;  %v538_v26 = vpop.f32.mrf.mxu0 }
 0x17e   : > { %660 = vst [vmem:[%s1183_s16 + $0x8] sm:$0xff] %v537_v19  ;;  %v539_v5 = vadd.f32 %v538_v26, %v1185_v50  ;;  %v589_v4 = vpop.f32.mrf.mxu1 }
 0x17f   : > { %661 = vst [vmem:[%s1183_s16 + $0x10] sm:$0xff] %v588_v20  ;;  %v590_v27 = vadd.f32 %v589_v4, %v447_v0  ;;  %v540_v28 = vpop.f32.mrf.mxu0 }
 0x180   : > { %665 = vst [vmem:[%s1183_s16 + $0x30] sm:$0xff] %v539_v5  ;;  %v541_v29 = vadd.f32 %v540_v28, %v1185_v50  ;;  %v591_v30 = vpop.f32.mrf.mxu1 }
 0x181   : > { %662 = vst [vmem:[%s1183_s16 + $0x18] sm:$0xff] %v590_v27  ;;  %v592_v32 = vadd.f32 %v591_v30, %v1185_v50 }
 0x182   : > { %666 = vst [vmem:[%s1183_s16 + $0x38] sm:$0xff] %v541_v29  ;;  %v544_v33 = vpop.f32.mrf.mxu0  ;;  %v593_v34 = vpop.f32.mrf.mxu1 }
 0x183   : > { %667 = vst [vmem:[%s1183_s16 + $0x40] sm:$0xff] %v592_v32  ;;  %v594_v35 = vadd.f32 %v593_v34, %v1185_v50  ;;  %v545_v36 = vadd.f32 %v544_v33, %v457_v31 }
 0x184   : > { %v546_v7 = vpop.f32.mrf.mxu0  ;;  %v597_v38 = vpop.f32.mrf.mxu1 }
 0x185   : > { %668 = vst [vmem:[%s1183_s16 + $0x48] sm:$0xff] %v594_v35  ;;  %v547_v6 = vadd.f32 %v546_v7, %v457_v31  ;;  %v598_v40 = vadd.f32 %v597_v38, %v457_v31  ;;  %671 = vst [vmem:[%s1183_s16 + $0x60] sm:$0xff] %v545_v36 }
 0x186   : > { %v548_v41 = vpop.f32.mrf.mxu0  ;;  %v599_v42 = vpop.f32.mrf.mxu1 }
 0x187   : > { %v600_v44 = vadd.f32 %v599_v42, %v457_v31  ;;  %672 = vst [vmem:[%s1183_s16 + $0x68] sm:$0xff] %v547_v6  ;;  %673 = vst [vmem:[%s1183_s16 + $0x70] sm:$0xff] %v598_v40  ;;  %v549_v47 = vadd.f32 %v548_v41, %v462_v37 }
 0x188   : > { %v550_v48 = vpop.f32.mrf.mxu0  ;;  %v601_v21 = vpop.f32.mrf.mxu1 }
 0x189   : > { %674 = vst [vmem:[%s1183_s16 + $0x78] sm:$0xff] %v600_v44  ;;  %677 = vst [vmem:[%s1183_s16 + $0x90] sm:$0xff] %v549_v47  ;;  %v551_v49 = vadd.f32 %v550_v48, %v462_v37  ;;  %v602_v54 = vadd.f32 %v601_v21, %v462_v37 }
 0x18a   : > { %v603_v55 = vpop.f32.mrf.mxu1 }
 0x18b   : > { %678 = vst [vmem:[%s1183_s16 + $0x98] sm:$0xff] %v551_v49  ;;  %679 = vst [vmem:[%s1183_s16 + $0xa0] sm:$0xff] %v602_v54  ;;  %v604_v56 = vadd.f32 %v603_v55, %v462_v37 }
 0x18d   : > { %680 = vst [vmem:[%s1183_s16 + $0xa8] sm:$0xff] %v604_v56 }
 0x190   : > { %v640_v57 = vpop.f32.mrf.mxu0 }
 0x191   : > { %v641_v58 = vadd.f32 %v640_v57, %v447_v0  ;;  %v650_v39 = vpop.f32.mrf.mxu1 }
 0x192   : > { %v651_v45 = vadd.f32 %v650_v39, %v457_v31  ;;  %v642_v51 = vpop.f32.mrf.mxu0 }
 0x193   : > { %663 = vst [vmem:[%s1183_s16 + $0x20] sm:$0xff] %v641_v58  ;;  %v643_v52 = vadd.f32 %v642_v51, %v447_v0  ;;  %v652_v59 = vpop.f32.mrf.mxu1 }
 0x194   : > { %675 = vst [vmem:[%s1183_s16 + $0x80] sm:$0xff] %v651_v45  ;;  %v653_v60 = vadd.f32 %v652_v59, %v457_v31  ;;  %v644_v61 = vpop.f32.mrf.mxu0 }
 0x195   : > { %664 = vst [vmem:[%s1183_s16 + $0x28] sm:$0xff] %v643_v52  ;;  %v645_v62 = vadd.f32 %v644_v61, %v1185_v50  ;;  %v654_v63 = vpop.f32.mrf.mxu1 }
 0x196   : > { %676 = vst [vmem:[%s1183_s16 + $0x88] sm:$0xff] %v653_v60  ;;  %v655_v1 = vadd.f32 %v654_v63, %v462_v37  ;;  %v646_v2 = vpop.f32.mrf.mxu0 }
 0x197   : > { %669 = vst [vmem:[%s1183_s16 + $0x50] sm:$0xff] %v645_v62  ;;  %v647_v8 = vadd.f32 %v646_v2, %v1185_v50  ;;  %v656_v9 = vpop.f32.mrf.mxu1 }
 0x198   : > { %681 = vst [vmem:[%s1183_s16 + $0xb0] sm:$0xff] %v655_v1  ;;  %v657_v15 = vadd.f32 %v656_v9, %v462_v37 }
 0x199   : > { %670 = vst [vmem:[%s1183_s16 + $0x58] sm:$0xff] %v647_v8 }
 0x19a   : > { %682 = vst [vmem:[%s1183_s16 + $0xb8] sm:$0xff] %v657_v15 }
 0x19b PF: > { %s13_s12 = sadd.s32 1, %s917_s12  }
 0x19c   : > { %p10_p4 = scmp.ge.s32.totalorder %s13_s12, 6  }
 0x19e   :  { %12 = sbr.rel (!%p10_p4) target bundleno = 1 (0x1), region = 62 }

// kernel: _lambda_.8
= control target key start
LH: loop header
LB: loop body
LE: loop exit
PB: predicated region body
PF: predicated region fallthrough
CT: control target
= control target key end

     0   :  { %s1342_s12 = smov 0   ;;  %s1661_s0 = inlined_call_operand.vmem [shape: f32[4,32,768], index: 0, kind: input, shape index: {}]   ;;  %s1662_s1 = inlined_call_operand.vmem [shape: bf16[32,72], index: 1, kind: input, shape index: {}]   ;;  %s1663_s2 = inlined_call_operand.vmem [shape: f32[1,768], index: 2, kind: input, shape index: {}]   ;;  %s1664_s3 = inlined_call_operand.vmem [shape: bf16[4,8,768], index: 3, kind: output, shape index: {}]  }
   0x1 LB: > { %s1007_s13 = sadd.s32 4294967295, %s1308_s12   ;;  %p1011_p0 = scmp.ge.s32.totalorder %s1308_s12, 1  ;;  %s1308_s12 = sphi %s1342_s12, %s13_s12  }
   0x2   : > { %p137_p1 = scmp.lt.s32.totalorder %s1308_s12, 5 }
   0x4   : > { %p138_p2 = pnand %p1011_p0, %p137_p1 }
   0x5   : > { %p161_p3 = scmp.lt.s32.totalorder (!%p138_p2), %s1007_s13, 3  ;;  %p1014_p4 = scmp.ne.s32.totalorder (!%p138_p2), %s1007_s13, 0 }
   0x6   : > { %141 = sbr.rel (%p138_p2) target bundleno = 597 (0x255), region = 32 }
   0xb   : > { %s162_s14 = scalar_select %p161_p3, %s1007_s13, 3 }
   0xc   : > { %175 = sbr.rel (%p1014_p4) target bundleno = 23 (0x17), region = 36 }
   0xd   : > { %s1062_s15 = smul.u32 192, %s162_s14 }
   0xe   : > { %s1063_s16 = smul.u32 24, %s162_s14 }
   0xf   : > { %s1353_s19 = scalar_lea.vmem %s1661_s0, %s1062_s15 }
  0x10   : > { %s1358_s22 = scalar_lea.vmem %s1664_s3, %s1063_s16 }
  0x11   : > { %v1310_v0 = vmov 0   ;;  %v1311_v1 = vmov 0.0  }
  0x12   : > { %176 = vst [vmem:[#allocation2] sm:$0xff] %v1310_v0  ;;  %177 = vst [vmem:[#allocation2 + $0x8] sm:$0xff] %v1310_v0 }
  0x13   : > { %178 = vst [vmem:[#allocation2 + $0x10] sm:$0xff] %v1310_v0  ;;  %179 = vst [vmem:[#allocation2 + $0x18] sm:$0xf] %v1310_v0 }
  0x14   : > { %180 = vst [vmem:[#allocation3 + $0x28] sm:$0xff] %v1311_v1  ;;  %181 = vst [vmem:[#allocation3 + $0x10] sm:$0xff] %v1311_v1 }
  0x15   : > { %182 = vst [vmem:[#allocation3 + $0x8] sm:$0xff] %v1311_v1  ;;  %183 = vst [vmem:[#allocation3] sm:$0xff] %v1311_v1 }
  0x16   : > { %184 = vst [vmem:[#allocation3 + $0x18] sm:$0xff] %v1311_v1  ;;  %185 = vst [vmem:[#allocation3 + $0x20] sm:$0xff] %v1311_v1 }
  0x17 PF: > { %s1312_s23 = smov 92   ;;  %s1313_s24 = smov 90   ;;  %v1319_v13 = vmov 0   ;;  %vm407_vm0 = vcmask 736256   ;;  %vm380_vm1 = vcmask 744448   ;;  %vm353_vm2 = vcmask 752640  }
  0x18   : > { %s1314_s25 = smov 91   ;;  %s1315_s26 = smov 108   ;;  %546 = vmatprep.mubr.bf16.mxu0 %v1319_v13  ;;  %599 = vmatprep.mubr.bf16.mxu1 %v1319_v13  ;;  %vm495_vm3 = vcmask 1043456   ;;  %vm299_vm4 = vcmask 891904   ;;  %vm326_vm5 = vcmask 883712   ;;  %vm272_vm6 = vcmask 900096  }
  0x19   : > { %v186_v2 = vld [vmem:[#allocation2] sm:$0xff]  ;;  %v187_v3 = vld [vmem:[#allocation2 + $0x8] sm:$0xff]  ;;  %s1316_s27 = smov 109   ;;  %s1317_s28 = smov 110   ;;  %vm245_vm7 = vcmask 1031168   ;;  %vm218_vm8 = vcmask 1039360  }
  0x1a   : > { %v1360_v4 = vunpack.c.h.bf16 %v186_v2  ;;  %v1362_v5 = vunpack.c.l.bf16 %v187_v3  ;;  %v1364_v6 = vunpack.c.l.bf16 %v186_v2  ;;  %v1366_v7 = vunpack.c.h.bf16 %v187_v3  ;;  %s1318_s29 = smov 126   ;;  %v188_v12 = vld [vmem:[#allocation2 + $0x10] sm:$0xff]  ;;  %v189_v16 = vld [vmem:[#allocation2 + $0x18] sm:$0xf]  ;;  %s1320_s30 = smov 127  }
  0x1b   : > { %v1389_v14 = vunpack.c.l.bf16 %v188_v12  ;;  %v1391_v15 = vunpack.c.h.bf16 %v188_v12  ;;  %v196_v17 = vunpack.c.l.bf16 %v189_v16  ;;  %vm488_vm9 = vcmask 588800   ;;  %s1321_s10 = smov 19  }
  0x1c   : > { %v1094_v8 = vpack.i.bf16 %v1362_v5, %v1360_v4  ;;  %v1084_v9 = vpack.i.bf16 %v1360_v4, %v1364_v6  ;;  %v1089_v10 = vpack.i.bf16 %v1366_v7, %v1362_v5  ;;  %v1109_v11 = vpack.i.bf16 %v1366_v7, %v1364_v6 }
  0x1d   : > { %v1154_v18 = vpack.i.bf16 %v1391_v15, %v1389_v14  ;;  %v1189_v19 = vpack.i.bf16 %v196_v17, %v1391_v15  ;;  %v1184_v20 = vpack.i.bf16 %v1389_v14, %v1366_v7  ;;  %vm938_vm10 = vcmask 1043608  }
  0x1e   : > { %1095 = vrot.lane.b32.xlu1 %v1094_v8, %s1312_s23  ;;  %1085 = vrot.lane.b32.xlu0 %v1084_v9, %s1313_s24  ;;  %vm939_vm11 = vcmask 1047556   ;;  %vm927_vm12 = vcmask 154624   ;;  %vm944_vm14 = vcmask 150528  }
  0x1f   : > { %vm940_vm13 = vmor %vm939_vm11, %vm938_vm10 }
  0x22   : > { %1100 = vrot.lane.b32.xlu1 %v1094_v8, %s1314_s25  ;;  %1090 = vrot.lane.b32.xlu0 %v1089_v10, %s1313_s24 }
  0x26   : > { %1110 = vrot.lane.b32.xlu1 %v1109_v11, %s1314_s25  ;;  %1105 = vrot.lane.b32.xlu0 %v1109_v11, %s1312_s23 }
  0x2a   : > { %1120 = vrot.lane.b32.xlu1 %v1094_v8, %s1315_s26  ;;  %1115 = vrot.lane.b32.xlu0 %v1094_v8, %s1316_s27 }
  0x2e   : > { %1130 = vrot.lane.b32.xlu1 %v1109_v11, %s1315_s26  ;;  %1125 = vrot.lane.b32.xlu0 %v1109_v11, %s1316_s27 }
  0x32   : > { %1140 = vrot.lane.b32.xlu1 %v1094_v8, %s1317_s28  ;;  %1135 = vrot.lane.b32.xlu0 %v1094_v8, %s1318_s29 }
  0x36   : > { %258 = vrot.lane.b32.xlu1 %v1364_v6, %s1317_s28  ;;  %1145 = vrot.lane.b32.xlu0 %v1109_v11, %s1318_s29 }
  0x3a   : > { %204 = vrot.lane.b32.xlu1 %v1364_v6, %s1320_s30  ;;  %1150 = vrot.lane.b32.xlu0 %v1094_v8, %s1320_s30 }
  0x3e   : > { %405 = vrot.lane.b32.xlu1 %v196_v17, %s1313_s24  ;;  %1155 = vrot.lane.b32.xlu0 %v1154_v18, %s1313_s24 }
  0x42   : > { %351 = vrot.lane.b32.xlu1 %v196_v17, %s1312_s23  ;;  %1160 = vrot.lane.b32.xlu0 %v1154_v18, %s1312_s23 }
  0x46   : > { %378 = vrot.lane.b32.xlu1 %v196_v17, %s1314_s25  ;;  %1165 = vrot.lane.b32.xlu0 %v1154_v18, %s1314_s25 }
  0x4a   : > { %297 = vrot.lane.b32.xlu1 %v196_v17, %s1316_s27  ;;  %1170 = vrot.lane.b32.xlu0 %v1154_v18, %s1316_s27 }
  0x4e   : > { %324 = vrot.lane.b32.xlu1 %v196_v17, %s1315_s26  ;;  %1175 = vrot.lane.b32.xlu0 %v1154_v18, %s1315_s26 }
  0x52   : > { %243 = vrot.lane.b32.xlu1 %v196_v17, %s1318_s29  ;;  %1180 = vrot.lane.b32.xlu0 %v1154_v18, %s1318_s29 }
  0x56   : > { %1190 = vrot.lane.b32.xlu1 %v1189_v19, %s1317_s28  ;;  %1185 = vrot.lane.b32.xlu0 %v1184_v20, %s1317_s28 }
  0x5a   : > { %1200 = vrot.lane.b32.xlu1 %v1189_v19, %s1320_s30  ;;  %1195 = vrot.lane.b32.xlu0 %v1184_v20, %s1320_s30 }
  0x90   : > { %v1409_v21 = vpop.permute.xlu1 %1095  ;;  %v1086_v22 = vpop.permute.xlu0 %1085 }
  0x91   : > { %v1088_v23 = vunpack.i.h.bf16 %v1086_v22  ;;  %v1087_v24 = vunpack.i.l.bf16 %v1086_v22  ;;  %v1098_v26 = vunpack.i.h.bf16 %v1409_v21  ;;  %v1097_v29 = vunpack.i.l.bf16 %v1409_v21 }
  0x93   : > { %v408_v25 = vsel %vm407_vm0, %v1087_v24, %v1088_v23  ;;  %v355_v41 = vsel %vm353_vm2, %v1097_v29, %v1098_v26 }
  0x94   : > { %v1413_v27 = vpop.permute.xlu1 %1100  ;;  %v1415_v28 = vpop.permute.xlu0 %1090  ;;  %v444_v33 = vpack.c.bf16 %v408_v25, %v408_v25 }
  0x95   : > { %v1103_v30 = vunpack.i.h.bf16 %v1413_v27  ;;  %v1102_v31 = vunpack.i.l.bf16 %v1413_v27  ;;  %v1092_v32 = vunpack.i.l.bf16 %v1415_v28  ;;  %v1093_v18 = vunpack.i.h.bf16 %v1415_v28 }
  0x96   : > { %v497_v42 = vsel %vm495_vm3, %v444_v33, 0 }
  0x97   : > { %v409_v34 = vsel %vm407_vm0, %v1088_v23, %v1092_v32  ;;  %v382_v35 = vsel %vm380_vm1, %v1102_v31, %v1103_v30 }
  0x98   : > { %v1427_v36 = vpop.permute.xlu1 %1110  ;;  %v1429_v37 = vpop.permute.xlu0 %1105  ;;  %v445_v38 = vpack.c.bf16 %v409_v34, %v409_v34  ;;  %v439_v43 = vpack.c.bf16 %v382_v35, %v355_v41  ;;  %v410_v34 = vsel %vm407_vm0, %v1092_v32, %v1093_v18 }
  0x99   : > { %v1112_v39 = vunpack.i.l.bf16 %v1427_v36  ;;  %v1107_v40 = vunpack.i.l.bf16 %v1429_v37 }
  0x9a   : > { %1017 = vmatprep.subr.msk.bf16.mxu0 %vm495_vm3, %v445_v38 }
  0x9b   : > { %521 = vmatpush1.bf16.msra.mxu0 %v497_v42  ;;  %v354_v44 = vsel %vm353_vm2, %v1107_v40, %v1097_v29  ;;  %v381_v45 = vsel %vm380_vm1, %v1112_v39, %v1102_v31 }
  0x9c   : > { %v1440_v46 = vpop.permute.xlu1 %1120  ;;  %v1442_v47 = vpop.permute.xlu0 %1115  ;;  %522 = vmatprep.subr.bf16.mxu0 %v439_v43  ;;  %v438_v48 = vpack.c.bf16 %v381_v45, %v354_v44  ;;  %v1498_v43 = vld [vmem:[%s1662_s1] sm:$0xff]   ;;  %v446_v44 = vpack.c.bf16 %v410_v34, %v410_v34 }
  0x9d   : > { %v1123_v49 = vunpack.i.h.bf16 %v1440_v46  ;;  %v1122_v50 = vunpack.i.l.bf16 %v1440_v46  ;;  %v1118_v51 = vunpack.i.h.bf16 %v1442_v47  ;;  %v1117_v52 = vunpack.i.l.bf16 %v1442_v47 }
  0x9f   : > { %523 = vmatpush1.bf16.msra.mxu0 %v438_v48  ;;  %v301_v53 = vsel %vm299_vm4, %v1117_v52, %v1118_v51  ;;  %v328_v54 = vsel %vm326_vm5, %v1122_v50, %v1123_v49 }
  0xa0   : > { %v1454_v55 = vpop.permute.xlu1 %1130  ;;  %v1456_v56 = vpop.permute.xlu0 %1125  ;;  %v433_v57 = vpack.c.bf16 %v328_v54, %v301_v53  ;;  %v1113_v53 = vunpack.i.h.bf16 %v1427_v36  ;;  %v1108_v54 = vunpack.i.h.bf16 %v1429_v37 }
  0xa1   : > { %v1132_v58 = vunpack.i.l.bf16 %v1454_v55  ;;  %v1127_v59 = vunpack.i.l.bf16 %v1456_v56 }
  0xa2   : > { %524 = vmatprep.subr.bf16.mxu0 %v433_v57 }
  0xa3   : > { %v300_v60 = vsel %vm299_vm4, %v1127_v59, %v1117_v52  ;;  %v327_v61 = vsel %vm326_vm5, %v1132_v58, %v1122_v50  ;;  %v503_v59 = vsel %vm495_vm3, %v446_v44, 0 }
  0xa4   : > { %v1462_v62 = vpop.permute.xlu1 %1140  ;;  %v1464_v63 = vpop.permute.xlu0 %1135  ;;  %v432_v0 = vpack.c.bf16 %v327_v61, %v300_v60 }
  0xa5   : > { %v1143_v1 = vunpack.i.h.bf16 %v1462_v62  ;;  %v1142_v2 = vunpack.i.l.bf16 %v1462_v62  ;;  %v1138_v3 = vunpack.i.h.bf16 %v1464_v63  ;;  %v1137_v8 = vunpack.i.l.bf16 %v1464_v63 }
  0xa6   : > { %525 = vmatpush1.bf16.msra.mxu0 %v432_v0 }
  0xa7   : > { %v247_v9 = vsel %vm245_vm7, %v1137_v8, %v1138_v3  ;;  %v274_v10 = vsel %vm272_vm6, %v1142_v2, %v1143_v1 }
  0xa8   : > { %v259_v11 = vpop.permute.xlu1 %258  ;;  %v1476_v12 = vpop.permute.xlu0 %1145  ;;  %v427_v16 = vpack.c.bf16 %v274_v10, %v247_v9  ;;  %v356_v9 = vsel %vm353_vm2, %v1098_v26, %v1108_v54  ;;  %v383_v10 = vsel %vm380_vm1, %v1103_v30, %v1113_v53  ;;  %v1537_v26 = vld [vmem:[%s1662_s1 + $0x8] sm:$0xff]   ;;  %v1133_v30 = vunpack.i.h.bf16 %v1454_v55 }
  0xa9   : > { %v1147_v17 = vunpack.i.l.bf16 %v1476_v12  ;;  %v273_v19 = vsel %vm272_vm6, %v259_v11, %v1142_v2  ;;  %v440_v27 = vpack.c.bf16 %v383_v10, %v356_v9 }
  0xaa   : > { %526 = vmatprep.subr.bf16.mxu0 %v427_v16 }
  0xab   : > { %v246_v20 = vsel %vm245_vm7, %v1147_v17, %v1137_v8 }
  0xac   : > { %v205_v22 = vpop.permute.xlu1 %204  ;;  %v1482_v23 = vpop.permute.xlu0 %1150  ;;  %v426_v24 = vpack.c.bf16 %v273_v19, %v246_v20 }
  0xad   : > { %v1153_v25 = vunpack.i.h.bf16 %v1482_v23  ;;  %v1152_v29 = vunpack.i.l.bf16 %v1482_v23 }
  0xae   : > { %527 = vmatpush1.bf16.msra.mxu0 %v426_v24 }
  0xaf   : > { %v220_v31 = vsel %vm218_vm8, %v1152_v29, %v1153_v25  ;;  %v219_v33 = vsel %vm218_vm8, %v205_v22, %v1152_v29  ;;  %v1128_v29 = vunpack.i.h.bf16 %v1456_v56 }
  0xb0   : > { %v406_v35 = vpop.permute.xlu1 %405  ;;  %v1156_v38 = vpop.permute.xlu0 %1155  ;;  %v421_v39 = vpack.c.bf16 %v220_v31, %v1360_v4  ;;  %v420_v40 = vpack.c.bf16 %v219_v33, %v1364_v6 }
  0xb1   : > { %v1158_v41 = vunpack.i.h.bf16 %v1156_v38  ;;  %v1157_v42 = vunpack.i.l.bf16 %v1156_v38 }
  0xb2   : > { %528 = vmatprep.subr.bf16.mxu0 %v421_v39 }
  0xb3   : > { %v413_v45 = vsel %vm407_vm0, %v1158_v41, %v406_v35  ;;  %529 = vmatpush1.bf16.msra.mxu0 %v420_v40  ;;  %v411_v28 = vsel %vm407_vm0, %v1093_v18, %v1157_v42  ;;  %v412_v32 = vsel %vm407_vm0, %v1157_v42, %v1158_v41  ;;  %v302_v40 = vsel %vm299_vm4, %v1118_v51, %v1128_v29 }
  0xb4   : > { %v1503_v4 = vpack.c.bf16 %v413_v45, %v413_v45  ;;  %v352_v6 = vpop.permute.xlu1 %351  ;;  %v1161_v48 = vpop.permute.xlu0 %1160  ;;  %v447_v50 = vpack.c.bf16 %v411_v28, %v411_v28  ;;  %v448_v52 = vpack.c.bf16 %v412_v32, %v412_v32  ;;  %v329_v41 = vsel %vm326_vm5, %v1123_v49, %v1133_v30 }
  0xb5   : > { %v1163_v57 = vunpack.i.h.bf16 %v1161_v48  ;;  %v1162_v58 = vunpack.i.l.bf16 %v1161_v48  ;;  %v434_v47 = vpack.c.bf16 %v329_v41, %v302_v40  ;;  %v1148_v51 = vunpack.i.h.bf16 %v1476_v12  ;;  %v462_v41 = vld [vmem:[%s1353_s19 + $0x60] sm:$0xff] }
  0xb6   : > { %1018 = vmatmul.mubr.msk.bf16.vlgmr.msra.gmra.mxu0 %vm488_vm9, %v1498_v43  ;;  %1020 = vmatprep.subr.msk.bf16.mxu1 %vm495_vm3, %v447_v50  ;;  %v1512_v60 = vsel %vm495_vm3, %v448_v52, 0 }
  0xb7   : > { %1023 = vmatprep.subr.msk.bf16.mxu0 %vm495_vm3, %v1503_v4  ;;  %574 = vmatpush1.bf16.msra.mxu1 %v503_v59  ;;  %v358_v2 = vsel %vm353_vm2, %v1162_v58, %v1163_v57  ;;  %v357_v8 = vsel %vm353_vm2, %v1108_v54, %v1162_v58  ;;  %v359_v17 = vsel %vm353_vm2, %v1163_v57, %v352_v6 }
  0xb8   : > { %627 = vmatpush1.bf16.msra.mxu0 %v1512_v60  ;;  %v379_v36 = vpop.permute.xlu1 %378  ;;  %v1166_v37 = vpop.permute.xlu0 %1165  ;;  %556 = vmatprep.mubr.bf16.mxu0 %v1319_v13  ;;  %v248_v12 = vsel %vm245_vm7, %v1138_v3, %v1148_v51 }
  0xb9   : > { %v1168_v61 = vunpack.i.h.bf16 %v1166_v37  ;;  %v1167_v0 = vunpack.i.l.bf16 %v1166_v37 }
  0xbb   : > { %v385_v11 = vsel %vm380_vm1, %v1167_v0, %v1168_v61  ;;  %v384_v16 = vsel %vm380_vm1, %v1113_v53, %v1167_v0  ;;  %v386_v18 = vsel %vm380_vm1, %v1168_v61, %v379_v36 }
  0xbc   : > { %v1530_v19 = vpack.c.bf16 %v385_v11, %v358_v2  ;;  %v298_v20 = vpop.permute.xlu1 %297  ;;  %v1171_v22 = vpop.permute.xlu0 %1170  ;;  %v441_v24 = vpack.c.bf16 %v384_v16, %v357_v8  ;;  %v1532_v21 = vpack.c.bf16 %v386_v18, %v359_v17 }
  0xbd   : > { %v1173_v31 = vunpack.i.h.bf16 %v1171_v22  ;;  %v1172_v33 = vunpack.i.l.bf16 %v1171_v22 }
  0xbe   : > { %575 = vmatprep.subr.bf16.mxu1 %v441_v24  ;;  %628 = vmatprep.subr.bf16.mxu0 %v1532_v21 }
  0xbf   : > { %576 = vmatpush1.bf16.msra.mxu1 %v440_v27  ;;  %629 = vmatpush1.bf16.msra.mxu0 %v1530_v19  ;;  %v304_v55 = vsel %vm299_vm4, %v1172_v33, %v1173_v31  ;;  %v303_v56 = vsel %vm299_vm4, %v1128_v29, %v1172_v33  ;;  %v305_v45 = vsel %vm299_vm4, %v1173_v31, %v298_v20 }
  0xc0   : > { %v325_v34 = vpop.permute.xlu1 %324  ;;  %v1176_v35 = vpop.permute.xlu0 %1175  ;;  %1019 = vmatmul.mubr.msk.bf16.gmra.mxu0 %vm488_vm9, %v1537_v26 }
  0xc1   : > { %v1178_v38 = vunpack.i.h.bf16 %v1176_v35  ;;  %v1177_v39 = vunpack.i.l.bf16 %v1176_v35  ;;  %652 = vmatprep.mubr.bf16.mxu0 %v1319_v13 }
  0xc3   : > { %v331_v42 = vsel %vm326_vm5, %v1177_v39, %v1178_v38  ;;  %v330_v44 = vsel %vm326_vm5, %v1133_v30, %v1177_v39  ;;  %v332_v28 = vsel %vm326_vm5, %v1178_v38, %v325_v34 }
  0xc4   : > { %v436_v32 = vpack.c.bf16 %v331_v42, %v304_v55  ;;  %v244_v6 = vpop.permute.xlu1 %243  ;;  %v1181_v48 = vpop.permute.xlu0 %1180  ;;  %v435_v50 = vpack.c.bf16 %v330_v44, %v303_v56  ;;  %v437_v52 = vpack.c.bf16 %v332_v28, %v305_v45  ;;  %v468_v42 = vld [vmem:[%s1353_s19 + $0x90] sm:$0xff]  ;;  %v463_v44 = vld [vmem:[%s1353_s19 + $0x68] sm:$0xff]  ;;  %v469_v28 = vld [vmem:[%s1353_s19 + $0x98] sm:$0xff] }
  0xc5   : > { %v1183_v53 = vunpack.i.h.bf16 %v1181_v48  ;;  %v1182_v46 = vunpack.i.l.bf16 %v1181_v48 }
  0xc6   : > { %577 = vmatprep.subr.bf16.mxu1 %v435_v50  ;;  %630 = vmatprep.subr.bf16.mxu0 %v437_v52 }
  0xc7   : > { %578 = vmatpush1.bf16.msra.mxu1 %v434_v47  ;;  %631 = vmatpush1.bf16.msra.mxu0 %v436_v32  ;;  %v250_v37 = vsel %vm245_vm7, %v1182_v46, %v1183_v53  ;;  %v249_v61 = vsel %vm245_vm7, %v1148_v51, %v1182_v46  ;;  %v251_v0 = vsel %vm245_vm7, %v1183_v53, %v244_v6 }
  0xc8   : > { %v1191_v49 = vpop.permute.xlu1 %1190  ;;  %v1186_v54 = vpop.permute.xlu0 %1185 }
  0xc9   : > { %v1193_v57 = vunpack.i.h.bf16 %v1191_v49  ;;  %v1192_v58 = vunpack.i.l.bf16 %v1191_v49  ;;  %v1188_v59 = vunpack.i.h.bf16 %v1186_v54  ;;  %v1187_v36 = vunpack.i.l.bf16 %v1186_v54 }
  0xcb   : > { %v277_v2 = vsel %vm272_vm6, %v1188_v59, %v1192_v58  ;;  %v276_v8 = vsel %vm272_vm6, %v1187_v36, %v1188_v59  ;;  %v278_v9 = vsel %vm272_vm6, %v1192_v58, %v1193_v57  ;;  %v275_v10 = vsel %vm272_vm6, %v1143_v1, %v1187_v36 }
  0xcc   : > { %v430_v11 = vpack.c.bf16 %v277_v2, %v250_v37  ;;  %v1201_v16 = vpop.permute.xlu1 %1200  ;;  %v1196_v17 = vpop.permute.xlu0 %1195  ;;  %v429_v18 = vpack.c.bf16 %v276_v8, %v249_v61  ;;  %v431_v20 = vpack.c.bf16 %v278_v9, %v251_v0  ;;  %v428_v22 = vpack.c.bf16 %v275_v10, %v248_v12  ;;  %v452_v61 = vld [vmem:[%s1353_s19 + $0x10] sm:$0xff]  ;;  %v454_v0 = vld [vmem:[%s1353_s19 + $0x20] sm:$0xff]  ;;  %v453_v8 = vld [vmem:[%s1353_s19 + $0x18] sm:$0xff] }
  0xcd   : > { %v1203_v24 = vunpack.i.h.bf16 %v1201_v16  ;;  %v1202_v63 = vunpack.i.l.bf16 %v1201_v16  ;;  %v1198_v27 = vunpack.i.h.bf16 %v1196_v17  ;;  %v1197_v3 = vunpack.i.l.bf16 %v1196_v17  ;;  %v455_v17 = vld [vmem:[%s1353_s19 + $0x28] sm:$0xff] }
  0xce   : > { %579 = vmatprep.subr.bf16.mxu1 %v429_v18  ;;  %632 = vmatprep.subr.bf16.mxu0 %v431_v20  ;;  %v837_v37 = vlaneseq }
  0xcf   : > { %v223_v30 = vsel %vm218_vm8, %v1198_v27, %v1202_v63  ;;  %580 = vmatpush1.bf16.msra.mxu1 %v428_v22  ;;  %633 = vmatpush1.bf16.msra.mxu0 %v430_v11  ;;  %v222_v62 = vsel %vm218_vm8, %v1197_v3, %v1198_v27  ;;  %v224_v1 = vsel %vm218_vm8, %v1202_v63, %v1203_v24  ;;  %v458_v24 = vld [vmem:[%s1353_s19 + $0x40] sm:$0xff]  ;;  %v460_v63 = vld [vmem:[%s1353_s19 + $0x50] sm:$0xff] }
  0xd0   : > { %v424_v29 = vpack.c.bf16 %v223_v30, %v1389_v14  ;;  %v423_v31 = vpack.c.bf16 %v222_v62, %v1366_v7  ;;  %v425_v33 = vpack.c.bf16 %v224_v1, %v1391_v15  ;;  %v221_v34 = vsel %vm218_vm8, %v1153_v25, %v1197_v3  ;;  %v451_v14 = vld [vmem:[%s1353_s19 + $0x8] sm:$0xff]  ;;  %v456_v25 = vld [vmem:[%s1353_s19 + $0x30] sm:$0xff] }
  0xd1   : > { %v422_v35 = vpack.c.bf16 %v221_v34, %v1362_v5  ;;  %v450_v5 = vld [vmem:[%s1353_s19] sm:$0xff]  ;;  %v1607_v9 = vshrl.u32 %v837_v37, 7  ;;  %v459_v34 = vld [vmem:[%s1353_s19 + $0x48] sm:$0xff] }
  0xd2   : > { %581 = vmatprep.subr.bf16.mxu1 %v423_v31  ;;  %634 = vmatprep.subr.bf16.mxu0 %v425_v33 }
  0xd3   : > { %582 = vmatpush1.bf16.msra.mxu1 %v422_v35  ;;  %635 = vmatpush1.bf16.msra.mxu0 %v424_v29  ;;  %v839_v35 = vsub.s32 0, %v1607_v9 }
  0xd4   : > { %1052 = vmatprep.subr.msk.bf16.mxu1 %vm495_vm3, %v1503_v4 }
  0xd6   : > { %1021 = vmatmul.mubr.msk.bf16.vlgmr.msra.gmra.mxu1 %vm488_vm9, %v1498_v43  ;;  %1024 = vmatmul.mubr.msk.bf16.vlgmr.msra.gmra.mxu0 %vm488_vm9, %v1498_v43 }
  0xd7   : > { %1057 = vmatpush1.bf16.msra.mxu1 %v1512_v60  ;;  %609 = vmatprep.mubr.bf16.mxu1 %v1319_v13 }
  0xd8   : > { %1053 = vmatprep.subr.bf16.mxu1 %v1532_v21 }
  0xdb   : > { %1058 = vmatpush1.bf16.msra.mxu1 %v1530_v19 }
  0xdc   : > { %1054 = vmatprep.subr.bf16.mxu1 %v437_v52 }
  0xde   : > { %1022 = vmatmul.mubr.msk.bf16.gmra.mxu1 %vm488_vm9, %v1537_v26 }
  0xdf   : > { %1059 = vmatpush1.bf16.msra.mxu1 %v436_v32  ;;  %662 = vmatprep.mubr.bf16.mxu1 %v1319_v13  ;;  %v457_v13 = vld [vmem:[%s1353_s19 + $0x38] sm:$0xff] }
  0xe0   : > { %1055 = vmatprep.subr.bf16.mxu1 %v431_v20 }
  0xe3   : > { %1060 = vmatpush1.bf16.msra.mxu1 %v430_v11 }
  0xe4   : > { %1056 = vmatprep.subr.bf16.mxu1 %v425_v33 }
  0xe7   : > { %1061 = vmatpush1.bf16.msra.mxu1 %v424_v29 }
  0xea   : > { %1025 = vmatmul.mubr.msk.bf16.vlgmr.msra.gmra.mxu1 %vm488_vm9, %v1537_v26 }
 0x176   : > { %v548_v7 = vpop.f32.mrf.mxu0 }
 0x177   : > { %v673_v15 = vadd.f32 %v548_v7, %v450_v5  ;;  %v843_v5 = vsub.s32 1, %v1607_v9 }
 0x178   : > { %v550_v23 = vpop.f32.mrf.mxu0 }
 0x179   : > { %v1026_v43 = vmul.f32 -1.442695, %v673_v15  ;;  %v674_v4 = vadd.f32 %v550_v23, %v451_v14 }
 0x17a   : > { %v552_v60 = vpop.f32.mrf.mxu0 }
 0x17b   : > { %1206 = vpow2.f32 %v1026_v43  ;;  %v1027_v19 = vmul.f32 -1.442695, %v674_v4  ;;  %v679_v21 = vadd.f32 %v552_v60, %v456_v25  ;;  %v461_v25 = vld [vmem:[%s1353_s19 + $0x58] sm:$0xff]  ;;  %v1619_v43 = vld [vmem:[%s1663_s2] sm:$0x3f] }
 0x17c   : > { %v554_v38 = vpop.f32.mrf.mxu0  ;;  %v812_v4 = vld [vmem:[#allocation3 + $0x28] sm:$0xff] }
 0x17d   : > { %1208 = vpow2.f32 %v1027_v19  ;;  %v1032_v26 = vmul.f32 -1.442695, %v679_v21  ;;  %v680_v39 = vadd.f32 %v554_v38, %v457_v13  ;;  %v813_v38 = vld [vmem:[#allocation3 + $0x10] sm:$0xff] }
 0x17f   : > { %1210 = vpow2.f32 %v1032_v26  ;;  %v1033_v55 = vmul.f32 -1.442695, %v680_v39 }
 0x180   : > { %v558_v56 = vpop.f32.mrf.mxu0 }
 0x181   : > { %1212 = vpow2.f32 %v1033_v55  ;;  %v685_v32 = vadd.f32 %v558_v56, %v462_v41 }
 0x182   : > { %v560_v40 = vpop.f32.mrf.mxu0 }
 0x183   : > { %v686_v50 = vadd.f32 %v560_v40, %v463_v44  ;;  %1214 = vtanh.f32 %v685_v32  ;;  %v1622_v32 = vrot.slane %v1619_v43, %v839_v35  ;;  %v467_v35 = vld [vmem:[%s1353_s19 + $0x88] sm:$0xff] }
 0x184   : > { %v562_v45 = vpop.f32.mrf.mxu0 }
 0x185   : > { %v691_v6 = vadd.f32 %v562_v45, %v468_v42  ;;  %1216 = vtanh.f32 %v686_v50  ;;  %v1625_v50 = vrot.slane %v1619_v43, %v843_v5 }
 0x186   : > { %v564_v48 = vpop.f32.mrf.mxu0 }
 0x187   : > { %v692_v47 = vadd.f32 %v564_v48, %v469_v28  ;;  %v1038_v46 = vmul.f32 -1.442695, %v691_v6 }
 0x188   : > { %v1207_v52 = vpop.eup %1206 }
 0x189   : > { %v715_v51 = vadd.f32 1.0, %v1207_v52  ;;  %v1039_v57 = vmul.f32 -1.442695, %v692_v47 }
 0x18a   : > { %v1209_v53 = vpop.eup %1208 }
 0x18b   : > { %v716_v49 = vadd.f32 1.0, %v1209_v53  ;;  %1218 = vrcp.f32 %v715_v51  ;;  %v464_v51 = vld [vmem:[%s1353_s19 + $0x70] sm:$0xff] }
 0x18c   : > { %v1211_v54 = vpop.eup %1210 }
 0x18d   : > { %1220 = vrcp.f32 %v716_v49  ;;  %v751_v58 = vadd.f32 1.0, %v1211_v54 }
 0x18e   : > { %v1213_v59 = vpop.eup %1212  ;;  %1222 = vpow2.f32 %v1038_v46  ;;  %v470_v46 = vld [vmem:[%s1353_s19 + $0xa0] sm:$0xff] }
 0x18f   : > { %1224 = vrcp.f32 %v751_v58  ;;  %v752_v36 = vadd.f32 1.0, %v1213_v59  ;;  %v465_v58 = vld [vmem:[%s1353_s19 + $0x78] sm:$0xff] }
 0x190   : > { %1226 = vpow2.f32 %v1039_v57  ;;  %v1215_v10 = vpop.eup %1214 }
 0x191   : > { %1228 = vrcp.f32 %v752_v36  ;;  %v471_v36 = vld [vmem:[%s1353_s19 + $0xa8] sm:$0xff] }
 0x192   : > { %v1217_v18 = vpop.eup %1216 }
 0x196   : > { %v601_v12 = vpop.f32.mrf.mxu1  ;;  %v654_v2 = vpop.f32.mrf.mxu0 }
 0x197   : > { %v675_v11 = vadd.f32 %v601_v12, %v452_v61  ;;  %v677_v16 = vadd.f32 %v654_v2, %v454_v0 }
 0x198   : > { %v603_v20 = vpop.f32.mrf.mxu1  ;;  %v656_v22 = vpop.f32.mrf.mxu0 }
 0x199   : > { %v1219_v27 = vpop.eup %1218  ;;  %v1028_v3 = vmul.f32 -1.442695, %v675_v11  ;;  %v1030_v30 = vmul.f32 -1.442695, %v677_v16  ;;  %v676_v62 = vadd.f32 %v603_v20, %v453_v8  ;;  %v678_v29 = vadd.f32 %v656_v22, %v455_v17 }
 0x19a   : > { %v1221_v1 = vpop.eup %1220  ;;  %v605_v31 = vpop.f32.mrf.mxu1  ;;  %v824_v26 = vmul.f32 %v1219_v27, %v1215_v10 }
 0x19b   : > { %v658_v33 = vpop.f32.mrf.mxu0  ;;  %v1223_v7 = vpop.eup %1222  ;;  %1230 = vpow2.f32 %v1028_v3  ;;  %v1029_v14 = vmul.f32 -1.442695, %v676_v62  ;;  %v681_v15 = vadd.f32 %v605_v31, %v458_v24  ;;  %v1031_v13 = vmul.f32 -1.442695, %v678_v29  ;;  %v472_v62 = vld [vmem:[%s1353_s19 + $0xb0] sm:$0xff]  ;;  %v466_v31 = vld [vmem:[%s1353_s19 + $0x80] sm:$0xff] }
 0x19c   : > { %v683_v23 = vadd.f32 %v658_v33, %v460_v63  ;;  %v1225_v60 = vpop.eup %1224  ;;  %v607_v19 = vpop.f32.mrf.mxu1  ;;  %v825_v39 = vmul.f32 %v1221_v1, %v1217_v18  ;;  %1232 = vpow2.f32 %v1030_v30  ;;  %v793_v52 = vadd.f32 1.0, %v1223_v7  ;;  %v473_v7 = vld [vmem:[%s1353_s19 + $0xb8] sm:$0xff] }
 0x19d   : > { %v660_v21 = vpop.f32.mrf.mxu0  ;;  %v1227_v55 = vpop.eup %1226  ;;  %v1034_v56 = vmul.f32 -1.442695, %v681_v15  ;;  %v682_v41 = vadd.f32 %v607_v19, %v459_v34  ;;  %1234 = vpow2.f32 %v1029_v14  ;;  %v818_v28 = vmul.f32 %v1225_v60, %v812_v4 }
 0x19e   : > { %v1036_v40 = vmul.f32 -1.442695, %v683_v23  ;;  %v1229_v42 = vpop.eup %1228  ;;  %v684_v44 = vadd.f32 %v660_v21, %v461_v25  ;;  %v611_v45 = vpop.f32.mrf.mxu1  ;;  %1236 = vpow2.f32 %v1031_v13  ;;  %v794_v54 = vadd.f32 1.0, %v1227_v55 }
 0x19f   : > { %v1035_v6 = vmul.f32 -1.442695, %v682_v41  ;;  %v819_v48 = vmul.f32 %v1229_v42, %v813_v38  ;;  %1238 = vpow2.f32 %v1034_v56  ;;  %v830_v49 = vadd.f32 %v824_v26, %v818_v28 }
 0x1a0   : > { %v1037_v47 = vmul.f32 -1.442695, %v684_v44  ;;  %v613_v53 = vpop.f32.mrf.mxu1  ;;  %1240 = vpow2.f32 %v1036_v40  ;;  %v687_v61 = vadd.f32 %v611_v45, %v464_v51 }
 0x1a1   : > { %v831_v57 = vadd.f32 %v825_v39, %v819_v48  ;;  %1242 = vpow2.f32 %v1035_v6  ;;  %v867_v37 = vmul.f32 %v1622_v32, %v830_v49  ;;  %v688_v8 = vadd.f32 %v613_v53, %v465_v58 }
 0x1a2   : > { %v615_v59 = vpop.f32.mrf.mxu1  ;;  %1244 = vpow2.f32 %v1037_v47  ;;  %v847_v49 = vsub.s32 2, %v1607_v9  ;;  %v851_v58 = vsub.s32 3, %v1607_v9 }
 0x1a3   : > { %v693_v0 = vadd.f32 %v615_v59, %v470_v46  ;;  %v868_v12 = vmul.f32 %v1625_v50, %v831_v57  ;;  %1246 = vrcp.f32 %v793_v52  ;;  %891 = vst [vmem:[#allocation3 + $0x28] sm:$0xff] %v867_v37  ;;  %v814_v57 = vld [vmem:[#allocation3 + $0x8] sm:$0xff] }
 0x1a4   : > { %v617_v2 = vpop.f32.mrf.mxu1  ;;  %1248 = vrcp.f32 %v794_v54 }
 0x1a5   : > { %v694_v10 = vadd.f32 %v617_v2, %v471_v36  ;;  %892 = vst [vmem:[#allocation3 + $0x10] sm:$0xff] %v868_v12  ;;  %v1040_v11 = vmul.f32 -1.442695, %v693_v0  ;;  %1250 = vtanh.f32 %v867_v37  ;;  %v815_v37 = vld [vmem:[#allocation3] sm:$0xff] }
 0x1a6   : > { %1252 = vtanh.f32 %v687_v61  ;;  %v816_v61 = vld [vmem:[#allocation3 + $0x18] sm:$0xff]  ;;  %v817_v2 = vld [vmem:[#allocation3 + $0x20] sm:$0xff] }
 0x1a7   : > { %v1041_v16 = vmul.f32 -1.442695, %v694_v10  ;;  %1254 = vtanh.f32 %v868_v12  ;;  %v848_v12 = vrot.slane %v1619_v43, %v847_v49 }
 0x1a8   : > { %v1231_v17 = vpop.eup %1230  ;;  %1256 = vtanh.f32 %v688_v8  ;;  %v855_v8 = vsub.s32 4, %v1607_v9 }
 0x1a9   : > { %v717_v18 = vadd.f32 1.0, %v1231_v17  ;;  %v1233_v20 = vpop.eup %1232  ;;  %1258 = vpow2.f32 %v1040_v11  ;;  %v859_v17 = vsub.s32 5, %v1607_v9 }
 0x1aa   : > { %v664_v22 = vpop.f32.mrf.mxu1  ;;  %v1235_v24 = vpop.eup %1234  ;;  %v719_v63 = vadd.f32 1.0, %v1233_v20  ;;  %1260 = vpow2.f32 %v1041_v16  ;;  %v852_v16 = vrot.slane %v1619_v43, %v851_v58 }
 0x1ab   : > { %v1237_v27 = vpop.eup %1236  ;;  %1262 = vrcp.f32 %v717_v18  ;;  %v718_v3 = vadd.f32 1.0, %v1235_v24  ;;  %v689_v60 = vadd.f32 %v664_v22, %v466_v31 }
 0x1ac   : > { %v666_v30 = vpop.f32.mrf.mxu1  ;;  %v1239_v1 = vpop.eup %1238  ;;  %1264 = vrcp.f32 %v719_v63  ;;  %v720_v29 = vadd.f32 1.0, %v1237_v27 }
 0x1ad   : > { %v1241_v33 = vpop.eup %1240  ;;  %1266 = vrcp.f32 %v718_v3  ;;  %v753_v34 = vadd.f32 1.0, %v1239_v1  ;;  %v690_v38 = vadd.f32 %v666_v30, %v467_v35 }
 0x1ae   : > { %v668_v5 = vpop.f32.mrf.mxu1  ;;  %v1243_v14 = vpop.eup %1242  ;;  %1268 = vrcp.f32 %v720_v29  ;;  %v755_v15 = vadd.f32 1.0, %v1241_v33  ;;  %v856_v33 = vrot.slane %v1619_v43, %v855_v8 }
 0x1af   : > { %v695_v23 = vadd.f32 %v668_v5, %v472_v62  ;;  %v1245_v25 = vpop.eup %1244  ;;  %1270 = vrcp.f32 %v753_v34  ;;  %v754_v4 = vadd.f32 1.0, %v1243_v14  ;;  %v860_v5 = vrot.slane %v1619_v43, %v859_v17 }
 0x1b0   : > { %v670_v13 = vpop.f32.mrf.mxu1  ;;  %v1247_v19 = vpop.eup %1246  ;;  %1272 = vrcp.f32 %v755_v15  ;;  %v756_v21 = vadd.f32 1.0, %v1245_v25 }
 0x1b1   : > { %v696_v26 = vadd.f32 %v670_v13, %v473_v7  ;;  %v1249_v39 = vpop.eup %1248  ;;  %1274 = vrcp.f32 %v754_v4  ;;  %v1042_v55 = vmul.f32 -1.442695, %v695_v23 }
 0x1b2   : > { %v1251_v56 = vpop.eup %1250  ;;  %1276 = vrcp.f32 %v756_v21 }
 0x1b3   : > { %v1253_v40 = vpop.eup %1252  ;;  %1278 = vtanh.f32 %v689_v60  ;;  %v1043_v41 = vmul.f32 -1.442695, %v696_v26  ;;  %v879_v42 = vmul.f32 %v1251_v56, %v1247_v19 }
 0x1b4   : > { %v1255_v44 = vpop.eup %1254  ;;  %1280 = vtanh.f32 %v690_v38 }
 0x1b5   : > { %v1257_v45 = vpop.eup %1256  ;;  %1282 = vpow2.f32 %v1042_v55  ;;  %v880_v28 = vmul.f32 %v1255_v44, %v1249_v39  ;;  %v885_v52 = vmul.f32 %v879_v42, %v1622_v32 }
 0x1b6   : > { %v1259_v6 = vpop.eup %1258  ;;  %1284 = vpow2.f32 %v1043_v41 }
 0x1b7   : > { %v1261_v48 = vpop.eup %1260  ;;  %v886_v47 = vmul.f32 %v880_v28, %v1625_v50  ;;  %v795_v11 = vadd.f32 1.0, %v1259_v6 }
 0x1b8   : > { %v1263_v51 = vpop.eup %1262  ;;  %v796_v3 = vadd.f32 1.0, %v1261_v48 }
 0x1b9   : > { %v1265_v53 = vpop.eup %1264  ;;  %v1049_v46 = vpack.c.bf16 %v886_v47, %v885_v52  ;;  %v826_v50 = vmul.f32 %v1263_v51, %v1253_v40  ;;  %1286 = vrcp.f32 %v795_v11 }
 0x1ba   : > { %v1267_v54 = vpop.eup %1266 }
 0x1bb   : > { %v1269_v59 = vpop.eup %1268  ;;  %918 = vrot.lane.b32.xlu0 %v1049_v46, %s1321_s10  ;;  %949 = vst [vmem:[%s1358_s22] sm:$0xff] %v1049_v46  ;;  %v827_v22 = vmul.f32 %v1267_v54, %v1257_v45 }
 0x1bc   : > { %v1271_v36 = vpop.eup %1270 }
 0x1bd   : > { %v1273_v32 = vpop.eup %1272  ;;  %v820_v0 = vmul.f32 %v1271_v36, %v814_v57 }
 0x1be   : > { %v1275_v10 = vpop.eup %1274  ;;  %v822_v63 = vmul.f32 %v1273_v32, %v816_v61 }
 0x1bf   : > { %v1277_v18 = vpop.eup %1276  ;;  %v821_v20 = vmul.f32 %v1275_v10, %v815_v37  ;;  %v832_v24 = vadd.f32 %v826_v50, %v820_v0 }
 0x1c0   : > { %v1279_v27 = vpop.eup %1278  ;;  %v823_v30 = vmul.f32 %v1277_v18, %v817_v2 }
 0x1c1   : > { %v1281_v62 = vpop.eup %1280  ;;  %v833_v1 = vadd.f32 %v827_v22, %v821_v20  ;;  %v869_v29 = vmul.f32 %v848_v12, %v832_v24  ;;  %v828_v31 = vmul.f32 %v1279_v27, %v1265_v53 }
 0x1c2   : > { %v1283_v34 = vpop.eup %1282  ;;  %v829_v35 = vmul.f32 %v1281_v62, %v1269_v59 }
 0x1c3   : > { %v797_v9 = vadd.f32 1.0, %v1283_v34  ;;  %v870_v7 = vmul.f32 %v852_v16, %v833_v1  ;;  %1288 = vtanh.f32 %v869_v29  ;;  %893 = vst [vmem:[#allocation3 + $0x8] sm:$0xff] %v869_v29  ;;  %v834_v14 = vadd.f32 %v828_v31, %v822_v63  ;;  %v1285_v15 = vpop.eup %1284 }
 0x1c4   : > { %1290 = vrcp.f32 %v796_v3  ;;  %v835_v23 = vadd.f32 %v829_v35, %v823_v30  ;;  %v798_v25 = vadd.f32 1.0, %v1285_v15 }
 0x1c5   : > { %1292 = vrcp.f32 %v797_v9  ;;  %894 = vst [vmem:[#allocation3] sm:$0xff] %v870_v7  ;;  %v871_v4 = vmul.f32 %v856_v33, %v834_v14 }
 0x1c6   : > { %1294 = vtanh.f32 %v870_v7  ;;  %v872_v60 = vmul.f32 %v860_v5, %v835_v23  ;;  %v1287_v43 = vpop.eup %1286 }
 0x1c7   : > { %1296 = vrcp.f32 %v798_v25  ;;  %895 = vst [vmem:[#allocation3 + $0x18] sm:$0xff] %v871_v4 }
 0x1c8   : > { %1298 = vtanh.f32 %v871_v4  ;;  %896 = vst [vmem:[#allocation3 + $0x20] sm:$0xff] %v872_v60 }
 0x1c9   : > { %1300 = vtanh.f32 %v872_v60 }
 0x1d0   : > { %v1289_v13 = vpop.eup %1288 }
 0x1d1   : > { %v1291_v19 = vpop.eup %1290  ;;  %v881_v38 = vmul.f32 %v1289_v13, %v1287_v43 }
 0x1d2   : > { %v1293_v21 = vpop.eup %1292 }
 0x1d3   : > { %v1295_v26 = vpop.eup %1294  ;;  %v887_v41 = vmul.f32 %v881_v38, %v848_v12 }
 0x1d4   : > { %v1297_v39 = vpop.eup %1296  ;;  %v882_v55 = vmul.f32 %v1295_v26, %v1291_v19 }
 0x1d5   : > { %v1299_v56 = vpop.eup %1298 }
 0x1d6   : > { %v1301_v40 = vpop.eup %1300  ;;  %v888_v42 = vmul.f32 %v882_v55, %v852_v16  ;;  %v883_v44 = vmul.f32 %v1299_v56, %v1293_v21 }
 0x1d7   : > { %v884_v45 = vmul.f32 %v1301_v40, %v1297_v39 }
 0x1d8   : > { %v1050_v28 = vpack.c.bf16 %v888_v42, %v887_v41  ;;  %v889_v6 = vmul.f32 %v883_v44, %v856_v33 }
 0x1d9   : > { %v890_v48 = vmul.f32 %v884_v45, %v860_v5 }
 0x1da   : > { %920 = vrot.lane.b32.xlu1 %v1050_v28, %s1321_s10  ;;  %950 = vst [vmem:[%s1358_s22 + $0x8] sm:$0xff] %v1050_v28 }
 0x1db   : > { %v1051_v52 = vpack.c.bf16 %v890_v48, %v889_v6 }
 0x1dd   : > { %922 = vrot.lane.b32.xlu0 %v1051_v52, %s1321_s10  ;;  %951 = vst [vmem:[%s1358_s22 + $0x10] sm:$0xff] %v1051_v52 }
 0x22d   : > { %v919_v47 = vpop.permute.xlu0 %918 }
 0x22e   : > { %v924_v51 = vrot.slane %v919_v47, 4 }
 0x230   : > { %v928_v53 = vsel %vm927_vm12, %v924_v51, %v919_v47 }
 0x231   : > { %941 = vst.msk [vmem:[#allocation2] sm:$0xff] %vm940_vm13, %v928_v53 }
 0x24c   : > { %v921_v46 = vpop.permute.xlu1 %920 }
 0x24d   : > { %v925_v49 = vrot.slane %v921_v46, 4 }
 0x24f   : > { %v930_v54 = vsel %vm495_vm3, %v924_v51, %v925_v49  ;;  %v923_v57 = vpop.permute.xlu0 %922 }
 0x250   : > { %v931_v58 = vsel %vm927_vm12, %v930_v54, %v921_v46  ;;  %v926_v59 = vrot.slane %v923_v57, 4 }
 0x251   : > { %942 = vst [vmem:[#allocation2 + $0x8] sm:$0xff] %v931_v58 }
 0x252   : > { %v932_v36 = vsel %vm495_vm3, %v925_v49, %v926_v59  ;;  %945 = vst.msk [vmem:[#allocation2 + $0x18] sm:$0xf] %vm944_vm14, %v926_v59 }
 0x253   : > { %v933_v37 = vsel %vm927_vm12, %v932_v36, %v923_v57 }
 0x254   : > { %943 = vst [vmem:[#allocation2 + $0x10] sm:$0xff] %v933_v37 }
 0x255 PF: > { %s13_s12 = sadd.s32 1, %s1308_s12  }
 0x256   : > { %p10_p5 = scmp.ge.s32.totalorder %s13_s12, 6  }
 0x258   :  { %12 = sbr.rel (!%p10_p5) target bundleno = 1 (0x1), region = 66 }

// kernel: _lambda_.9
= control target key start
LH: loop header
LB: loop body
LE: loop exit
PB: predicated region body
PF: predicated region fallthrough
CT: control target
= control target key end

     0   :  { %s711_s12 = smov 0   ;;  %s784_s0 = inlined_call_operand.vmem [shape: bf16[8,8,512], index: 0, kind: input, shape index: {}]   ;;  %s785_s1 = inlined_call_operand.vmem [shape: bf16[16,72], index: 1, kind: input, shape index: {}]   ;;  %s786_s2 = inlined_call_operand.vmem [shape: f32[16,1], index: 2, kind: input, shape index: {}]   ;;  %s787_s3 = inlined_call_operand.vmem [shape: bf16[8,16,384], index: 3, kind: output, shape index: {}]  }
   0x1 LB: > { %s531_s13 = sadd.s32 4294967295, %s678_s12   ;;  %p535_p0 = scmp.ge.s32.totalorder %s678_s12, 1  ;;  %s678_s12 = sphi %s711_s12, %s13_s12  }
   0x2   : > { %p137_p1 = scmp.lt.s32.totalorder %s678_s12, 9 }
   0x4   : > { %p138_p2 = pnand %p535_p0, %p137_p1 }
   0x5   : > { %p161_p3 = scmp.lt.s32.totalorder (!%p138_p2), %s531_s13, 7  ;;  %s681_s18 = smov (!%p138_p2), 92  }
   0x6   : > { %141 = sbr.rel (%p138_p2) target bundleno = 378 (0x17a), region = 32  ;;  %s682_s19 = smov (!%p138_p2), 90  }
   0x7   : > { %s683_s20 = smov (!%p138_p2), 91   ;;  %s684_s21 = smov (!%p138_p2), 108  }
   0x8   : > { %s685_s22 = smov (!%p138_p2), 109   ;;  %s686_s23 = smov (!%p138_p2), 110  }
   0x9   : > { %s687_s24 = smov (!%p138_p2), 126   ;;  %s690_s25 = smov (!%p138_p2), 127  }
   0xb   : > { %s789_s13 = smov (!%p161_p3, %s531_s13), 7  ;;  %v680_v6 = vmov 0.0   ;;  %v688_v11 = vmov 0   ;;  %vm689_vm0 = vmmov 0   ;;  %v319_v12 = vld [vmem:[%s786_s2] sm:$0xff]  ;;  %v320_v13 = vld [vmem:[%s786_s2 + $0x8] sm:$0xff] }
   0xc   : > { %s549_s14 = sshll.u32 %s789_s13, 4  ;;  %560 = vmatprep.subr.bf16.mxu1 %v680_v6  ;;  %382 = vmatprep.mubr.bf16.mxu0 %v688_v11  ;;  %vm295_vm1 = vcmask 736256   ;;  %vm265_vm2 = vcmask 752640   ;;  %vm280_vm3 = vcmask 744448   ;;  %vm340_vm4 = vcmask 1043456   ;;  %s574_s5 = smul.u32 24, %s789_s13 }
   0xd   : > { %s165_s17 = scalar_lea.vmem %s784_s0, %s549_s14  ;;  %669 = vset.pattern.permute.xlu1 %v688_v11  ;;  %570 = vmatprep.mubr.msk.bf16.mxu1 %vm689_vm0, %v680_v6  ;;  %vm235_vm5 = vcmask 891904   ;;  %vm250_vm6 = vcmask 883712   ;;  %vm205_vm7 = vcmask 1031168   ;;  %vm220_vm8 = vcmask 900096  }
   0xe   : > { %v172_v0 = vld [vmem:[%s165_s17] sm:$0xff]  ;;  %v173_v1 = vld [vmem:[%s165_s17 + $0x8] sm:$0xff]  ;;  %670 = vset.pattern.permute.xlu0 %v688_v11  ;;  %vm190_vm9 = vcmask 1039360   ;;  %vm336_vm10 = vcmask 588800   ;;  %s170_s8 = scalar_lea.vmem %s787_s3, %s574_s5 }
   0xf   : > { %v725_v2 = vunpack.c.h.bf16 %v172_v0  ;;  %v727_v3 = vunpack.c.l.bf16 %v173_v1  ;;  %v729_v4 = vunpack.c.l.bf16 %v172_v0  ;;  %v177_v5 = vunpack.c.h.bf16 %v173_v1 }
  0x11   : > { %v604_v7 = vpack.i.bf16 %v727_v3, %v725_v2  ;;  %v594_v8 = vpack.i.bf16 %v725_v2, %v729_v4  ;;  %v599_v9 = vpack.i.bf16 %v177_v5, %v727_v3  ;;  %v619_v10 = vpack.i.bf16 %v177_v5, %v729_v4 }
  0x13   : > { %605 = vrot.lane.b32.xlu1 %v604_v7, %s681_s18  ;;  %595 = vrot.lane.b32.xlu0 %v594_v8, %s682_s19 }
  0x17   : > { %610 = vrot.lane.b32.xlu1 %v604_v7, %s683_s20  ;;  %600 = vrot.lane.b32.xlu0 %v599_v9, %s682_s19 }
  0x1b   : > { %620 = vrot.lane.b32.xlu1 %v619_v10, %s683_s20  ;;  %615 = vrot.lane.b32.xlu0 %v619_v10, %s681_s18 }
  0x1f   : > { %630 = vrot.lane.b32.xlu1 %v604_v7, %s684_s21  ;;  %625 = vrot.lane.b32.xlu0 %v604_v7, %s685_s22 }
  0x23   : > { %640 = vrot.lane.b32.xlu1 %v619_v10, %s684_s21  ;;  %635 = vrot.lane.b32.xlu0 %v619_v10, %s685_s22 }
  0x27   : > { %650 = vrot.lane.b32.xlu1 %v604_v7, %s686_s23  ;;  %645 = vrot.lane.b32.xlu0 %v604_v7, %s687_s24 }
  0x2b   : > { %660 = vrot.lane.b32.xlu1 %v619_v10, %s686_s23  ;;  %655 = vrot.lane.b32.xlu0 %v619_v10, %s687_s24 }
  0x2f   : > { %665 = vrot.lane.b32.xlu0 %v604_v7, %s690_s25  ;;  %182 = vrot.lane.b32.xlu1 %v729_v4, %s690_s25 }
  0x33   : > { %188 = vrot.lane.b32.xlu0 %v177_v5, %s690_s25  ;;  %323 = vperm.xlu1 %669, %v319_v12  }
  0x37   : > { %328 = vperm.xlu0 %670, %v320_v13  }
  0x85   : > { %v606_v14 = vpop.permute.xlu1 %605  ;;  %v596_v15 = vpop.permute.xlu0 %595 }
  0x86   : > { %v598_v16 = vunpack.i.h.bf16 %v596_v15  ;;  %v597_v17 = vunpack.i.l.bf16 %v596_v15  ;;  %v608_v19 = vunpack.i.h.bf16 %v606_v14  ;;  %v607_v20 = vunpack.i.l.bf16 %v606_v14 }
  0x88   : > { %v296_v18 = vsel %vm295_vm1, %v597_v17, %v598_v16  ;;  %v267_v35 = vsel %vm265_vm2, %v607_v20, %v608_v19 }
  0x89   : > { %v611_v21 = vpop.permute.xlu1 %610  ;;  %v601_v22 = vpop.permute.xlu0 %600  ;;  %v314_v27 = vpack.c.bf16 %v296_v18, %v296_v18 }
  0x8a   : > { %v613_v23 = vunpack.i.h.bf16 %v611_v21  ;;  %v612_v24 = vunpack.i.l.bf16 %v611_v21  ;;  %v603_v25 = vunpack.i.h.bf16 %v601_v22  ;;  %v602_v26 = vunpack.i.l.bf16 %v601_v22 }
  0x8b   : > { %v342_v40 = vsel %vm340_vm4, %v314_v27, 0 }
  0x8c   : > { %v297_v28 = vsel %vm295_vm1, %v598_v16, %v602_v26  ;;  %v298_v29 = vsel %vm295_vm1, %v602_v26, %v603_v25  ;;  %v282_v30 = vsel %vm280_vm3, %v612_v24, %v613_v23 }
  0x8d   : > { %v621_v31 = vpop.permute.xlu1 %620  ;;  %v616_v32 = vpop.permute.xlu0 %615  ;;  %v315_v33 = vpack.c.bf16 %v297_v28, %v297_v28  ;;  %v316_v34 = vpack.c.bf16 %v298_v29, %v298_v29  ;;  %v312_v42 = vpack.c.bf16 %v282_v30, %v267_v35 }
  0x8e   : > { %v623_v36 = vunpack.i.h.bf16 %v621_v31  ;;  %v622_v37 = vunpack.i.l.bf16 %v621_v31  ;;  %v618_v38 = vunpack.i.h.bf16 %v616_v32  ;;  %v617_v39 = vunpack.i.l.bf16 %v616_v32 }
  0x8f   : > { %540 = vmatprep.subr.msk.bf16.mxu0 %vm340_vm4, %v315_v33  ;;  %v348_v41 = vsel %vm340_vm4, %v316_v34, 0 }
  0x90   : > { %357 = vmatpush1.bf16.msra.mxu0 %v342_v40  ;;  %561 = vmatpush3.bf16.msra.mxu1 %v348_v41  ;;  %v266_v43 = vsel %vm265_vm2, %v617_v39, %v607_v20  ;;  %v281_v44 = vsel %vm280_vm3, %v622_v37, %v612_v24  ;;  %v268_v45 = vsel %vm265_vm2, %v608_v19, %v618_v38 }
  0x91   : > { %v631_v46 = vpop.permute.xlu1 %630  ;;  %v626_v47 = vpop.permute.xlu0 %625  ;;  %358 = vmatprep.subr.bf16.mxu0 %v312_v42  ;;  %562 = vmatprep.subr.bf16.mxu1 %v680_v6  ;;  %v311_v48 = vpack.c.bf16 %v281_v44, %v266_v43  ;;  %v283_v49 = vsel %vm280_vm3, %v613_v23, %v623_v36  ;;  %v671_v42 = vld [vmem:[%s785_s1] sm:$0xff]  }
  0x92   : > { %v633_v50 = vunpack.i.h.bf16 %v631_v46  ;;  %v632_v51 = vunpack.i.l.bf16 %v631_v46  ;;  %v628_v52 = vunpack.i.h.bf16 %v626_v47  ;;  %v627_v53 = vunpack.i.l.bf16 %v626_v47 }
  0x93   : > { %v313_v54 = vpack.c.bf16 %v283_v49, %v268_v45 }
  0x94   : > { %359 = vmatpush1.bf16.msra.mxu0 %v311_v48  ;;  %v237_v55 = vsel %vm235_vm5, %v627_v53, %v628_v52  ;;  %v252_v56 = vsel %vm250_vm6, %v632_v51, %v633_v50 }
  0x95   : > { %563 = vmatpush3.bf16.msra.mxu1 %v313_v54  ;;  %v641_v57 = vpop.permute.xlu1 %640  ;;  %v636_v58 = vpop.permute.xlu0 %635  ;;  %v309_v59 = vpack.c.bf16 %v252_v56, %v237_v55 }
  0x96   : > { %v643_v60 = vunpack.i.h.bf16 %v641_v57  ;;  %v642_v61 = vunpack.i.l.bf16 %v641_v57  ;;  %v638_v62 = vunpack.i.h.bf16 %v636_v58  ;;  %v637_v63 = vunpack.i.l.bf16 %v636_v58  ;;  %564 = vmatprep.subr.bf16.mxu1 %v680_v6 }
  0x97   : > { %360 = vmatprep.subr.bf16.mxu0 %v309_v59 }
  0x98   : > { %v236_v0 = vsel %vm235_vm5, %v637_v63, %v627_v53  ;;  %v251_v1 = vsel %vm250_vm6, %v642_v61, %v632_v51  ;;  %v238_v5 = vsel %vm235_vm5, %v628_v52, %v638_v62  ;;  %v253_v7 = vsel %vm250_vm6, %v633_v50, %v643_v60 }
  0x99   : > { %v651_v8 = vpop.permute.xlu1 %650  ;;  %v646_v9 = vpop.permute.xlu0 %645  ;;  %v308_v10 = vpack.c.bf16 %v251_v1, %v236_v0  ;;  %v310_v11 = vpack.c.bf16 %v253_v7, %v238_v5 }
  0x9a   : > { %v653_v12 = vunpack.i.h.bf16 %v651_v8  ;;  %v652_v13 = vunpack.i.l.bf16 %v651_v8  ;;  %v648_v14 = vunpack.i.h.bf16 %v646_v9  ;;  %v647_v15 = vunpack.i.l.bf16 %v646_v9 }
  0x9b   : > { %361 = vmatpush1.bf16.msra.mxu0 %v308_v10  ;;  %565 = vmatpush3.bf16.msra.mxu1 %v310_v11 }
  0x9c   : > { %v207_v16 = vsel %vm205_vm7, %v647_v15, %v648_v14  ;;  %v222_v17 = vsel %vm220_vm8, %v652_v13, %v653_v12  ;;  %566 = vmatprep.subr.bf16.mxu1 %v680_v6 }
  0x9d   : > { %v661_v18 = vpop.permute.xlu1 %660  ;;  %v656_v19 = vpop.permute.xlu0 %655  ;;  %v306_v20 = vpack.c.bf16 %v222_v17, %v207_v16 }
  0x9e   : > { %v663_v21 = vunpack.i.h.bf16 %v661_v18  ;;  %v662_v22 = vunpack.i.l.bf16 %v661_v18  ;;  %v658_v23 = vunpack.i.h.bf16 %v656_v19  ;;  %v657_v24 = vunpack.i.l.bf16 %v656_v19 }
  0x9f   : > { %362 = vmatprep.subr.bf16.mxu0 %v306_v20 }
  0xa0   : > { %v206_v25 = vsel %vm205_vm7, %v657_v24, %v647_v15  ;;  %v221_v26 = vsel %vm220_vm8, %v662_v22, %v652_v13  ;;  %v208_v27 = vsel %vm205_vm7, %v648_v14, %v658_v23  ;;  %v223_v28 = vsel %vm220_vm8, %v653_v12, %v663_v21 }
  0xa1   : > { %v666_v29 = vpop.permute.xlu0 %665  ;;  %v183_v30 = vpop.permute.xlu1 %182  ;;  %v305_v31 = vpack.c.bf16 %v221_v26, %v206_v25  ;;  %v307_v32 = vpack.c.bf16 %v223_v28, %v208_v27 }
  0xa2   : > { %v668_v33 = vunpack.i.h.bf16 %v666_v29  ;;  %v667_v34 = vunpack.i.l.bf16 %v666_v29 }
  0xa3   : > { %363 = vmatpush1.bf16.msra.mxu0 %v305_v31  ;;  %567 = vmatpush3.bf16.msra.mxu1 %v307_v32 }
  0xa4   : > { %v191_v35 = vsel %vm190_vm9, %v183_v30, %v667_v34  ;;  %v192_v36 = vsel %vm190_vm9, %v667_v34, %v668_v33  ;;  %568 = vmatprep.subr.bf16.mxu1 %v680_v6 }
  0xa5   : > { %v302_v37 = vpack.c.bf16 %v191_v35, %v729_v4  ;;  %v189_v38 = vpop.permute.xlu0 %188  ;;  %v303_v39 = vpack.c.bf16 %v192_v36, %v725_v2 }
  0xa6   : > { %v193_v40 = vsel %vm190_vm9, %v668_v33, %v189_v38 }
  0xa7   : > { %v304_v41 = vpack.c.bf16 %v193_v40, %v727_v3  ;;  %364 = vmatprep.subr.bf16.mxu0 %v303_v39 }
  0xa8   : > { %365 = vmatpush1.bf16.msra.mxu0 %v302_v37 }
  0xa9   : > { %569 = vmatpush3.bf16.msra.mxu1 %v304_v41 }
  0xab   : > { %541 = vmatmul.mubr.msk.bf16.vlgmr.msra.gmra.mxu0 %vm336_vm10, %v671_v42 }
  0xac   : > { %571 = vmatmul.mubr.msk.bf16.vlgmr.msra.gmra.mxu1 %vm336_vm10, %v671_v42 }
  0xae   : > { %v324_v6 = vpop.permute.xlu1 %323 }
  0xb2   : > { %v329_v46 = vpop.permute.xlu0 %328 }
 0x16b   : > { %v384_v43 = vpop.f32.mrf.mxu0 }
 0x16c   : > { %v385_v4 = vadd.f32 %v384_v43, %v324_v6  ;;  %v427_v44 = vpop.f32.mrf.mxu1 }
 0x16d   : > { %v428_v45 = vadd.f32 %v427_v44, %v324_v6  ;;  %v386_v2 = vpop.f32.mrf.mxu0 }
 0x16e   : > { %v440_v47 = vmul.f32 0.2, %v385_v4  ;;  %v387_v3 = vadd.f32 %v386_v2, %v324_v6  ;;  %v572_v48 = vpop.f32.mrf.mxu1  ;;  %vm434_vm11 = vcmp.gt.f32.partialorder %v385_v4, 0.0 }
 0x16f   : > { %vm436_vm12 = vcmp.gt.f32.partialorder %v428_v45, 0.0  ;;  %v442_v49 = vmul.f32 0.2, %v428_v45  ;;  %v388_v50 = vpop.f32.mrf.mxu0 }
 0x170   : > { %vm435_vm13 = vcmp.gt.f32.partialorder %v387_v3, 0.0  ;;  %v441_v51 = vmul.f32 0.2, %v387_v3  ;;  %v389_v52 = vadd.f32 %v388_v50, %v329_v46  ;;  %v430_v53 = vpop.f32.mrf.mxu1  ;;  %v446_v57 = vsel %vm434_vm11, %v385_v4, %v440_v47 }
 0x171   : > { %v448_v54 = vsel %vm436_vm12, %v428_v45, %v442_v49  ;;  %v431_v55 = vadd.f32 %v430_v53, %v329_v46  ;;  %v390_v56 = vpop.f32.mrf.mxu0 }
 0x172   : > { %v551_v58 = vpack.c.bf16 %v448_v54, %v448_v54  ;;  %v447_v59 = vsel %vm435_vm13, %v387_v3, %v441_v51  ;;  %v443_v60 = vmul.f32 0.2, %v389_v52  ;;  %v573_v61 = vpop.f32.mrf.mxu1  ;;  %v391_v0 = vadd.f32 %v390_v56, %v329_v46 }
 0x173   : > { %v550_v62 = vpack.c.bf16 %v447_v59, %v446_v57  ;;  %vm439_vm14 = vcmp.gt.f32.partialorder %v431_v55, 0.0  ;;  %v445_v63 = vmul.f32 0.2, %v431_v55  ;;  %vm437_vm15 = vcmp.gt.f32.partialorder %v389_v52, 0.0 }
 0x174   : > { %473 = vst [vmem:[%s170_s8 + $0x8] sm:$0xf] %v551_v58  ;;  %vm438_vm0 = vcmp.gt.f32.partialorder %v391_v0, 0.0  ;;  %v444_v5 = vmul.f32 0.2, %v391_v0  ;;  %v449_v8 = vsel %vm437_vm15, %v389_v52, %v443_v60 }
 0x175   : > { %472 = vst [vmem:[%s170_s8] sm:$0xff] %v550_v62  ;;  %v451_v1 = vsel %vm439_vm14, %v431_v55, %v445_v63 }
 0x176   : > { %v553_v7 = vpack.c.bf16 %v451_v1, %v451_v1  ;;  %v450_v9 = vsel %vm438_vm0, %v391_v0, %v444_v5 }
 0x177   : > { %v552_v10 = vpack.c.bf16 %v450_v9, %v449_v8 }
 0x178   : > { %475 = vst [vmem:[%s170_s8 + $0x14] sm:$0xf] %v553_v7 }
 0x179   : > { %474 = vst [vmem:[%s170_s8 + $0xc] sm:$0xff] %v552_v10 }
 0x17a PF: > { %s13_s12 = sadd.s32 1, %s678_s12  }
 0x17b   : > { %p10_p4 = scmp.ge.s32.totalorder %s13_s12, 10  }
 0x17d   :  { %12 = sbr.rel (!%p10_p4) target bundleno = 1 (0x1), region = 62 }

// kernel: _lambda_.10
= control target key start
LH: loop header
LB: loop body
LE: loop exit
PB: predicated region body
PF: predicated region fallthrough
CT: control target
= control target key end

     0   :  { %s857_s12 = smov 0   ;;  %s984_s0 = inlined_call_operand.vmem [shape: bf16[4,16,384], index: 0, kind: input, shape index: {}]   ;;  %s985_s1 = inlined_call_operand.vmem [shape: bf16[64,144], index: 1, kind: input, shape index: {}]   ;;  %s986_s2 = inlined_call_operand.vmem [shape: f32[64,1], index: 2, kind: input, shape index: {}]   ;;  %s987_s3 = inlined_call_operand.vmem [shape: f32[4,64,256], index: 3, kind: output, shape index: {}]  }
   0x1 LB: > { %s623_s13 = sadd.s32 4294967295, %s826_s12   ;;  %p627_p0 = scmp.ge.s32.totalorder %s826_s12, 1  ;;  %s826_s12 = sphi %s857_s12, %s13_s12  }
   0x2   : > { %p137_p1 = scmp.lt.s32.totalorder %s826_s12, 5 }
   0x4   : > { %p138_p2 = pnand %p627_p0, %p137_p1 }
   0x5   : > { %p161_p3 = scmp.lt.s32.totalorder (!%p138_p2), %s623_s13, 3  ;;  %s828_s18 = smov (!%p138_p2), 107  }
   0x6   : > { %141 = sbr.rel (%p138_p2) target bundleno = 401 (0x191), region = 32  ;;  %s829_s19 = smov (!%p138_p2), 108  }
   0x7   : > { %s830_s20 = smov (!%p138_p2), 116   ;;  %s831_s21 = smov (!%p138_p2), 117  }
   0x8   : > { %s832_s22 = smov (!%p138_p2), 118   ;;  %s833_s23 = smov (!%p138_p2), 126  }
   0x9   : > { %s834_s24 = smov (!%p138_p2), 127   ;;  %s835_s25 = smov (!%p138_p2), 106  }
   0xb   : > { %s989_s13 = smov (!%p161_p3, %s623_s13), 3  ;;  %v810_v14 = vld [vmem:[%s985_s1 + $0x4] ss:$8 sps:$4 sm:$0xff]   ;;  %vm466_vm0 = vcmask 130048   ;;  %v836_v18 = vmov 0   ;;  %v385_v19 = vld [vmem:[%s986_s2 + $0x18] sm:$0xff] }
   0xc   : > { %s666_s14 = smul.u32 24, %s989_s13  ;;  %v813_v15 = vld [vmem:[%s985_s1 + $0x24] ss:$8 sps:$4 sm:$0xff]   ;;  %641 = vmatprep.mubr.msk.bf16.mxu0 %vm466_vm0, %v810_v14  ;;  %805 = vset.pattern.permute.xlu1 %v836_v18  ;;  %v384_v20 = vld [vmem:[%s986_s2 + $0x10] sm:$0xff]  ;;  %v389_v23 = vld [vmem:[%s986_s2 + $0x38] sm:$0xff]  ;;  %vm326_vm1 = vcmask 875520  }
   0xd   : > { %643 = vmatprep.mubr.msk.bf16.mxu1 %vm466_vm0, %v813_v15  ;;  %v382_v16 = vld [vmem:[%s986_s2] sm:$0xff]  ;;  %v383_v17 = vld [vmem:[%s986_s2 + $0x8] sm:$0xff]  ;;  %804 = vset.pattern.permute.xlu0 %v836_v18  ;;  %v388_v24 = vld [vmem:[%s986_s2 + $0x30] sm:$0xff]  ;;  %vm305_vm2 = vcmask 883712   ;;  %vm284_vm3 = vcmask 949248   ;;  %vm263_vm4 = vcmask 957440  }
   0xe   : > { %s165_s17 = scalar_lea.vmem %s984_s0, %s666_s14  ;;  %v387_v21 = vld [vmem:[%s986_s2 + $0x28] sm:$0xff]  ;;  %v386_v22 = vld [vmem:[%s986_s2 + $0x20] sm:$0xff]  ;;  %vm242_vm5 = vcmask 965632   ;;  %vm221_vm6 = vcmask 1031168   ;;  %vm200_vm7 = vcmask 1039360   ;;  %vm347_vm8 = vcmask 867328  }
   0xf   : > { %v172_v0 = vld [vmem:[%s165_s17] sm:$0xff]  ;;  %v173_v1 = vld [vmem:[%s165_s17 + $0x8] ss:$12 sps:$4 sm:$0xff]   ;;  %v174_v2 = vld [vmem:[%s165_s17 + $0xc] sm:$0xff]  ;;  %s647_s6 = sshll.u32 %s989_s13, 7 }
  0x10   : > { %v177_v3 = vunpack.c.h.bf16 %v172_v0  ;;  %v178_v4 = vunpack.c.l.bf16 %v173_v1  ;;  %v176_v5 = vunpack.c.l.bf16 %v172_v0  ;;  %v179_v6 = vunpack.c.l.bf16 %v174_v2  ;;  %s963_s9 = scalar_lea.vmem %s987_s3, %s647_s6 }
  0x11   : > { %v180_v7 = vunpack.c.h.bf16 %v174_v2  ;;  %v181_v8 = vunpack.c.h.bf16 %v173_v1  ;;  %v871_v12 = vcombine.high %v172_v0, %v174_v2  ;;  %v873_v13 = vcombine.low %v172_v0, %v174_v2 }
  0x12   : > { %v684_v9 = vpack.i.bf16 %v178_v4, %v177_v3  ;;  %v694_v10 = vpack.i.bf16 %v179_v6, %v176_v5 }
  0x13   : > { %v689_v11 = vpack.i.bf16 %v181_v8, %v180_v7 }
  0x14   : > { %685 = vrot.lane.b32.xlu0 %v684_v9, %s828_s18  ;;  %695 = vrot.lane.b32.xlu1 %v694_v10, %s828_s18 }
  0x18   : > { %690 = vrot.lane.b32.xlu0 %v689_v11, %s828_s18  ;;  %700 = vrot.lane.b32.xlu1 %v684_v9, %s829_s19 }
  0x1c   : > { %705 = vrot.lane.b32.xlu0 %v689_v11, %s829_s19  ;;  %710 = vrot.lane.b32.xlu1 %v694_v10, %s829_s19 }
  0x20   : > { %715 = vrot.lane.b32.xlu0 %v684_v9, %s830_s20  ;;  %720 = vrot.lane.b32.xlu1 %v689_v11, %s830_s20 }
  0x24   : > { %725 = vrot.lane.b32.xlu0 %v694_v10, %s830_s20  ;;  %730 = vrot.lane.b32.xlu1 %v684_v9, %s831_s21 }
  0x28   : > { %735 = vrot.lane.b32.xlu0 %v689_v11, %s831_s21  ;;  %740 = vrot.lane.b32.xlu1 %v694_v10, %s831_s21 }
  0x2c   : > { %745 = vrot.lane.b32.xlu0 %v684_v9, %s832_s22  ;;  %750 = vrot.lane.b32.xlu1 %v689_v11, %s832_s22 }
  0x30   : > { %755 = vrot.lane.b32.xlu0 %v694_v10, %s832_s22  ;;  %760 = vrot.lane.b32.xlu1 %v684_v9, %s833_s23 }
  0x34   : > { %765 = vrot.lane.b32.xlu0 %v689_v11, %s833_s23  ;;  %770 = vrot.lane.b32.xlu1 %v694_v10, %s833_s23 }
  0x38   : > { %775 = vrot.lane.b32.xlu0 %v684_v9, %s834_s24  ;;  %780 = vrot.lane.b32.xlu1 %v689_v11, %s834_s24 }
  0x3c   : > { %785 = vrot.lane.b32.xlu0 %v694_v10, %s834_s24  ;;  %790 = vrot.lane.b32.xlu1 %v684_v9, %s835_s25 }
  0x40   : > { %795 = vrot.lane.b32.xlu0 %v689_v11, %s835_s25  ;;  %800 = vrot.lane.b32.xlu1 %v694_v10, %s835_s25 }
  0x44   : > { %392 = vperm.xlu0 %804, %v382_v16   ;;  %397 = vperm.xlu1 %805, %v383_v17  }
  0x48   : > { %407 = vperm.xlu0 %804, %v385_v19   ;;  %402 = vperm.xlu1 %805, %v384_v20  }
  0x4c   : > { %417 = vperm.xlu0 %804, %v387_v21   ;;  %412 = vperm.xlu1 %805, %v386_v22  }
  0x50   : > { %427 = vperm.xlu0 %804, %v389_v23   ;;  %422 = vperm.xlu1 %805, %v388_v24  }
  0x86   : > { %v686_v25 = vpop.permute.xlu0 %685  ;;  %v696_v26 = vpop.permute.xlu1 %695 }
  0x87   : > { %v688_v27 = vunpack.i.h.bf16 %v686_v25  ;;  %v687_v28 = vunpack.i.l.bf16 %v686_v25  ;;  %v698_v29 = vunpack.i.h.bf16 %v696_v26  ;;  %v697_v30 = vunpack.i.l.bf16 %v696_v26 }
  0x89   : > { %v328_v37 = vsel %vm326_vm1, %v687_v28, %v688_v27  ;;  %v327_v39 = vsel %vm326_vm1, %v697_v30, %v687_v28 }
  0x8a   : > { %v691_v31 = vpop.permute.xlu0 %690  ;;  %v701_v32 = vpop.permute.xlu1 %700 }
  0x8b   : > { %v693_v33 = vunpack.i.h.bf16 %v691_v31  ;;  %v692_v34 = vunpack.i.l.bf16 %v691_v31  ;;  %v703_v35 = vunpack.i.h.bf16 %v701_v32  ;;  %v702_v36 = vunpack.i.l.bf16 %v701_v32 }
  0x8d   : > { %v330_v38 = vsel %vm326_vm1, %v692_v34, %v693_v33  ;;  %v329_v40 = vsel %vm326_vm1, %v698_v29, %v692_v34  ;;  %v307_v45 = vsel %vm305_vm2, %v702_v36, %v703_v35 }
  0x8e   : > { %v706_v41 = vpop.permute.xlu0 %705  ;;  %v711_v42 = vpop.permute.xlu1 %710  ;;  %v371_v43 = vpack.c.bf16 %v330_v38, %v328_v37  ;;  %v370_v44 = vpack.c.bf16 %v329_v40, %v327_v39 }
  0x8f   : > { %v708_v46 = vunpack.i.h.bf16 %v706_v41  ;;  %v707_v47 = vunpack.i.l.bf16 %v706_v41  ;;  %v713_v48 = vunpack.i.h.bf16 %v711_v42  ;;  %v712_v49 = vunpack.i.l.bf16 %v711_v42 }
  0x90   : > { %479 = vmatprep.subr.bf16.mxu0 %v371_v43  ;;  %648 = vmatprep.subr.bf16.mxu1 %v371_v43 }
  0x91   : > { %480 = vmatpush1.bf16.msra.mxu0 %v370_v44  ;;  %657 = vmatpush1.bf16.msra.mxu1 %v370_v44  ;;  %v309_v50 = vsel %vm305_vm2, %v707_v47, %v708_v46  ;;  %v306_v51 = vsel %vm305_vm2, %v712_v49, %v702_v36  ;;  %v308_v52 = vsel %vm305_vm2, %v713_v48, %v707_v47 }
  0x92   : > { %v716_v53 = vpop.permute.xlu0 %715  ;;  %v721_v54 = vpop.permute.xlu1 %720  ;;  %v369_v55 = vpack.c.bf16 %v309_v50, %v307_v45  ;;  %v368_v56 = vpack.c.bf16 %v308_v52, %v306_v51 }
  0x93   : > { %v718_v57 = vunpack.i.h.bf16 %v716_v53  ;;  %v717_v58 = vunpack.i.l.bf16 %v716_v53  ;;  %v723_v59 = vunpack.i.h.bf16 %v721_v54  ;;  %v722_v60 = vunpack.i.l.bf16 %v721_v54 }
  0x94   : > { %481 = vmatprep.subr.bf16.mxu0 %v369_v55  ;;  %649 = vmatprep.subr.bf16.mxu1 %v369_v55 }
  0x95   : > { %482 = vmatpush1.bf16.msra.mxu0 %v368_v56  ;;  %658 = vmatpush1.bf16.msra.mxu1 %v368_v56  ;;  %v286_v61 = vsel %vm284_vm3, %v717_v58, %v718_v57  ;;  %v288_v62 = vsel %vm284_vm3, %v722_v60, %v723_v59 }
  0x96   : > { %v726_v63 = vpop.permute.xlu0 %725  ;;  %v731_v0 = vpop.permute.xlu1 %730  ;;  %v367_v1 = vpack.c.bf16 %v288_v62, %v286_v61 }
  0x97   : > { %v728_v2 = vunpack.i.h.bf16 %v726_v63  ;;  %v727_v3 = vunpack.i.l.bf16 %v726_v63  ;;  %v733_v4 = vunpack.i.h.bf16 %v731_v0  ;;  %v732_v5 = vunpack.i.l.bf16 %v731_v0 }
  0x98   : > { %483 = vmatprep.subr.bf16.mxu0 %v367_v1  ;;  %650 = vmatprep.subr.bf16.mxu1 %v367_v1 }
  0x99   : > { %v285_v6 = vsel %vm284_vm3, %v727_v3, %v717_v58  ;;  %v287_v7 = vsel %vm284_vm3, %v728_v2, %v722_v60  ;;  %v265_v11 = vsel %vm263_vm4, %v732_v5, %v733_v4 }
  0x9a   : > { %v736_v8 = vpop.permute.xlu0 %735  ;;  %v741_v9 = vpop.permute.xlu1 %740  ;;  %v366_v10 = vpack.c.bf16 %v287_v7, %v285_v6 }
  0x9b   : > { %v738_v14 = vunpack.i.h.bf16 %v736_v8  ;;  %v737_v15 = vunpack.i.l.bf16 %v736_v8  ;;  %v743_v16 = vunpack.i.h.bf16 %v741_v9  ;;  %v742_v17 = vunpack.i.l.bf16 %v741_v9 }
  0x9c   : > { %484 = vmatpush1.bf16.msra.mxu0 %v366_v10  ;;  %659 = vmatpush1.bf16.msra.mxu1 %v366_v10 }
  0x9d   : > { %v267_v18 = vsel %vm263_vm4, %v737_v15, %v738_v14  ;;  %v264_v19 = vsel %vm263_vm4, %v742_v17, %v732_v5  ;;  %v266_v20 = vsel %vm263_vm4, %v743_v16, %v737_v15 }
  0x9e   : > { %v746_v21 = vpop.permute.xlu0 %745  ;;  %v751_v22 = vpop.permute.xlu1 %750  ;;  %v365_v23 = vpack.c.bf16 %v267_v18, %v265_v11  ;;  %v364_v24 = vpack.c.bf16 %v266_v20, %v264_v19 }
  0x9f   : > { %v748_v25 = vunpack.i.h.bf16 %v746_v21  ;;  %v747_v26 = vunpack.i.l.bf16 %v746_v21  ;;  %v753_v27 = vunpack.i.h.bf16 %v751_v22  ;;  %v752_v28 = vunpack.i.l.bf16 %v751_v22  ;;  %v808_v21 = vld [vmem:[%s985_s1] ss:$8 sps:$4 sm:$0xff]   ;;  %v814_v22 = vld [vmem:[%s985_s1 + $0x14] ss:$8 sps:$4 sm:$0xff]  }
  0xa0   : > { %485 = vmatprep.subr.bf16.mxu0 %v365_v23  ;;  %651 = vmatprep.subr.bf16.mxu1 %v365_v23  ;;  %v818_v23 = vld [vmem:[%s985_s1 + $0x10] ss:$8 sps:$4 sm:$0xff]  }
  0xa1   : > { %486 = vmatpush1.bf16.msra.mxu0 %v364_v24  ;;  %660 = vmatpush1.bf16.msra.mxu1 %v364_v24  ;;  %v244_v29 = vsel %vm242_vm5, %v747_v26, %v748_v25  ;;  %v246_v30 = vsel %vm242_vm5, %v752_v28, %v753_v27  ;;  %v819_v24 = vld [vmem:[%s985_s1 + $0x30] ss:$8 sps:$4 sm:$0xff]  }
  0xa2   : > { %v756_v31 = vpop.permute.xlu0 %755  ;;  %v761_v32 = vpop.permute.xlu1 %760  ;;  %v363_v33 = vpack.c.bf16 %v246_v30, %v244_v29 }
  0xa3   : > { %v758_v34 = vunpack.i.h.bf16 %v756_v31  ;;  %v757_v35 = vunpack.i.l.bf16 %v756_v31  ;;  %v763_v36 = vunpack.i.h.bf16 %v761_v32  ;;  %v762_v37 = vunpack.i.l.bf16 %v761_v32 }
  0xa4   : > { %487 = vmatprep.subr.bf16.mxu0 %v363_v33  ;;  %652 = vmatprep.subr.bf16.mxu1 %v363_v33 }
  0xa5   : > { %v243_v38 = vsel %vm242_vm5, %v757_v35, %v747_v26  ;;  %v245_v39 = vsel %vm242_vm5, %v758_v34, %v752_v28  ;;  %v223_v43 = vsel %vm221_vm6, %v762_v37, %v763_v36 }
  0xa6   : > { %v766_v40 = vpop.permute.xlu0 %765  ;;  %v771_v41 = vpop.permute.xlu1 %770  ;;  %v362_v42 = vpack.c.bf16 %v245_v39, %v243_v38 }
  0xa7   : > { %v768_v44 = vunpack.i.h.bf16 %v766_v40  ;;  %v767_v45 = vunpack.i.l.bf16 %v766_v40  ;;  %v773_v46 = vunpack.i.h.bf16 %v771_v41  ;;  %v772_v47 = vunpack.i.l.bf16 %v771_v41 }
  0xa8   : > { %488 = vmatpush1.bf16.msra.mxu0 %v362_v42  ;;  %661 = vmatpush1.bf16.msra.mxu1 %v362_v42 }
  0xa9   : > { %v225_v48 = vsel %vm221_vm6, %v767_v45, %v768_v44  ;;  %v222_v49 = vsel %vm221_vm6, %v772_v47, %v762_v37  ;;  %v224_v50 = vsel %vm221_vm6, %v773_v46, %v767_v45 }
  0xaa   : > { %v776_v51 = vpop.permute.xlu0 %775  ;;  %v781_v52 = vpop.permute.xlu1 %780  ;;  %v361_v53 = vpack.c.bf16 %v225_v48, %v223_v43  ;;  %v360_v54 = vpack.c.bf16 %v224_v50, %v222_v49 }
  0xab   : > { %v778_v55 = vunpack.i.h.bf16 %v776_v51  ;;  %v777_v56 = vunpack.i.l.bf16 %v776_v51  ;;  %v783_v57 = vunpack.i.h.bf16 %v781_v52  ;;  %v782_v58 = vunpack.i.l.bf16 %v781_v52 }
  0xac   : > { %489 = vmatprep.subr.bf16.mxu0 %v361_v53  ;;  %653 = vmatprep.subr.bf16.mxu1 %v361_v53 }
  0xad   : > { %490 = vmatpush1.bf16.msra.mxu0 %v360_v54  ;;  %662 = vmatpush1.bf16.msra.mxu1 %v360_v54  ;;  %v202_v59 = vsel %vm200_vm7, %v777_v56, %v778_v55  ;;  %v204_v60 = vsel %vm200_vm7, %v782_v58, %v783_v57 }
  0xae   : > { %v786_v61 = vpop.permute.xlu0 %785  ;;  %v791_v62 = vpop.permute.xlu1 %790  ;;  %v359_v63 = vpack.c.bf16 %v204_v60, %v202_v59 }
  0xaf   : > { %v788_v0 = vunpack.i.h.bf16 %v786_v61  ;;  %v787_v1 = vunpack.i.l.bf16 %v786_v61  ;;  %v793_v2 = vunpack.i.h.bf16 %v791_v62  ;;  %v792_v3 = vunpack.i.l.bf16 %v791_v62 }
  0xb0   : > { %491 = vmatprep.subr.bf16.mxu0 %v359_v63  ;;  %654 = vmatprep.subr.bf16.mxu1 %v359_v63 }
  0xb1   : > { %v201_v4 = vsel %vm200_vm7, %v787_v1, %v777_v56  ;;  %v203_v5 = vsel %vm200_vm7, %v788_v0, %v782_v58  ;;  %v349_v9 = vsel %vm347_vm8, %v792_v3, %v793_v2 }
  0xb2   : > { %v796_v6 = vpop.permute.xlu0 %795  ;;  %v801_v7 = vpop.permute.xlu1 %800  ;;  %v358_v8 = vpack.c.bf16 %v203_v5, %v201_v4 }
  0xb3   : > { %v798_v10 = vunpack.i.h.bf16 %v796_v6  ;;  %v797_v11 = vunpack.i.l.bf16 %v796_v6  ;;  %v803_v14 = vunpack.i.h.bf16 %v801_v7  ;;  %v802_v15 = vunpack.i.l.bf16 %v801_v7 }
  0xb4   : > { %492 = vmatpush1.bf16.msra.mxu0 %v358_v8  ;;  %663 = vmatpush1.bf16.msra.mxu1 %v358_v8 }
  0xb5   : > { %493 = vmatprep.subr.bf16.mxu0 %v871_v12  ;;  %655 = vmatprep.subr.bf16.mxu1 %v871_v12  ;;  %v351_v16 = vsel %vm347_vm8, %v797_v11, %v798_v10  ;;  %v348_v18 = vsel %vm347_vm8, %v802_v15, %v792_v3  ;;  %v350_v19 = vsel %vm347_vm8, %v803_v14, %v797_v11  ;;  %v811_v12 = vld [vmem:[%s985_s1 + $0x20] ss:$8 sps:$4 sm:$0xff]  }
  0xb6   : > { %v373_v17 = vpack.c.bf16 %v351_v16, %v349_v9  ;;  %v372_v20 = vpack.c.bf16 %v350_v19, %v348_v18 }
  0xb8   : > { %494 = vmatpush1.bf16.msra.mxu0 %v873_v13  ;;  %664 = vmatpush1.bf16.msra.mxu1 %v873_v13  ;;  %v816_v13 = vld [vmem:[%s985_s1 + $0x34] ss:$8 sps:$4 sm:$0xff]  }
  0xb9   : > { %509 = vmatprep.subr.bf16.mxu0 %v373_v17  ;;  %656 = vmatprep.subr.bf16.mxu1 %v373_v17 }
  0xbc   : > { %510 = vmatpush2.bf16.msra.mxu0 %v372_v20  ;;  %665 = vmatpush2.bf16.msra.mxu1 %v372_v20 }
  0xbf   : > { %512 = vmatmul.mubr.bf16.vlgmr.msra.gmra.mxu0 %v808_v21  ;;  %532 = vmatmul.mubr.bf16.vlgmr.msra.gmra.mxu1 %v811_v12  ;;  %v398_v25 = vpop.permute.xlu1 %397  ;;  %v393_v26 = vpop.permute.xlu0 %392 }
  0xc0   : > { %642 = vmatprep.mubr.msk.bf16.mxu0 %vm466_vm0, %v814_v22  ;;  %644 = vmatprep.mubr.msk.bf16.mxu1 %vm466_vm0, %v816_v13 }
  0xc3   : > { %v403_v27 = vpop.permute.xlu1 %402  ;;  %v408_v28 = vpop.permute.xlu0 %407 }
  0xc7   : > { %522 = vmatmul.mubr.bf16.gmra.mxu0 %v818_v23  ;;  %542 = vmatmul.mubr.bf16.gmra.mxu1 %v819_v24  ;;  %v413_v29 = vpop.permute.xlu1 %412  ;;  %v418_v36 = vpop.permute.xlu0 %417 }
  0xcb   : > { %v423_v45 = vpop.permute.xlu1 %422  ;;  %v428_v54 = vpop.permute.xlu0 %427 }
 0x17f   : > { %v513_v30 = vpop.f32.mrf.mxu0  ;;  %v533_v31 = vpop.f32.mrf.mxu1 }
 0x180   : > { %v514_v32 = vadd.f32 %v513_v30, %v393_v26  ;;  %v534_v33 = vadd.f32 %v533_v31, %v413_v29 }
 0x181   : > { %v515_v34 = vpop.f32.mrf.mxu0  ;;  %v535_v35 = vpop.f32.mrf.mxu1 }
 0x182   : > { %552 = vst [vmem:[%s963_s9] sm:$0xff] %v514_v32  ;;  %560 = vst [vmem:[%s963_s9 + $0x40] sm:$0xff] %v534_v33  ;;  %v516_v37 = vadd.f32 %v515_v34, %v393_v26  ;;  %v536_v38 = vadd.f32 %v535_v35, %v413_v29 }
 0x183   : > { %v517_v39 = vpop.f32.mrf.mxu0  ;;  %v537_v40 = vpop.f32.mrf.mxu1 }
 0x184   : > { %553 = vst [vmem:[%s963_s9 + $0x8] sm:$0xff] %v516_v37  ;;  %561 = vst [vmem:[%s963_s9 + $0x48] sm:$0xff] %v536_v38  ;;  %v518_v41 = vadd.f32 %v517_v39, %v398_v25  ;;  %v538_v42 = vadd.f32 %v537_v40, %v418_v36 }
 0x185   : > { %v519_v43 = vpop.f32.mrf.mxu0  ;;  %v539_v44 = vpop.f32.mrf.mxu1 }
 0x186   : > { %554 = vst [vmem:[%s963_s9 + $0x10] sm:$0xff] %v518_v41  ;;  %562 = vst [vmem:[%s963_s9 + $0x50] sm:$0xff] %v538_v42  ;;  %v520_v46 = vadd.f32 %v519_v43, %v398_v25  ;;  %v540_v47 = vadd.f32 %v539_v44, %v418_v36 }
 0x187   : > { %v523_v48 = vpop.f32.mrf.mxu0  ;;  %v543_v49 = vpop.f32.mrf.mxu1 }
 0x188   : > { %555 = vst [vmem:[%s963_s9 + $0x18] sm:$0xff] %v520_v46  ;;  %563 = vst [vmem:[%s963_s9 + $0x58] sm:$0xff] %v540_v47  ;;  %v524_v50 = vadd.f32 %v523_v48, %v403_v27  ;;  %v544_v51 = vadd.f32 %v543_v49, %v423_v45 }
 0x189   : > { %v525_v52 = vpop.f32.mrf.mxu0  ;;  %v545_v53 = vpop.f32.mrf.mxu1 }
 0x18a   : > { %556 = vst [vmem:[%s963_s9 + $0x20] sm:$0xff] %v524_v50  ;;  %564 = vst [vmem:[%s963_s9 + $0x60] sm:$0xff] %v544_v51  ;;  %v526_v55 = vadd.f32 %v525_v52, %v403_v27  ;;  %v546_v56 = vadd.f32 %v545_v53, %v423_v45 }
 0x18b   : > { %v527_v57 = vpop.f32.mrf.mxu0  ;;  %v547_v58 = vpop.f32.mrf.mxu1 }
 0x18c   : > { %557 = vst [vmem:[%s963_s9 + $0x28] sm:$0xff] %v526_v55  ;;  %565 = vst [vmem:[%s963_s9 + $0x68] sm:$0xff] %v546_v56  ;;  %v528_v59 = vadd.f32 %v527_v57, %v408_v28  ;;  %v548_v60 = vadd.f32 %v547_v58, %v428_v54 }
 0x18d   : > { %v529_v61 = vpop.f32.mrf.mxu0  ;;  %v549_v62 = vpop.f32.mrf.mxu1 }
 0x18e   : > { %558 = vst [vmem:[%s963_s9 + $0x30] sm:$0xff] %v528_v59  ;;  %566 = vst [vmem:[%s963_s9 + $0x70] sm:$0xff] %v548_v60  ;;  %v530_v63 = vadd.f32 %v529_v61, %v408_v28  ;;  %v550_v0 = vadd.f32 %v549_v62, %v428_v54 }
 0x190   : > { %559 = vst [vmem:[%s963_s9 + $0x38] sm:$0xff] %v530_v63  ;;  %567 = vst [vmem:[%s963_s9 + $0x78] sm:$0xff] %v550_v0 }
 0x191 PF: > { %s13_s12 = sadd.s32 1, %s826_s12  }
 0x192   : > { %p10_p4 = scmp.ge.s32.totalorder %s13_s12, 6  }
 0x194   :  { %12 = sbr.rel (!%p10_p4) target bundleno = 1 (0x1), region = 62 }

// kernel: _lambda_.11
= control target key start
LH: loop header
LB: loop body
LE: loop exit
PB: predicated region body
PF: predicated region fallthrough
CT: control target
= control target key end

     0   :  { %s1080_s12 = smov 0   ;;  %s1190_s0 = inlined_call_operand.vmem [shape: f32[4,64,256], index: 0, kind: input, shape index: {}]   ;;  %s1191_s1 = inlined_call_operand.vmem [shape: bf16[64,144], index: 1, kind: input, shape index: {}]   ;;  %s1192_s2 = inlined_call_operand.vmem [shape: f32[1,256], index: 2, kind: input, shape index: {}]   ;;  %s1193_s3 = inlined_call_operand.vmem [shape: bf16[4,16,256], index: 3, kind: output, shape index: {}]  }
   0x1 LB: > { %s762_s13 = sadd.s32 4294967295, %s1047_s12   ;;  %p766_p0 = scmp.ge.s32.totalorder %s1047_s12, 1  ;;  %s1047_s12 = sphi %s1080_s12, %s13_s12  }
   0x2   : > { %p137_p1 = scmp.lt.s32.totalorder %s1047_s12, 5 }
   0x4   : > { %p138_p2 = pnand %p766_p0, %p137_p1 }
   0x5   : > { %p161_p3 = scmp.lt.s32.totalorder (!%p138_p2), %s762_s13, 3  ;;  %p771_p4 = scmp.ne.s32.totalorder (!%p138_p2), %s762_s13, 0 }
   0x6   : > { %141 = sbr.rel (%p138_p2) target bundleno = 588 (0x24c), region = 32 }
   0xb   : > { %s162_s14 = scalar_select %p161_p3, %s762_s13, 3 }
   0xc   : > { %175 = sbr.rel (%p771_p4) target bundleno = 22 (0x16), region = 36 }
   0xd   : > { %s802_s15 = sshll.u32 %s162_s14, 7  ;;  %s803_s16 = sshll.u32 %s162_s14, 4 }
   0xe   : > { %s1091_s19 = scalar_lea.vmem %s1190_s0, %s802_s15  ;;  %s1096_s22 = scalar_lea.vmem %s1193_s3, %s803_s16 }
  0x11   : > { %v1049_v0 = vmov 0   ;;  %v1050_v1 = vmov 0.0  }
  0x12   : > { %176 = vst [vmem:[#allocation2] sm:$0xff] %v1049_v0  ;;  %177 = vst [vmem:[#allocation2 + $0x8] sm:$0xf] %v1049_v0 }
  0x13   : > { %178 = vst [vmem:[#allocation2 + $0xc] sm:$0xff] %v1049_v0  ;;  %179 = vst [vmem:[#allocation2 + $0x14] sm:$0xf] %v1049_v0 }
  0x14   : > { %180 = vst [vmem:[#allocation3 + $0x10] sm:$0xff] %v1050_v1  ;;  %181 = vst [vmem:[#allocation3] sm:$0xff] %v1050_v1 }
  0x15   : > { %182 = vst [vmem:[#allocation3 + $0x18] sm:$0xff] %v1050_v1  ;;  %183 = vst [vmem:[#allocation3 + $0x8] sm:$0xff] %v1050_v1 }
  0x16 PF: > { %s1051_s23 = smov 107   ;;  %s1052_s24 = smov 108   ;;  %v967_v14 = vld [vmem:[%s1191_s1 + $0x4] ss:$8 sps:$4 sm:$0xff]   ;;  %vm446_vm0 = vcmask 130048   ;;  %vm338_vm1 = vcmask 875520  }
  0x17   : > { %s1053_s25 = smov 116   ;;  %s1054_s26 = smov 117   ;;  %782 = vmatprep.mubr.msk.bf16.mxu0 %vm446_vm0, %v967_v14  ;;  %v973_v15 = vld [vmem:[%s1191_s1 + $0x24] ss:$8 sps:$4 sm:$0xff]   ;;  %vm317_vm2 = vcmask 883712   ;;  %vm296_vm3 = vcmask 949248  }
  0x18   : > { %s1055_s27 = smov 118   ;;  %s1056_s28 = smov 126   ;;  %784 = vmatprep.mubr.msk.bf16.mxu1 %vm446_vm0, %v973_v15  ;;  %vm275_vm4 = vcmask 957440   ;;  %vm254_vm5 = vcmask 965632   ;;  %vm233_vm6 = vcmask 1031168   ;;  %vm212_vm7 = vcmask 1039360  }
  0x19   : > { %v1098_v2 = vld [vmem:[#allocation2] sm:$0xff]  ;;  %s1057_s29 = smov 127   ;;  %s1058_s30 = smov 106   ;;  %vm359_vm8 = vcmask 867328   ;;  %vm695_vm9 = vcmask 1043544   ;;  %vm696_vm10 = vcmask 1047556  }
  0x1a   : > { %v185_v3 = vld [vmem:[#allocation2 + $0x8] ss:$12 sps:$4 sm:$0xff]   ;;  %v1100_v4 = vld [vmem:[#allocation2 + $0xc] sm:$0xff]  ;;  %v189_v5 = vunpack.c.h.bf16 %v1098_v2  ;;  %v188_v7 = vunpack.c.l.bf16 %v1098_v2  ;;  %vm688_vm11 = vcmask 89088   ;;  %vm699_vm12 = vcmask 84992   ;;  %vm697_vm13 = vmor %vm696_vm10, %vm695_vm9 }
  0x1b   : > { %v190_v6 = vunpack.c.l.bf16 %v185_v3  ;;  %v191_v8 = vunpack.c.l.bf16 %v1100_v4  ;;  %v192_v9 = vunpack.c.h.bf16 %v1100_v4  ;;  %v193_v10 = vunpack.c.h.bf16 %v185_v3 }
  0x1d   : > { %v843_v11 = vpack.i.bf16 %v190_v6, %v189_v5  ;;  %v853_v12 = vpack.i.bf16 %v191_v8, %v188_v7  ;;  %v848_v13 = vpack.i.bf16 %v193_v10, %v192_v9 }
  0x1f   : > { %844 = vrot.lane.b32.xlu0 %v843_v11, %s1051_s23  ;;  %854 = vrot.lane.b32.xlu1 %v853_v12, %s1051_s23 }
  0x23   : > { %849 = vrot.lane.b32.xlu0 %v848_v13, %s1051_s23  ;;  %859 = vrot.lane.b32.xlu1 %v843_v11, %s1052_s24 }
  0x27   : > { %864 = vrot.lane.b32.xlu0 %v848_v13, %s1052_s24  ;;  %869 = vrot.lane.b32.xlu1 %v853_v12, %s1052_s24  ;;  %s1059_s24 = smov 11  }
  0x2b   : > { %874 = vrot.lane.b32.xlu0 %v843_v11, %s1053_s25  ;;  %879 = vrot.lane.b32.xlu1 %v848_v13, %s1053_s25 }
  0x2f   : > { %884 = vrot.lane.b32.xlu0 %v853_v12, %s1053_s25  ;;  %889 = vrot.lane.b32.xlu1 %v843_v11, %s1054_s26 }
  0x33   : > { %894 = vrot.lane.b32.xlu0 %v848_v13, %s1054_s26  ;;  %899 = vrot.lane.b32.xlu1 %v853_v12, %s1054_s26 }
  0x37   : > { %904 = vrot.lane.b32.xlu0 %v843_v11, %s1055_s27  ;;  %909 = vrot.lane.b32.xlu1 %v848_v13, %s1055_s27 }
  0x3b   : > { %914 = vrot.lane.b32.xlu0 %v853_v12, %s1055_s27  ;;  %919 = vrot.lane.b32.xlu1 %v843_v11, %s1056_s28 }
  0x3f   : > { %924 = vrot.lane.b32.xlu0 %v848_v13, %s1056_s28  ;;  %929 = vrot.lane.b32.xlu1 %v853_v12, %s1056_s28 }
  0x43   : > { %934 = vrot.lane.b32.xlu0 %v843_v11, %s1057_s29  ;;  %939 = vrot.lane.b32.xlu1 %v848_v13, %s1057_s29 }
  0x47   : > { %944 = vrot.lane.b32.xlu0 %v853_v12, %s1057_s29  ;;  %949 = vrot.lane.b32.xlu1 %v843_v11, %s1058_s30 }
  0x4b   : > { %954 = vrot.lane.b32.xlu0 %v848_v13, %s1058_s30  ;;  %959 = vrot.lane.b32.xlu1 %v853_v12, %s1058_s30 }
  0x91   : > { %v845_v16 = vpop.permute.xlu0 %844  ;;  %v855_v17 = vpop.permute.xlu1 %854 }
  0x92   : > { %v847_v18 = vunpack.i.h.bf16 %v845_v16  ;;  %v846_v19 = vunpack.i.l.bf16 %v845_v16  ;;  %v857_v20 = vunpack.i.h.bf16 %v855_v17  ;;  %v856_v21 = vunpack.i.l.bf16 %v855_v17 }
  0x94   : > { %v340_v28 = vsel %vm338_vm1, %v846_v19, %v847_v18  ;;  %v339_v30 = vsel %vm338_vm1, %v856_v21, %v846_v19 }
  0x95   : > { %v850_v22 = vpop.permute.xlu0 %849  ;;  %v860_v23 = vpop.permute.xlu1 %859 }
  0x96   : > { %v852_v24 = vunpack.i.h.bf16 %v850_v22  ;;  %v851_v25 = vunpack.i.l.bf16 %v850_v22  ;;  %v862_v26 = vunpack.i.h.bf16 %v860_v23  ;;  %v861_v27 = vunpack.i.l.bf16 %v860_v23 }
  0x98   : > { %v342_v29 = vsel %vm338_vm1, %v851_v25, %v852_v24  ;;  %v341_v31 = vsel %vm338_vm1, %v857_v20, %v851_v25  ;;  %v319_v36 = vsel %vm317_vm2, %v861_v27, %v862_v26 }
  0x99   : > { %v865_v32 = vpop.permute.xlu0 %864  ;;  %v870_v33 = vpop.permute.xlu1 %869  ;;  %v383_v34 = vpack.c.bf16 %v342_v29, %v340_v28  ;;  %v382_v35 = vpack.c.bf16 %v341_v31, %v339_v30 }
  0x9a   : > { %v867_v37 = vunpack.i.h.bf16 %v865_v32  ;;  %v866_v38 = vunpack.i.l.bf16 %v865_v32  ;;  %v872_v39 = vunpack.i.h.bf16 %v870_v33  ;;  %v871_v40 = vunpack.i.l.bf16 %v870_v33 }
  0x9b   : > { %459 = vmatprep.subr.bf16.mxu0 %v383_v34  ;;  %806 = vmatprep.subr.bf16.mxu1 %v383_v34 }
  0x9c   : > { %460 = vmatpush1.bf16.msra.mxu0 %v382_v35  ;;  %815 = vmatpush1.bf16.msra.mxu1 %v382_v35  ;;  %v321_v41 = vsel %vm317_vm2, %v866_v38, %v867_v37  ;;  %v318_v42 = vsel %vm317_vm2, %v871_v40, %v861_v27  ;;  %v320_v43 = vsel %vm317_vm2, %v872_v39, %v866_v38 }
  0x9d   : > { %v875_v44 = vpop.permute.xlu0 %874  ;;  %v880_v45 = vpop.permute.xlu1 %879  ;;  %v381_v46 = vpack.c.bf16 %v321_v41, %v319_v36  ;;  %v380_v47 = vpack.c.bf16 %v320_v43, %v318_v42 }
  0x9e   : > { %v877_v48 = vunpack.i.h.bf16 %v875_v44  ;;  %v876_v49 = vunpack.i.l.bf16 %v875_v44  ;;  %v882_v50 = vunpack.i.h.bf16 %v880_v45  ;;  %v881_v51 = vunpack.i.l.bf16 %v880_v45 }
  0x9f   : > { %461 = vmatprep.subr.bf16.mxu0 %v381_v46  ;;  %807 = vmatprep.subr.bf16.mxu1 %v381_v46 }
  0xa0   : > { %462 = vmatpush1.bf16.msra.mxu0 %v380_v47  ;;  %816 = vmatpush1.bf16.msra.mxu1 %v380_v47  ;;  %v298_v52 = vsel %vm296_vm3, %v876_v49, %v877_v48  ;;  %v300_v53 = vsel %vm296_vm3, %v881_v51, %v882_v50 }
  0xa1   : > { %v885_v54 = vpop.permute.xlu0 %884  ;;  %v890_v55 = vpop.permute.xlu1 %889  ;;  %v379_v56 = vpack.c.bf16 %v300_v53, %v298_v52 }
  0xa2   : > { %v887_v57 = vunpack.i.h.bf16 %v885_v54  ;;  %v886_v58 = vunpack.i.l.bf16 %v885_v54  ;;  %v892_v59 = vunpack.i.h.bf16 %v890_v55  ;;  %v891_v60 = vunpack.i.l.bf16 %v890_v55 }
  0xa3   : > { %463 = vmatprep.subr.bf16.mxu0 %v379_v56  ;;  %808 = vmatprep.subr.bf16.mxu1 %v379_v56 }
  0xa4   : > { %v297_v61 = vsel %vm296_vm3, %v886_v58, %v876_v49  ;;  %v299_v62 = vsel %vm296_vm3, %v887_v57, %v881_v51  ;;  %v277_v3 = vsel %vm275_vm4, %v891_v60, %v892_v59 }
  0xa5   : > { %v895_v63 = vpop.permute.xlu0 %894  ;;  %v900_v0 = vpop.permute.xlu1 %899  ;;  %v378_v1 = vpack.c.bf16 %v299_v62, %v297_v61  ;;  %v773_v61 = vcombine.high %v1098_v2, %v1100_v4 }
  0xa6   : > { %v897_v5 = vunpack.i.h.bf16 %v895_v63  ;;  %v896_v6 = vunpack.i.l.bf16 %v895_v63  ;;  %v902_v7 = vunpack.i.h.bf16 %v900_v0  ;;  %v901_v8 = vunpack.i.l.bf16 %v900_v0 }
  0xa7   : > { %464 = vmatpush1.bf16.msra.mxu0 %v378_v1  ;;  %817 = vmatpush1.bf16.msra.mxu1 %v378_v1 }
  0xa8   : > { %v279_v9 = vsel %vm275_vm4, %v896_v6, %v897_v5  ;;  %v276_v10 = vsel %vm275_vm4, %v901_v8, %v891_v60  ;;  %v278_v11 = vsel %vm275_vm4, %v902_v7, %v896_v6  ;;  %v772_v8 = vcombine.low %v1098_v2, %v1100_v4  ;;  %v971_v2 = vld [vmem:[%s1191_s1 + $0x20] ss:$8 sps:$4 sm:$0xff]   ;;  %v968_v4 = vld [vmem:[%s1191_s1 + $0x14] ss:$8 sps:$4 sm:$0xff]  }
  0xa9   : > { %v905_v12 = vpop.permute.xlu0 %904  ;;  %v910_v13 = vpop.permute.xlu1 %909  ;;  %v377_v14 = vpack.c.bf16 %v279_v9, %v277_v3  ;;  %v376_v15 = vpack.c.bf16 %v278_v11, %v276_v10 }
  0xaa   : > { %v907_v16 = vunpack.i.h.bf16 %v905_v12  ;;  %v906_v17 = vunpack.i.l.bf16 %v905_v12  ;;  %v912_v18 = vunpack.i.h.bf16 %v910_v13  ;;  %v911_v19 = vunpack.i.l.bf16 %v910_v13 }
  0xab   : > { %465 = vmatprep.subr.bf16.mxu0 %v377_v14  ;;  %809 = vmatprep.subr.bf16.mxu1 %v377_v14  ;;  %v965_v14 = vld [vmem:[%s1191_s1] ss:$8 sps:$4 sm:$0xff]  }
  0xac   : > { %466 = vmatpush1.bf16.msra.mxu0 %v376_v15  ;;  %818 = vmatpush1.bf16.msra.mxu1 %v376_v15  ;;  %v256_v20 = vsel %vm254_vm5, %v906_v17, %v907_v16  ;;  %v258_v21 = vsel %vm254_vm5, %v911_v19, %v912_v18  ;;  %v974_v15 = vld [vmem:[%s1191_s1 + $0x34] ss:$8 sps:$4 sm:$0xff]   ;;  %v970_v16 = vld [vmem:[%s1191_s1 + $0x10] ss:$8 sps:$4 sm:$0xff]   ;;  %v386_v18 = vld [vmem:[%s1091_s19] sm:$0xff] }
  0xad   : > { %v915_v22 = vpop.permute.xlu0 %914  ;;  %v920_v23 = vpop.permute.xlu1 %919  ;;  %v375_v24 = vpack.c.bf16 %v258_v21, %v256_v20  ;;  %v387_v20 = vld [vmem:[%s1091_s19 + $0x8] sm:$0xff] }
  0xae   : > { %v917_v25 = vunpack.i.h.bf16 %v915_v22  ;;  %v916_v26 = vunpack.i.l.bf16 %v915_v22  ;;  %v922_v27 = vunpack.i.h.bf16 %v920_v23  ;;  %v921_v28 = vunpack.i.l.bf16 %v920_v23 }
  0xaf   : > { %467 = vmatprep.subr.bf16.mxu0 %v375_v24  ;;  %810 = vmatprep.subr.bf16.mxu1 %v375_v24  ;;  %v388_v24 = vld [vmem:[%s1091_s19 + $0x10] sm:$0xff] }
  0xb0   : > { %v255_v29 = vsel %vm254_vm5, %v916_v26, %v906_v17  ;;  %v257_v30 = vsel %vm254_vm5, %v917_v25, %v911_v19  ;;  %v235_v34 = vsel %vm233_vm6, %v921_v28, %v922_v27  ;;  %v976_v17 = vld [vmem:[%s1191_s1 + $0x30] ss:$8 sps:$4 sm:$0xff]  }
  0xb1   : > { %v925_v31 = vpop.permute.xlu0 %924  ;;  %v930_v32 = vpop.permute.xlu1 %929  ;;  %v374_v33 = vpack.c.bf16 %v257_v30, %v255_v29  ;;  %v389_v29 = vld [vmem:[%s1091_s19 + $0x18] sm:$0xff] }
  0xb2   : > { %v927_v35 = vunpack.i.h.bf16 %v925_v31  ;;  %v926_v36 = vunpack.i.l.bf16 %v925_v31  ;;  %v932_v37 = vunpack.i.h.bf16 %v930_v32  ;;  %v931_v38 = vunpack.i.l.bf16 %v930_v32 }
  0xb3   : > { %468 = vmatpush1.bf16.msra.mxu0 %v374_v33  ;;  %819 = vmatpush1.bf16.msra.mxu1 %v374_v33 }
  0xb4   : > { %v237_v39 = vsel %vm233_vm6, %v926_v36, %v927_v35  ;;  %v234_v40 = vsel %vm233_vm6, %v931_v38, %v921_v28  ;;  %v236_v41 = vsel %vm233_vm6, %v932_v37, %v926_v36 }
  0xb5   : > { %v935_v42 = vpop.permute.xlu0 %934  ;;  %v940_v43 = vpop.permute.xlu1 %939  ;;  %v373_v44 = vpack.c.bf16 %v237_v39, %v235_v34  ;;  %v372_v45 = vpack.c.bf16 %v236_v41, %v234_v40  ;;  %v390_v34 = vld [vmem:[%s1091_s19 + $0x20] sm:$0xff]  ;;  %v391_v39 = vld [vmem:[%s1091_s19 + $0x28] sm:$0xff] }
  0xb6   : > { %v937_v46 = vunpack.i.h.bf16 %v935_v42  ;;  %v936_v47 = vunpack.i.l.bf16 %v935_v42  ;;  %v942_v48 = vunpack.i.h.bf16 %v940_v43  ;;  %v941_v49 = vunpack.i.l.bf16 %v940_v43 }
  0xb7   : > { %469 = vmatprep.subr.bf16.mxu0 %v373_v44  ;;  %811 = vmatprep.subr.bf16.mxu1 %v373_v44  ;;  %v392_v44 = vld [vmem:[%s1091_s19 + $0x30] sm:$0xff] }
  0xb8   : > { %470 = vmatpush1.bf16.msra.mxu0 %v372_v45  ;;  %820 = vmatpush1.bf16.msra.mxu1 %v372_v45  ;;  %v214_v50 = vsel %vm212_vm7, %v936_v47, %v937_v46  ;;  %v216_v51 = vsel %vm212_vm7, %v941_v49, %v942_v48  ;;  %v393_v48 = vld [vmem:[%s1091_s19 + $0x38] sm:$0xff] }
  0xb9   : > { %v945_v52 = vpop.permute.xlu0 %944  ;;  %v950_v53 = vpop.permute.xlu1 %949  ;;  %v371_v54 = vpack.c.bf16 %v216_v51, %v214_v50  ;;  %v394_v51 = vld [vmem:[%s1091_s19 + $0x40] sm:$0xff] }
  0xba   : > { %v947_v55 = vunpack.i.h.bf16 %v945_v52  ;;  %v946_v56 = vunpack.i.l.bf16 %v945_v52  ;;  %v952_v57 = vunpack.i.h.bf16 %v950_v53  ;;  %v951_v58 = vunpack.i.l.bf16 %v950_v53  ;;  %v398_v52 = vld [vmem:[%s1091_s19 + $0x60] sm:$0xff] }
  0xbb   : > { %471 = vmatprep.subr.bf16.mxu0 %v371_v54  ;;  %812 = vmatprep.subr.bf16.mxu1 %v371_v54 }
  0xbc   : > { %v213_v59 = vsel %vm212_vm7, %v946_v56, %v936_v47  ;;  %v215_v60 = vsel %vm212_vm7, %v947_v55, %v941_v49  ;;  %v361_v1 = vsel %vm359_vm8, %v951_v58, %v952_v57  ;;  %v395_v55 = vld [vmem:[%s1091_s19 + $0x48] sm:$0xff] }
  0xbd   : > { %v955_v62 = vpop.permute.xlu0 %954  ;;  %v960_v63 = vpop.permute.xlu1 %959  ;;  %v370_v0 = vpack.c.bf16 %v215_v60, %v213_v59  ;;  %v399_v56 = vld [vmem:[%s1091_s19 + $0x68] sm:$0xff]  ;;  %v396_v59 = vld [vmem:[%s1091_s19 + $0x50] sm:$0xff] }
  0xbe   : > { %v957_v3 = vunpack.i.h.bf16 %v955_v62  ;;  %v956_v5 = vunpack.i.l.bf16 %v955_v62  ;;  %v962_v6 = vunpack.i.h.bf16 %v960_v63  ;;  %v961_v7 = vunpack.i.l.bf16 %v960_v63  ;;  %v400_v60 = vld [vmem:[%s1091_s19 + $0x70] sm:$0xff]  ;;  %v397_v62 = vld [vmem:[%s1091_s19 + $0x58] sm:$0xff] }
  0xbf   : > { %472 = vmatpush1.bf16.msra.mxu0 %v370_v0  ;;  %821 = vmatpush1.bf16.msra.mxu1 %v370_v0 }
  0xc0   : > { %473 = vmatprep.subr.bf16.mxu0 %v773_v61  ;;  %813 = vmatprep.subr.bf16.mxu1 %v773_v61  ;;  %v363_v9 = vsel %vm359_vm8, %v956_v5, %v957_v3  ;;  %v360_v11 = vsel %vm359_vm8, %v961_v7, %v951_v58  ;;  %v362_v12 = vsel %vm359_vm8, %v962_v6, %v956_v5 }
  0xc1   : > { %v385_v10 = vpack.c.bf16 %v363_v9, %v361_v1  ;;  %v384_v13 = vpack.c.bf16 %v362_v12, %v360_v11 }
  0xc3   : > { %474 = vmatpush1.bf16.msra.mxu0 %v772_v8  ;;  %822 = vmatpush1.bf16.msra.mxu1 %v772_v8 }
  0xc4   : > { %489 = vmatprep.subr.bf16.mxu0 %v385_v10  ;;  %814 = vmatprep.subr.bf16.mxu1 %v385_v10 }
  0xc7   : > { %490 = vmatpush2.bf16.msra.mxu0 %v384_v13  ;;  %823 = vmatpush2.bf16.msra.mxu1 %v384_v13 }
  0xca   : > { %492 = vmatmul.mubr.bf16.vlgmr.msra.gmra.mxu0 %v965_v14  ;;  %512 = vmatmul.mubr.bf16.vlgmr.msra.gmra.mxu1 %v971_v2 }
  0xcb   : > { %783 = vmatprep.mubr.msk.bf16.mxu0 %vm446_vm0, %v968_v4  ;;  %785 = vmatprep.mubr.msk.bf16.mxu1 %vm446_vm0, %v974_v15  ;;  %v401_v4 = vld [vmem:[%s1091_s19 + $0x78] sm:$0xff] }
  0xd2   : > { %502 = vmatmul.mubr.bf16.gmra.mxu0 %v970_v16  ;;  %522 = vmatmul.mubr.bf16.gmra.mxu1 %v976_v17 }
 0x18a   : > { %v493_v19 = vpop.f32.mrf.mxu0  ;;  %v513_v21 = vpop.f32.mrf.mxu1 }
 0x18b   : > { %v532_v22 = vadd.f32 %v493_v19, %v386_v18  ;;  %v540_v61 = vadd.f32 %v513_v21, %v394_v51 }
 0x18c   : > { %v495_v23 = vpop.f32.mrf.mxu0  ;;  %v515_v25 = vpop.f32.mrf.mxu1 }
 0x18d   : > { %v786_v26 = vmul.f32 -1.442695, %v532_v22  ;;  %v533_v27 = vadd.f32 %v495_v23, %v387_v20  ;;  %v541_v1 = vadd.f32 %v515_v25, %v395_v55 }
 0x18e   : > { %v497_v28 = vpop.f32.mrf.mxu0  ;;  %v517_v30 = vpop.f32.mrf.mxu1 }
 0x18f   : > { %v787_v31 = vmul.f32 -1.442695, %v533_v27  ;;  %v534_v32 = vadd.f32 %v497_v28, %v388_v24  ;;  %977 = vpow2.f32 %v786_v26  ;;  %v542_v6 = vadd.f32 %v517_v30, %v396_v59 }
 0x190   : > { %v499_v33 = vpop.f32.mrf.mxu0  ;;  %v519_v35 = vpop.f32.mrf.mxu1  ;;  %v642_v28 = vlaneseq }
 0x191   : > { %v788_v36 = vmul.f32 -1.442695, %v534_v32  ;;  %v535_v37 = vadd.f32 %v499_v33, %v389_v29  ;;  %979 = vpow2.f32 %v787_v31  ;;  %v543_v8 = vadd.f32 %v519_v35, %v397_v62 }
 0x192   : > { %v503_v38 = vpop.f32.mrf.mxu0  ;;  %v523_v42 = vpop.f32.mrf.mxu1 }
 0x193   : > { %v789_v40 = vmul.f32 -1.442695, %v535_v37  ;;  %v536_v41 = vadd.f32 %v503_v38, %v390_v34  ;;  %981 = vpow2.f32 %v788_v36  ;;  %v544_v63 = vadd.f32 %v523_v42, %v398_v52  ;;  %v624_v42 = vld [vmem:[%s1192_s2] sm:$0x3] }
 0x194   : > { %v505_v43 = vpop.f32.mrf.mxu0  ;;  %v525_v53 = vpop.f32.mrf.mxu1  ;;  %v643_v34 = vshrl.u32 %v642_v28, 7 }
 0x195   : > { %v790_v45 = vmul.f32 -1.442695, %v536_v41  ;;  %v537_v46 = vadd.f32 %v505_v43, %v391_v39  ;;  %983 = vpow2.f32 %v789_v40  ;;  %v545_v3 = vadd.f32 %v525_v53, %v399_v56  ;;  %v625_v41 = vld [vmem:[#allocation3 + $0x10] sm:$0xff]  ;;  %v627_v53 = vld [vmem:[#allocation3 + $0x18] sm:$0xff] }
 0x196   : > { %v507_v47 = vpop.f32.mrf.mxu0  ;;  %v527_v5 = vpop.f32.mrf.mxu1  ;;  %v794_v10 = vmul.f32 -1.442695, %v544_v63  ;;  %v644_v39 = vsub.s32 0, %v643_v34 }
 0x197   : > { %985 = vpow2.f32 %v790_v45  ;;  %v791_v49 = vmul.f32 -1.442695, %v537_v46  ;;  %v538_v50 = vadd.f32 %v507_v47, %v392_v44  ;;  %v546_v7 = vadd.f32 %v527_v5, %v400_v60  ;;  %v626_v46 = vld [vmem:[#allocation3] sm:$0xff]  ;;  %v628_v60 = vld [vmem:[#allocation3 + $0x8] sm:$0xff] }
 0x198   : > { %v509_v54 = vpop.f32.mrf.mxu0  ;;  %v795_v12 = vmul.f32 -1.442695, %v545_v3  ;;  %v529_v15 = vpop.f32.mrf.mxu1  ;;  %v648_v44 = vsub.s32 1, %v643_v34  ;;  %v645_v51 = vrot.slane %v624_v42, %v644_v39 }
 0x199   : > { %987 = vpow2.f32 %v791_v49  ;;  %v792_v57 = vmul.f32 -1.442695, %v538_v50  ;;  %v539_v58 = vadd.f32 %v509_v54, %v393_v48  ;;  %v796_v13 = vmul.f32 -1.442695, %v546_v7 }
 0x19a   : > { %v547_v20 = vadd.f32 %v529_v15, %v401_v4 }
 0x19b   : > { %989 = vpow2.f32 %v792_v57  ;;  %v793_v0 = vmul.f32 -1.442695, %v539_v58  ;;  %v649_v58 = vrot.slane %v624_v42, %v648_v44 }
 0x19c   : > { %v978_v9 = vpop.eup %977  ;;  %v797_v26 = vmul.f32 -1.442695, %v547_v20 }
 0x19d   : > { %991 = vpow2.f32 %v793_v0  ;;  %v560_v2 = vadd.f32 1.0, %v978_v9 }
 0x19e   : > { %993 = vtanh.f32 %v540_v61  ;;  %v980_v11 = vpop.eup %979 }
 0x19f   : > { %995 = vtanh.f32 %v541_v1  ;;  %v561_v16 = vadd.f32 1.0, %v980_v11 }
 0x1a0   : > { %997 = vtanh.f32 %v542_v6  ;;  %v982_v14 = vpop.eup %981 }
 0x1a1   : > { %999 = vtanh.f32 %v543_v8  ;;  %v562_v19 = vadd.f32 1.0, %v982_v14 }
 0x1a2   : > { %1001 = vpow2.f32 %v794_v10  ;;  %v984_v17 = vpop.eup %983 }
 0x1a3   : > { %1003 = vpow2.f32 %v795_v12  ;;  %v563_v23 = vadd.f32 1.0, %v984_v17 }
 0x1a4   : > { %v986_v18 = vpop.eup %985  ;;  %1005 = vpow2.f32 %v796_v13 }
 0x1a5   : > { %1007 = vrcp.f32 %v560_v2  ;;  %v584_v21 = vadd.f32 1.0, %v986_v18 }
 0x1a6   : > { %v988_v22 = vpop.eup %987  ;;  %1009 = vrcp.f32 %v561_v16 }
 0x1a7   : > { %1011 = vrcp.f32 %v584_v21  ;;  %v585_v24 = vadd.f32 1.0, %v988_v22 }
 0x1a8   : > { %v990_v25 = vpop.eup %989  ;;  %1013 = vrcp.f32 %v562_v19 }
 0x1a9   : > { %1015 = vrcp.f32 %v585_v24  ;;  %v586_v27 = vadd.f32 1.0, %v990_v25 }
 0x1aa   : > { %v992_v29 = vpop.eup %991  ;;  %1017 = vrcp.f32 %v563_v23 }
 0x1ab   : > { %v994_v30 = vpop.eup %993  ;;  %1019 = vrcp.f32 %v586_v27  ;;  %v587_v31 = vadd.f32 1.0, %v992_v29 }
 0x1ac   : > { %v996_v32 = vpop.eup %995  ;;  %1021 = vpow2.f32 %v797_v26 }
 0x1ad   : > { %v998_v33 = vpop.eup %997  ;;  %1023 = vrcp.f32 %v587_v31 }
 0x1ae   : > { %v1000_v35 = vpop.eup %999 }
 0x1af   : > { %v1002_v36 = vpop.eup %1001 }
 0x1b0   : > { %v1004_v37 = vpop.eup %1003  ;;  %v612_v47 = vadd.f32 1.0, %v1002_v36 }
 0x1b1   : > { %v1006_v38 = vpop.eup %1005  ;;  %v613_v61 = vadd.f32 1.0, %v1004_v37 }
 0x1b2   : > { %v1008_v40 = vpop.eup %1007  ;;  %1025 = vrcp.f32 %v612_v47  ;;  %v614_v7 = vadd.f32 1.0, %v1006_v38 }
 0x1b3   : > { %v1010_v43 = vpop.eup %1009  ;;  %v633_v50 = vmul.f32 %v1008_v40, %v994_v30 }
 0x1b4   : > { %v1012_v45 = vpop.eup %1011  ;;  %v634_v57 = vmul.f32 %v1010_v43, %v996_v32 }
 0x1b5   : > { %v1014_v48 = vpop.eup %1013  ;;  %v629_v49 = vmul.f32 %v1012_v45, %v625_v41 }
 0x1b6   : > { %v1016_v52 = vpop.eup %1015  ;;  %v635_v1 = vmul.f32 %v1014_v48, %v998_v33 }
 0x1b7   : > { %v1018_v54 = vpop.eup %1017  ;;  %v637_v55 = vadd.f32 %v633_v50, %v629_v49  ;;  %v630_v56 = vmul.f32 %v1016_v52, %v626_v46 }
 0x1b8   : > { %v1020_v59 = vpop.eup %1019  ;;  %v636_v6 = vmul.f32 %v1018_v54, %v1000_v35 }
 0x1b9   : > { %v1022_v62 = vpop.eup %1021  ;;  %v638_v63 = vadd.f32 %v634_v57, %v630_v56  ;;  %v631_v0 = vmul.f32 %v1020_v59, %v627_v53  ;;  %v652_v3 = vmul.f32 %v645_v51, %v637_v55 }
 0x1ba   : > { %v1024_v5 = vpop.eup %1023  ;;  %v615_v11 = vadd.f32 1.0, %v1022_v62 }
 0x1bb   : > { %v639_v8 = vadd.f32 %v635_v1, %v631_v0  ;;  %v632_v9 = vmul.f32 %v1024_v5, %v628_v60  ;;  %v653_v10 = vmul.f32 %v649_v58, %v638_v63  ;;  %1027 = vtanh.f32 %v652_v3  ;;  %668 = vst [vmem:[#allocation3 + $0x10] sm:$0xff] %v652_v3 }
 0x1bc   : > { %1029 = vrcp.f32 %v613_v61 }
 0x1bd   : > { %v640_v12 = vadd.f32 %v636_v6, %v632_v9  ;;  %1031 = vtanh.f32 %v653_v10  ;;  %669 = vst [vmem:[#allocation3] sm:$0xff] %v653_v10  ;;  %v654_v13 = vmul.f32 %v645_v51, %v639_v8 }
 0x1be   : > { %1033 = vrcp.f32 %v614_v7 }
 0x1bf   : > { %v655_v14 = vmul.f32 %v649_v58, %v640_v12  ;;  %670 = vst [vmem:[#allocation3 + $0x18] sm:$0xff] %v654_v13  ;;  %1035 = vtanh.f32 %v654_v13  ;;  %v1026_v2 = vpop.eup %1025 }
 0x1c0   : > { %1037 = vrcp.f32 %v615_v11 }
 0x1c1   : > { %671 = vst [vmem:[#allocation3 + $0x8] sm:$0xff] %v655_v14  ;;  %1039 = vtanh.f32 %v655_v14 }
 0x1c8   : > { %v1028_v4 = vpop.eup %1027 }
 0x1c9   : > { %v1030_v15 = vpop.eup %1029  ;;  %v660_v16 = vmul.f32 %v1028_v4, %v1026_v2 }
 0x1ca   : > { %v1032_v17 = vpop.eup %1031 }
 0x1cb   : > { %v1034_v18 = vpop.eup %1033  ;;  %v661_v19 = vmul.f32 %v1032_v17, %v1030_v15  ;;  %v664_v22 = vmul.f32 %v660_v16, %v645_v51 }
 0x1cc   : > { %v1036_v20 = vpop.eup %1035 }
 0x1cd   : > { %v1038_v21 = vpop.eup %1037  ;;  %v665_v23 = vmul.f32 %v661_v19, %v649_v58  ;;  %v662_v24 = vmul.f32 %v1036_v20, %v1034_v18 }
 0x1ce   : > { %v1040_v25 = vpop.eup %1039 }
 0x1cf   : > { %v804_v26 = vpack.c.bf16 %v665_v23, %v664_v22  ;;  %v663_v27 = vmul.f32 %v1040_v25, %v1038_v21  ;;  %v666_v28 = vmul.f32 %v662_v24, %v645_v51 }
 0x1d1   : > { %682 = vrot.lane.b32.xlu0 %v804_v26, %s1059_s24  ;;  %705 = vst [vmem:[%s1096_s22] sm:$0xff] %v804_v26  ;;  %v667_v29 = vmul.f32 %v663_v27, %v649_v58 }
 0x1d3   : > { %v805_v30 = vpack.c.bf16 %v667_v29, %v666_v28 }
 0x1d5   : > { %684 = vrot.lane.b32.xlu1 %v805_v30, %s1059_s24  ;;  %706 = vst [vmem:[%s1096_s22 + $0x8] sm:$0xff] %v805_v30 }
 0x243   : > { %v683_v31 = vpop.permute.xlu0 %682 }
 0x244   : > { %v686_v32 = vrot.slane %v683_v31, 4 }
 0x246   : > { %v689_v33 = vsel %vm688_vm11, %v686_v32, %v683_v31  ;;  %700 = vst.msk [vmem:[#allocation2 + $0x8] sm:$0xf] %vm699_vm12, %v686_v32 }
 0x247   : > { %698 = vst.msk [vmem:[#allocation2] sm:$0xff] %vm697_vm13, %v689_v33  ;;  %v685_v34 = vpop.permute.xlu1 %684 }
 0x248   : > { %v687_v35 = vrot.slane %v685_v34, 4 }
 0x24a   : > { %v690_v36 = vsel %vm688_vm11, %v687_v35, %v685_v34  ;;  %702 = vst.msk [vmem:[#allocation2 + $0x14] sm:$0xf] %vm699_vm12, %v687_v35 }
 0x24b   : > { %701 = vst.msk [vmem:[#allocation2 + $0xc] sm:$0xff] %vm697_vm13, %v690_v36 }
 0x24c PF: > { %s13_s12 = sadd.s32 1, %s1047_s12  }
 0x24d   : > { %p10_p5 = scmp.ge.s32.totalorder %s13_s12, 6  }
 0x24f   :  { %12 = sbr.rel (!%p10_p5) target bundleno = 1 (0x1), region = 66 }

</bundles_post_ra>
